<compile_context>
chip_gen: v7x
topology: tpu7x:2x2x1
jax: 0.10.0
libtpu: 0.0.40
codegen_flags: <defaults>
</compile_context>

<pallas_src>
import math

import jax
import jax.numpy as jnp
from jax import lax
from jax.experimental import pallas as pl
from jax.experimental.pallas import tpu as pltpu

KSIZE = 5  # 5x5 conv, stride 2, pad 2 everywhere (as in the PyTorch module)


# ----------------------------------------------------------------------------
# Fused Pallas kernel (built per static config, fully unrolled)
# ----------------------------------------------------------------------------
def _build_fused_kernel(cfg):
    n_hidden = cfg["n_hidden"]
    chans = cfg["chans"]            # (1, 64, 128, ...)  len == n_hidden + 1
    hs, ws = cfg["hs"], cfg["ws"]   # hs[k], ws[k] = input spatial of layer k
    acts = cfg["task_activations"]
    labels = cfg["task_labels"]
    n_tasks = len(labels)
    lpad = cfg["lpad"]              # lane-padded merged head width (mult of 128)

    def kernel(*refs):
        x_ref = refs[0]
        pos = 1
        layer_refs = []
        for _ in range(n_hidden):
            layer_refs.append(refs[pos:pos + 3])
            pos += 3
        wh_ref, bh_ref = refs[pos], refs[pos + 1]
        pos += 2
        out_ref = refs[pos]
        pos += 1
        pad_refs = refs[pos:pos + n_hidden - 1]

        # ---- layer 0: stride-2 conv from phase-split padded input (VPU) ----
        w_ref, s_ref, b_ref = layer_refs[0]
        H1, W1, C1 = hs[1], ws[1], chans[1]
        acc = jnp.zeros((H1, W1, C1), jnp.float32)
        for i in range(KSIZE):
            for j in range(KSIZE):
                p = (i % 2) * 2 + (j % 2)
                tap = i * KSIZE + j
                # contiguous static window of the (i%2, j%2) phase plane
                slab = x_ref[0, p, i // 2:i // 2 + H1, j // 2:j // 2 + W1, :]  # (H1, W1, 1)
                acc = acc + slab * w_ref[tap:tap + 1, :]                       # -> (H1, W1, C1)
        h = jnp.maximum(acc * s_ref[...] + b_ref[...], 0.0)                    # folded BN + ReLU

        # stage layer-0 output into layer-1's zero-padded VMEM scratch
        pad_refs[0][...] = jnp.zeros(pad_refs[0].shape, pad_refs[0].dtype)
        pad_refs[0][2:2 + H1, 2:2 + W1, :] = h

        feat = None
        # ---- layers 1..n-1: stride-1 conv as 25 contiguous-slab matmuls ----
        for k in range(1, n_hidden):
            w_ref, s_ref, b_ref = layer_refs[k]
            pad_ref = pad_refs[k - 1]
            Hin, Win, Cin, Cout = hs[k], ws[k], chans[k], chans[k + 1]
            Mrows = Hin * Win
            acc = jnp.zeros((Mrows, Cout), jnp.float32)
            for i in range(KSIZE):
                for j in range(KSIZE):
                    slab = pad_ref[i:i + Hin, j:j + Win, :]                 # (Hin, Win, Cin)
                    slab = slab.reshape(Mrows, Cin).astype(jnp.bfloat16)    # bf16 MXU operand
                    acc = acc + jnp.dot(slab, w_ref[i * KSIZE + j],
                                        preferred_element_type=jnp.float32)
            y = jnp.maximum(acc * s_ref[...] + b_ref[...], 0.0)             # (Hin*Win, Cout)

            Hout, Wout = hs[k + 1], ws[k + 1]
            if k < n_hidden - 1:
                # keep only the stride-2 positions and stage into next scratch.
                # TODO(synk): per-position stores; fine for the small spatial
                # sizes that remain after multiple stride-2 layers.
                nref = pad_refs[k]
                nref[...] = jnp.zeros(nref.shape, nref.dtype)
                for a in range(Hout):
                    for b2 in range(Wout):
                        nref[2 + a, 2 + b2, :] = y[2 * a * Win + 2 * b2, :]
            else:
                # fused global max-pool over the stride-2 output grid
                rowmax = y[0:Win, :]
                for a in range(1, Hout):
                    rowmax = jnp.maximum(rowmax, y[2 * a * Win:2 * a * Win + Win, :])
                feat = rowmax[0:1, :]
                for b2 in range(1, Wout):
                    feat = jnp.maximum(feat, rowmax[2 * b2:2 * b2 + 1, :])

        # ---- merged task heads: one lane-padded matmul, masked activations --
        z = jnp.dot(feat, wh_ref[...], preferred_element_type=jnp.float32) + bh_ref[...]
        col = lax.broadcasted_iota(jnp.int32, (1, lpad), 1)
        neg_inf = jnp.float32(-jnp.inf)
        row = jnp.zeros((1, lpad), jnp.float32)
        start = 0
        for t in range(n_tasks):
            L = labels[t]
            mask = jnp.logical_and(col >= start, col < start + L)
            if acts[t] == "softmax":          # F.log_softmax(dim=-1) within the task slice
                zm = jnp.where(mask, z, neg_inf)
                m = jnp.max(zm, axis=-1, keepdims=True)
                e = jnp.exp(jnp.where(mask, z - m, neg_inf))
                val = (z - m) - jnp.log(jnp.sum(e, axis=-1, keepdims=True))
            else:                              # 'sigmoid' (EUP recip path)
                val = pl.reciprocal(1.0 + jnp.exp(-z), approx=True)
            row = jnp.where(mask, val, row)
            start += L
        out_ref[0] = row                       # single unmasked (1, 128) lane-dense store

    return kernel


# ----------------------------------------------------------------------------
# Static config + parameter preparation
# ----------------------------------------------------------------------------
def _make_config(n_hidden, seq_len, mel_bins, task_label_counts, task_activations):
    if n_hidden < 2:
        # TODO(synk): n_hidden < 2 fused path not implemented.
        raise NotImplementedError("fused kernel requires n_hidden >= 2")
    if seq_len % 2 or mel_bins % 2:
        # TODO(synk): odd seq_len / mel_bins need an extra padding row/col.
        raise NotImplementedError("fused kernel requires even seq_len / mel_bins")
    chans = [1] + [2 ** (6 + k) for k in range(n_hidden)]
    hs, ws = [seq_len], [mel_bins]
    for _ in range(n_hidden):
        hs.append((hs[-1] - 1) // 2 + 1)
        ws.append((ws[-1] - 1) // 2 + 1)
    ltot = sum(task_label_counts)
    lpad = max(128, ((ltot + 127) // 128) * 128)   # lane-dense merged head width
    return dict(
        n_hidden=n_hidden,
        chans=tuple(chans),
        hs=tuple(hs),
        ws=tuple(ws),
        task_labels=tuple(task_label_counts),
        task_activations=tuple(task_activations),
        lpad=lpad,
    )


def prepare_fused_params(params, cfg):
    """Re-layout PyTorch-style params for the fused kernel."""
    n_hidden = cfg["n_hidden"]
    layers = []
    for k in range(n_hidden):
        w = params["convs"][k]                                   # (Cout, Cin, 5, 5)
        cout, cin, kh, kw = w.shape
        wm = jnp.transpose(w, (2, 3, 1, 0)).reshape(kh * kw, cin, cout)
        if k == 0:
            wm = wm.reshape(kh * kw, cout).astype(jnp.float32)   # Cin == 1 -> VPU path (f32)
        else:
            wm = wm.astype(jnp.bfloat16)                          # bf16 MXU operands
        scale, bias = params["bns"][k]
        layers.append((wm,
                       scale.reshape(1, cout).astype(jnp.float32),
                       bias.reshape(1, cout).astype(jnp.float32)))
    # merged, pre-transposed, zero-padded task heads: (C, LPAD), (1, LPAD)
    ltot = sum(cfg["task_labels"])
    lpad = cfg["lpad"]
    head_w = jnp.concatenate([w.T for (w, _) in params["heads"]], axis=1).astype(jnp.float32)
    head_b = jnp.concatenate([b for (_, b) in params["heads"]]).reshape(1, -1).astype(jnp.float32)
    head_w = jnp.pad(head_w, ((0, 0), (0, lpad - ltot)))
    head_b = jnp.pad(head_b, ((0, 0), (0, lpad - ltot)))
    return {"layers": layers, "head_w": head_w, "head_b": head_b}


# ----------------------------------------------------------------------------
# Forward pass: one fused pallas_call, gridded over batch
# ----------------------------------------------------------------------------
def baseline_cnn_forward(fused, cfg, x_bsm):
    n_hidden = cfg["n_hidden"]
    B, S, Mel = x_bsm.shape
    assert S == cfg["hs"][0] and Mel == cfg["ws"][0]
    labels = cfg["task_labels"]
    lpad = cfg["lpad"]

    # pad once and phase-split (pure relayout, no im2col expansion in HBM):
    #   xps[b, 2*pi+pj, si, sj, 0] == x_pad[b, 2*si+pi, 2*sj+pj]
    xp = jnp.pad(x_bsm.astype(jnp.float32), ((0, 0), (2, 2), (2, 2)))
    Hp, Wp = S + 4, Mel + 4
    xps = xp.reshape(B, Hp // 2, 2, Wp // 2, 2).transpose(0, 2, 4, 1, 3)
    xps = xps.reshape(B, 4, Hp // 2, Wp // 2)[..., None]

    def const_spec(arr):
        nd = arr.ndim
        return pl.BlockSpec(arr.shape, lambda b, _n=nd: (0,) * _n)

    inputs = [xps]
    in_specs = [pl.BlockSpec((1, 4, Hp // 2, Wp // 2, 1),
                             lambda b: (b, 0, 0, 0, 0))]
    for (w, s, bb) in fused["layers"]:
        inputs += [w, s, bb]
        in_specs += [const_spec(w), const_spec(s), const_spec(bb)]
    inputs += [fused["head_w"], fused["head_b"]]
    in_specs += [const_spec(fused["head_w"]), const_spec(fused["head_b"])]

    # single lane-dense merged output: (B, 1, LPAD), one unmasked store/step
    out_shape = jax.ShapeDtypeStruct((B, 1, lpad), jnp.float32)
    out_specs = pl.BlockSpec((1, 1, lpad), lambda b: (b, 0, 0))

    # one zero-padded VMEM staging buffer per conv layer k >= 1
    scratch = [pltpu.VMEM((cfg["hs"][k] + 4, cfg["ws"][k] + 4, cfg["chans"][k]),
                          jnp.float32)
               for k in range(1, n_hidden)]

    kernel = _build_fused_kernel(cfg)
    merged = pl.pallas_call(
        kernel,
        out_shape=out_shape,
        grid=(B,),
        in_specs=in_specs,
        out_specs=out_specs,
        scratch_shapes=scratch,
        compiler_params=pltpu.CompilerParams(
            dimension_semantics=("parallel",)),
    )(*inputs)

    merged = merged.reshape(B, lpad)
    outs, start = [], 0
    for L in labels:
        outs.append(merged[:, start:start + L])
        start += L
    return tuple(outs)


# ----------------------------------------------------------------------------
# Parameter initialization (mirrors init_layer / init_bn, deterministic)
# ----------------------------------------------------------------------------
def init_conv_weight(key, cout, cin, kh, kw):
    n = cin * kh * kw
    scale = math.sqrt(2.0 / n) * math.sqrt(3.0)
    return jax.random.uniform(key, (cout, cin, kh, kw), jnp.float32, -scale, scale)


def init_linear(key, out_f, in_f):
    scale = math.sqrt(2.0 / in_f) * math.sqrt(3.0)
    w = jax.random.uniform(key, (out_f, in_f), jnp.float32, -scale, scale)
    b = jnp.zeros((out_f,), jnp.float32)
    return w, b


def make_params(key, n_hidden, task_label_counts):
    params = {"convs": [], "bns": [], "heads": []}
    eps = 1e-5
    for k in range(n_hidden):
        cin = 1 if k == 0 else 2 ** (5 + k)
        cout = 2 ** (6 + k)
        key, sub = jax.random.split(key)
        params["convs"].append(init_conv_weight(sub, cout, cin, 5, 5))
        # init_bn: gamma=1, beta=0; fresh running stats mean=0, var=1 -> fold
        gamma = jnp.ones((cout,), jnp.float32)
        beta = jnp.zeros((cout,), jnp.float32)
        mean = jnp.zeros((cout,), jnp.float32)
        var = jnp.ones((cout,), jnp.float32)
        scale = gamma / jnp.sqrt(var + eps)
        bias = beta - mean * scale
        params["bns"].append((scale, bias))
    feat = 2 ** (5 + n_hidden)
    for n_labels in task_label_counts:
        key, sub = jax.random.split(key)
        params["heads"].append(init_linear(sub, n_labels, feat))
    return params


# ----------------------------------------------------------------------------
# Pure-JAX reference (same bf16 quantization on conv k>=1 as the kernel)
# ----------------------------------------------------------------------------
def reference_forward(params, n_hidden, task_activations, x_bsm):
    h = x_bsm[:, None, :, :].astype(jnp.float32)   # NCHW
    for k in range(n_hidden):
        w = params["convs"][k].astype(jnp.float32)
        if k > 0:
            w = w.astype(jnp.bfloat16).astype(jnp.float32)
            h = h.astype(jnp.bfloat16).astype(jnp.float32)
        y = jax.lax.conv_general_dilated(
            h, w, window_strides=(2, 2), padding=((2, 2), (2, 2)),
            dimension_numbers=("NCHW", "OIHW", "NCHW"))
        scale, bias = params["bns"][k]
        y = y * scale[None, :, None, None] + bias[None, :, None, None]
        h = jnp.maximum(y, 0.0)
    feat = jnp.max(h, axis=(2, 3))
    outs = []
    for (w, b), act in zip(params["heads"], task_activations):
        z = feat @ w.T + b[None, :]
        if act == "softmax":
            outs.append(jax.nn.log_softmax(z, axis=-1))
        else:
            outs.append(jax.nn.sigmoid(z))
    return tuple(outs)


if __name__ == "__main__":
    key = jax.random.PRNGKey(0)

    n_hidden = 2
    task_activations = ["softmax", "sigmoid"]   # t.output_module per task
    task_label_counts = [3, 5]                  # len(t.output_labels) per task
    batch, seq_len, mel_bins = 2, 16, 16

    key, pkey, xkey = jax.random.split(key, 3)
    params = make_params(pkey, n_hidden, task_label_counts)
    x = jax.random.normal(xkey, (batch, seq_len, mel_bins), dtype=jnp.float32)

    cfg = _make_config(n_hidden, seq_len, mel_bins, task_label_counts, task_activations)
    fused = prepare_fused_params(params, cfg)

    fwd = jax.jit(lambda p, xx: baseline_cnn_forward(p, cfg, xx))
    outs = jax.block_until_ready(fwd(fused, x))

    assert outs[0].shape == (batch, 3) and outs[1].shape == (batch, 5)
    ref = reference_forward(params, n_hidden, task_activations, x)
    for o, r in zip(outs, ref):
        assert jnp.all(jnp.isfinite(o))
        assert jnp.allclose(o, r, atol=1e-2, rtol=1e-2), (o, r)
    print("KERNEL_OK")
</pallas_src>

<mosaic_0001>
module attributes {stable_mosaic.version = 11 : i64} {
  func.func @kernel(%arg0: i32, %arg1: memref<1x4x10x10x1xf32, #tpu.memory_space<vmem>>, %arg2: memref<25x64xf32, #tpu.memory_space<vmem>>, %arg3: memref<1x64xf32, #tpu.memory_space<vmem>>, %arg4: memref<1x64xf32, #tpu.memory_space<vmem>>, %arg5: memref<25x64x128xbf16, #tpu.memory_space<vmem>>, %arg6: memref<1x128xf32, #tpu.memory_space<vmem>>, %arg7: memref<1x128xf32, #tpu.memory_space<vmem>>, %arg8: memref<128x128xf32, #tpu.memory_space<vmem>>, %arg9: memref<1x128xf32, #tpu.memory_space<vmem>>, %arg10: memref<1x1x128xf32, #tpu.memory_space<vmem>>, %arg11: memref<12x12x64xf32, #tpu.memory_space<vmem>>) attributes {dimension_semantics = [#tpu.dimension_semantics<parallel>], iteration_bounds = array<i64: 2>, scalar_prefetch = 0 : i64, scratch_operands = 1 : i64, tpu.core_type = #tpu.core_type<tc>, window_params = [{transform_indices = @transform_0, window_bounds = array<i64: 1, 4, 10, 10, 1>}, {pipeline_mode = #tpu.pipeline_mode<synchronous>, transform_indices = @transform_1, window_bounds = array<i64: 25, 64>}, {pipeline_mode = #tpu.pipeline_mode<synchronous>, transform_indices = @transform_2, window_bounds = array<i64: 1, 64>}, {pipeline_mode = #tpu.pipeline_mode<synchronous>, transform_indices = @transform_3, window_bounds = array<i64: 1, 64>}, {pipeline_mode = #tpu.pipeline_mode<synchronous>, transform_indices = @transform_4, window_bounds = array<i64: 25, 64, 128>}, {pipeline_mode = #tpu.pipeline_mode<synchronous>, transform_indices = @transform_5, window_bounds = array<i64: 1, 128>}, {pipeline_mode = #tpu.pipeline_mode<synchronous>, transform_indices = @transform_6, window_bounds = array<i64: 1, 128>}, {pipeline_mode = #tpu.pipeline_mode<synchronous>, transform_indices = @transform_7, window_bounds = array<i64: 128, 128>}, {pipeline_mode = #tpu.pipeline_mode<synchronous>, transform_indices = @transform_8, window_bounds = array<i64: 1, 128>}, {transform_indices = @transform_9, window_bounds = array<i64: 1, 1, 128>}]} {
    %cst = arith.constant 0.000000e+00 : f32
    %0 = vector.broadcast %cst : f32 to vector<8x8x64xf32>
    %c0 = arith.constant 0 : index
    %c0_0 = arith.constant 0 : index
    %c0_1 = arith.constant 0 : index
    %c0_2 = arith.constant 0 : index
    %c0_3 = arith.constant 0 : index
    %1 = vector.load %arg1[%c0, %c0_0, %c0_1, %c0_2, %c0_3] : memref<1x4x10x10x1xf32, #tpu.memory_space<vmem>>, vector<1x1x8x8x1xf32>
    %2 = vector.shape_cast %1 : vector<1x1x8x8x1xf32> to vector<8x8x1xf32>
    %c0_4 = arith.constant 0 : index
    %c0_5 = arith.constant 0 : index
    %3 = vector.load %arg2[%c0_4, %c0_5] : memref<25x64xf32, #tpu.memory_space<vmem>>, vector<1x64xf32>
    %4 = vector.shape_cast %3 : vector<1x64xf32> to vector<1x1x64xf32>
    %5 = vector.broadcast %2 : vector<8x8x1xf32> to vector<8x8x64xf32>
    %6 = vector.broadcast %4 : vector<1x1x64xf32> to vector<8x8x64xf32>
    %7 = arith.mulf %5, %6 : vector<8x8x64xf32>
    %8 = arith.addf %0, %7 : vector<8x8x64xf32>
    %c0_6 = arith.constant 0 : index
    %c1 = arith.constant 1 : index
    %c0_7 = arith.constant 0 : index
    %c0_8 = arith.constant 0 : index
    %c0_9 = arith.constant 0 : index
    %9 = vector.load %arg1[%c0_6, %c1, %c0_7, %c0_8, %c0_9] : memref<1x4x10x10x1xf32, #tpu.memory_space<vmem>>, vector<1x1x8x8x1xf32>
    %10 = vector.shape_cast %9 : vector<1x1x8x8x1xf32> to vector<8x8x1xf32>
    %c1_10 = arith.constant 1 : index
    %c0_11 = arith.constant 0 : index
    %11 = vector.load %arg2[%c1_10, %c0_11] : memref<25x64xf32, #tpu.memory_space<vmem>>, vector<1x64xf32>
    %12 = vector.shape_cast %11 : vector<1x64xf32> to vector<1x1x64xf32>
    %13 = vector.broadcast %10 : vector<8x8x1xf32> to vector<8x8x64xf32>
    %14 = vector.broadcast %12 : vector<1x1x64xf32> to vector<8x8x64xf32>
    %15 = arith.mulf %13, %14 : vector<8x8x64xf32>
    %16 = arith.addf %8, %15 : vector<8x8x64xf32>
    %c0_12 = arith.constant 0 : index
    %c0_13 = arith.constant 0 : index
    %c0_14 = arith.constant 0 : index
    %c1_15 = arith.constant 1 : index
    %c0_16 = arith.constant 0 : index
    %17 = vector.load %arg1[%c0_12, %c0_13, %c0_14, %c1_15, %c0_16] : memref<1x4x10x10x1xf32, #tpu.memory_space<vmem>>, vector<1x1x8x8x1xf32>
    %18 = vector.shape_cast %17 : vector<1x1x8x8x1xf32> to vector<8x8x1xf32>
    %c2 = arith.constant 2 : index
    %c0_17 = arith.constant 0 : index
    %19 = vector.load %arg2[%c2, %c0_17] : memref<25x64xf32, #tpu.memory_space<vmem>>, vector<1x64xf32>
    %20 = vector.shape_cast %19 : vector<1x64xf32> to vector<1x1x64xf32>
    %21 = vector.broadcast %18 : vector<8x8x1xf32> to vector<8x8x64xf32>
    %22 = vector.broadcast %20 : vector<1x1x64xf32> to vector<8x8x64xf32>
    %23 = arith.mulf %21, %22 : vector<8x8x64xf32>
    %24 = arith.addf %16, %23 : vector<8x8x64xf32>
    %c0_18 = arith.constant 0 : index
    %c1_19 = arith.constant 1 : index
    %c0_20 = arith.constant 0 : index
    %c1_21 = arith.constant 1 : index
    %c0_22 = arith.constant 0 : index
    %25 = vector.load %arg1[%c0_18, %c1_19, %c0_20, %c1_21, %c0_22] : memref<1x4x10x10x1xf32, #tpu.memory_space<vmem>>, vector<1x1x8x8x1xf32>
    %26 = vector.shape_cast %25 : vector<1x1x8x8x1xf32> to vector<8x8x1xf32>
    %c3 = arith.constant 3 : index
    %c0_23 = arith.constant 0 : index
    %27 = vector.load %arg2[%c3, %c0_23] : memref<25x64xf32, #tpu.memory_space<vmem>>, vector<1x64xf32>
    %28 = vector.shape_cast %27 : vector<1x64xf32> to vector<1x1x64xf32>
    %29 = vector.broadcast %26 : vector<8x8x1xf32> to vector<8x8x64xf32>
    %30 = vector.broadcast %28 : vector<1x1x64xf32> to vector<8x8x64xf32>
    %31 = arith.mulf %29, %30 : vector<8x8x64xf32>
    %32 = arith.addf %24, %31 : vector<8x8x64xf32>
    %c0_24 = arith.constant 0 : index
    %c0_25 = arith.constant 0 : index
    %c0_26 = arith.constant 0 : index
    %c2_27 = arith.constant 2 : index
    %c0_28 = arith.constant 0 : index
    %33 = vector.load %arg1[%c0_24, %c0_25, %c0_26, %c2_27, %c0_28] : memref<1x4x10x10x1xf32, #tpu.memory_space<vmem>>, vector<1x1x8x8x1xf32>
    %34 = vector.shape_cast %33 : vector<1x1x8x8x1xf32> to vector<8x8x1xf32>
    %c4 = arith.constant 4 : index
    %c0_29 = arith.constant 0 : index
    %35 = vector.load %arg2[%c4, %c0_29] : memref<25x64xf32, #tpu.memory_space<vmem>>, vector<1x64xf32>
    %36 = vector.shape_cast %35 : vector<1x64xf32> to vector<1x1x64xf32>
    %37 = vector.broadcast %34 : vector<8x8x1xf32> to vector<8x8x64xf32>
    %38 = vector.broadcast %36 : vector<1x1x64xf32> to vector<8x8x64xf32>
    %39 = arith.mulf %37, %38 : vector<8x8x64xf32>
    %40 = arith.addf %32, %39 : vector<8x8x64xf32>
    %c0_30 = arith.constant 0 : index
    %c2_31 = arith.constant 2 : index
    %c0_32 = arith.constant 0 : index
    %c0_33 = arith.constant 0 : index
    %c0_34 = arith.constant 0 : index
    %41 = vector.load %arg1[%c0_30, %c2_31, %c0_32, %c0_33, %c0_34] : memref<1x4x10x10x1xf32, #tpu.memory_space<vmem>>, vector<1x1x8x8x1xf32>
    %42 = vector.shape_cast %41 : vector<1x1x8x8x1xf32> to vector<8x8x1xf32>
    %c5 = arith.constant 5 : index
    %c0_35 = arith.constant 0 : index
    %43 = vector.load %arg2[%c5, %c0_35] : memref<25x64xf32, #tpu.memory_space<vmem>>, vector<1x64xf32>
    %44 = vector.shape_cast %43 : vector<1x64xf32> to vector<1x1x64xf32>
    %45 = vector.broadcast %42 : vector<8x8x1xf32> to vector<8x8x64xf32>
    %46 = vector.broadcast %44 : vector<1x1x64xf32> to vector<8x8x64xf32>
    %47 = arith.mulf %45, %46 : vector<8x8x64xf32>
    %48 = arith.addf %40, %47 : vector<8x8x64xf32>
    %c0_36 = arith.constant 0 : index
    %c3_37 = arith.constant 3 : index
    %c0_38 = arith.constant 0 : index
    %c0_39 = arith.constant 0 : index
    %c0_40 = arith.constant 0 : index
    %49 = vector.load %arg1[%c0_36, %c3_37, %c0_38, %c0_39, %c0_40] : memref<1x4x10x10x1xf32, #tpu.memory_space<vmem>>, vector<1x1x8x8x1xf32>
    %50 = vector.shape_cast %49 : vector<1x1x8x8x1xf32> to vector<8x8x1xf32>
    %c6 = arith.constant 6 : index
    %c0_41 = arith.constant 0 : index
    %51 = vector.load %arg2[%c6, %c0_41] : memref<25x64xf32, #tpu.memory_space<vmem>>, vector<1x64xf32>
    %52 = vector.shape_cast %51 : vector<1x64xf32> to vector<1x1x64xf32>
    %53 = vector.broadcast %50 : vector<8x8x1xf32> to vector<8x8x64xf32>
    %54 = vector.broadcast %52 : vector<1x1x64xf32> to vector<8x8x64xf32>
    %55 = arith.mulf %53, %54 : vector<8x8x64xf32>
    %56 = arith.addf %48, %55 : vector<8x8x64xf32>
    %c0_42 = arith.constant 0 : index
    %c2_43 = arith.constant 2 : index
    %c0_44 = arith.constant 0 : index
    %c1_45 = arith.constant 1 : index
    %c0_46 = arith.constant 0 : index
    %57 = vector.load %arg1[%c0_42, %c2_43, %c0_44, %c1_45, %c0_46] : memref<1x4x10x10x1xf32, #tpu.memory_space<vmem>>, vector<1x1x8x8x1xf32>
    %58 = vector.shape_cast %57 : vector<1x1x8x8x1xf32> to vector<8x8x1xf32>
    %c7 = arith.constant 7 : index
    %c0_47 = arith.constant 0 : index
    %59 = vector.load %arg2[%c7, %c0_47] : memref<25x64xf32, #tpu.memory_space<vmem>>, vector<1x64xf32>
    %60 = vector.shape_cast %59 : vector<1x64xf32> to vector<1x1x64xf32>
    %61 = vector.broadcast %58 : vector<8x8x1xf32> to vector<8x8x64xf32>
    %62 = vector.broadcast %60 : vector<1x1x64xf32> to vector<8x8x64xf32>
    %63 = arith.mulf %61, %62 : vector<8x8x64xf32>
    %64 = arith.addf %56, %63 : vector<8x8x64xf32>
    %c0_48 = arith.constant 0 : index
    %c3_49 = arith.constant 3 : index
    %c0_50 = arith.constant 0 : index
    %c1_51 = arith.constant 1 : index
    %c0_52 = arith.constant 0 : index
    %65 = vector.load %arg1[%c0_48, %c3_49, %c0_50, %c1_51, %c0_52] : memref<1x4x10x10x1xf32, #tpu.memory_space<vmem>>, vector<1x1x8x8x1xf32>
    %66 = vector.shape_cast %65 : vector<1x1x8x8x1xf32> to vector<8x8x1xf32>
    %c8 = arith.constant 8 : index
    %c0_53 = arith.constant 0 : index
    %67 = vector.load %arg2[%c8, %c0_53] : memref<25x64xf32, #tpu.memory_space<vmem>>, vector<1x64xf32>
    %68 = vector.shape_cast %67 : vector<1x64xf32> to vector<1x1x64xf32>
    %69 = vector.broadcast %66 : vector<8x8x1xf32> to vector<8x8x64xf32>
    %70 = vector.broadcast %68 : vector<1x1x64xf32> to vector<8x8x64xf32>
    %71 = arith.mulf %69, %70 : vector<8x8x64xf32>
    %72 = arith.addf %64, %71 : vector<8x8x64xf32>
    %c0_54 = arith.constant 0 : index
    %c2_55 = arith.constant 2 : index
    %c0_56 = arith.constant 0 : index
    %c2_57 = arith.constant 2 : index
    %c0_58 = arith.constant 0 : index
    %73 = vector.load %arg1[%c0_54, %c2_55, %c0_56, %c2_57, %c0_58] : memref<1x4x10x10x1xf32, #tpu.memory_space<vmem>>, vector<1x1x8x8x1xf32>
    %74 = vector.shape_cast %73 : vector<1x1x8x8x1xf32> to vector<8x8x1xf32>
    %c9 = arith.constant 9 : index
    %c0_59 = arith.constant 0 : index
    %75 = vector.load %arg2[%c9, %c0_59] : memref<25x64xf32, #tpu.memory_space<vmem>>, vector<1x64xf32>
    %76 = vector.shape_cast %75 : vector<1x64xf32> to vector<1x1x64xf32>
    %77 = vector.broadcast %74 : vector<8x8x1xf32> to vector<8x8x64xf32>
    %78 = vector.broadcast %76 : vector<1x1x64xf32> to vector<8x8x64xf32>
    %79 = arith.mulf %77, %78 : vector<8x8x64xf32>
    %80 = arith.addf %72, %79 : vector<8x8x64xf32>
    %c0_60 = arith.constant 0 : index
    %c0_61 = arith.constant 0 : index
    %c1_62 = arith.constant 1 : index
    %c0_63 = arith.constant 0 : index
    %c0_64 = arith.constant 0 : index
    %81 = vector.load %arg1[%c0_60, %c0_61, %c1_62, %c0_63, %c0_64] : memref<1x4x10x10x1xf32, #tpu.memory_space<vmem>>, vector<1x1x8x8x1xf32>
    %82 = vector.shape_cast %81 : vector<1x1x8x8x1xf32> to vector<8x8x1xf32>
    %c10 = arith.constant 10 : index
    %c0_65 = arith.constant 0 : index
    %83 = vector.load %arg2[%c10, %c0_65] : memref<25x64xf32, #tpu.memory_space<vmem>>, vector<1x64xf32>
    %84 = vector.shape_cast %83 : vector<1x64xf32> to vector<1x1x64xf32>
    %85 = vector.broadcast %82 : vector<8x8x1xf32> to vector<8x8x64xf32>
    %86 = vector.broadcast %84 : vector<1x1x64xf32> to vector<8x8x64xf32>
    %87 = arith.mulf %85, %86 : vector<8x8x64xf32>
    %88 = arith.addf %80, %87 : vector<8x8x64xf32>
    %c0_66 = arith.constant 0 : index
    %c1_67 = arith.constant 1 : index
    %c1_68 = arith.constant 1 : index
    %c0_69 = arith.constant 0 : index
    %c0_70 = arith.constant 0 : index
    %89 = vector.load %arg1[%c0_66, %c1_67, %c1_68, %c0_69, %c0_70] : memref<1x4x10x10x1xf32, #tpu.memory_space<vmem>>, vector<1x1x8x8x1xf32>
    %90 = vector.shape_cast %89 : vector<1x1x8x8x1xf32> to vector<8x8x1xf32>
    %c11 = arith.constant 11 : index
    %c0_71 = arith.constant 0 : index
    %91 = vector.load %arg2[%c11, %c0_71] : memref<25x64xf32, #tpu.memory_space<vmem>>, vector<1x64xf32>
    %92 = vector.shape_cast %91 : vector<1x64xf32> to vector<1x1x64xf32>
    %93 = vector.broadcast %90 : vector<8x8x1xf32> to vector<8x8x64xf32>
    %94 = vector.broadcast %92 : vector<1x1x64xf32> to vector<8x8x64xf32>
    %95 = arith.mulf %93, %94 : vector<8x8x64xf32>
    %96 = arith.addf %88, %95 : vector<8x8x64xf32>
    %c0_72 = arith.constant 0 : index
    %c0_73 = arith.constant 0 : index
    %c1_74 = arith.constant 1 : index
    %c1_75 = arith.constant 1 : index
    %c0_76 = arith.constant 0 : index
    %97 = vector.load %arg1[%c0_72, %c0_73, %c1_74, %c1_75, %c0_76] : memref<1x4x10x10x1xf32, #tpu.memory_space<vmem>>, vector<1x1x8x8x1xf32>
    %98 = vector.shape_cast %97 : vector<1x1x8x8x1xf32> to vector<8x8x1xf32>
    %c12 = arith.constant 12 : index
    %c0_77 = arith.constant 0 : index
    %99 = vector.load %arg2[%c12, %c0_77] : memref<25x64xf32, #tpu.memory_space<vmem>>, vector<1x64xf32>
    %100 = vector.shape_cast %99 : vector<1x64xf32> to vector<1x1x64xf32>
    %101 = vector.broadcast %98 : vector<8x8x1xf32> to vector<8x8x64xf32>
    %102 = vector.broadcast %100 : vector<1x1x64xf32> to vector<8x8x64xf32>
    %103 = arith.mulf %101, %102 : vector<8x8x64xf32>
    %104 = arith.addf %96, %103 : vector<8x8x64xf32>
    %c0_78 = arith.constant 0 : index
    %c1_79 = arith.constant 1 : index
    %c1_80 = arith.constant 1 : index
    %c1_81 = arith.constant 1 : index
    %c0_82 = arith.constant 0 : index
    %105 = vector.load %arg1[%c0_78, %c1_79, %c1_80, %c1_81, %c0_82] : memref<1x4x10x10x1xf32, #tpu.memory_space<vmem>>, vector<1x1x8x8x1xf32>
    %106 = vector.shape_cast %105 : vector<1x1x8x8x1xf32> to vector<8x8x1xf32>
    %c13 = arith.constant 13 : index
    %c0_83 = arith.constant 0 : index
    %107 = vector.load %arg2[%c13, %c0_83] : memref<25x64xf32, #tpu.memory_space<vmem>>, vector<1x64xf32>
    %108 = vector.shape_cast %107 : vector<1x64xf32> to vector<1x1x64xf32>
    %109 = vector.broadcast %106 : vector<8x8x1xf32> to vector<8x8x64xf32>
    %110 = vector.broadcast %108 : vector<1x1x64xf32> to vector<8x8x64xf32>
    %111 = arith.mulf %109, %110 : vector<8x8x64xf32>
    %112 = arith.addf %104, %111 : vector<8x8x64xf32>
    %c0_84 = arith.constant 0 : index
    %c0_85 = arith.constant 0 : index
    %c1_86 = arith.constant 1 : index
    %c2_87 = arith.constant 2 : index
    %c0_88 = arith.constant 0 : index
    %113 = vector.load %arg1[%c0_84, %c0_85, %c1_86, %c2_87, %c0_88] : memref<1x4x10x10x1xf32, #tpu.memory_space<vmem>>, vector<1x1x8x8x1xf32>
    %114 = vector.shape_cast %113 : vector<1x1x8x8x1xf32> to vector<8x8x1xf32>
    %c14 = arith.constant 14 : index
    %c0_89 = arith.constant 0 : index
    %115 = vector.load %arg2[%c14, %c0_89] : memref<25x64xf32, #tpu.memory_space<vmem>>, vector<1x64xf32>
    %116 = vector.shape_cast %115 : vector<1x64xf32> to vector<1x1x64xf32>
    %117 = vector.broadcast %114 : vector<8x8x1xf32> to vector<8x8x64xf32>
    %118 = vector.broadcast %116 : vector<1x1x64xf32> to vector<8x8x64xf32>
    %119 = arith.mulf %117, %118 : vector<8x8x64xf32>
    %120 = arith.addf %112, %119 : vector<8x8x64xf32>
    %c0_90 = arith.constant 0 : index
    %c2_91 = arith.constant 2 : index
    %c1_92 = arith.constant 1 : index
    %c0_93 = arith.constant 0 : index
    %c0_94 = arith.constant 0 : index
    %121 = vector.load %arg1[%c0_90, %c2_91, %c1_92, %c0_93, %c0_94] : memref<1x4x10x10x1xf32, #tpu.memory_space<vmem>>, vector<1x1x8x8x1xf32>
    %122 = vector.shape_cast %121 : vector<1x1x8x8x1xf32> to vector<8x8x1xf32>
    %c15 = arith.constant 15 : index
    %c0_95 = arith.constant 0 : index
    %123 = vector.load %arg2[%c15, %c0_95] : memref<25x64xf32, #tpu.memory_space<vmem>>, vector<1x64xf32>
    %124 = vector.shape_cast %123 : vector<1x64xf32> to vector<1x1x64xf32>
    %125 = vector.broadcast %122 : vector<8x8x1xf32> to vector<8x8x64xf32>
    %126 = vector.broadcast %124 : vector<1x1x64xf32> to vector<8x8x64xf32>
    %127 = arith.mulf %125, %126 : vector<8x8x64xf32>
    %128 = arith.addf %120, %127 : vector<8x8x64xf32>
    %c0_96 = arith.constant 0 : index
    %c3_97 = arith.constant 3 : index
    %c1_98 = arith.constant 1 : index
    %c0_99 = arith.constant 0 : index
    %c0_100 = arith.constant 0 : index
    %129 = vector.load %arg1[%c0_96, %c3_97, %c1_98, %c0_99, %c0_100] : memref<1x4x10x10x1xf32, #tpu.memory_space<vmem>>, vector<1x1x8x8x1xf32>
    %130 = vector.shape_cast %129 : vector<1x1x8x8x1xf32> to vector<8x8x1xf32>
    %c16 = arith.constant 16 : index
    %c0_101 = arith.constant 0 : index
    %131 = vector.load %arg2[%c16, %c0_101] : memref<25x64xf32, #tpu.memory_space<vmem>>, vector<1x64xf32>
    %132 = vector.shape_cast %131 : vector<1x64xf32> to vector<1x1x64xf32>
    %133 = vector.broadcast %130 : vector<8x8x1xf32> to vector<8x8x64xf32>
    %134 = vector.broadcast %132 : vector<1x1x64xf32> to vector<8x8x64xf32>
    %135 = arith.mulf %133, %134 : vector<8x8x64xf32>
    %136 = arith.addf %128, %135 : vector<8x8x64xf32>
    %c0_102 = arith.constant 0 : index
    %c2_103 = arith.constant 2 : index
    %c1_104 = arith.constant 1 : index
    %c1_105 = arith.constant 1 : index
    %c0_106 = arith.constant 0 : index
    %137 = vector.load %arg1[%c0_102, %c2_103, %c1_104, %c1_105, %c0_106] : memref<1x4x10x10x1xf32, #tpu.memory_space<vmem>>, vector<1x1x8x8x1xf32>
    %138 = vector.shape_cast %137 : vector<1x1x8x8x1xf32> to vector<8x8x1xf32>
    %c17 = arith.constant 17 : index
    %c0_107 = arith.constant 0 : index
    %139 = vector.load %arg2[%c17, %c0_107] : memref<25x64xf32, #tpu.memory_space<vmem>>, vector<1x64xf32>
    %140 = vector.shape_cast %139 : vector<1x64xf32> to vector<1x1x64xf32>
    %141 = vector.broadcast %138 : vector<8x8x1xf32> to vector<8x8x64xf32>
    %142 = vector.broadcast %140 : vector<1x1x64xf32> to vector<8x8x64xf32>
    %143 = arith.mulf %141, %142 : vector<8x8x64xf32>
    %144 = arith.addf %136, %143 : vector<8x8x64xf32>
    %c0_108 = arith.constant 0 : index
    %c3_109 = arith.constant 3 : index
    %c1_110 = arith.constant 1 : index
    %c1_111 = arith.constant 1 : index
    %c0_112 = arith.constant 0 : index
    %145 = vector.load %arg1[%c0_108, %c3_109, %c1_110, %c1_111, %c0_112] : memref<1x4x10x10x1xf32, #tpu.memory_space<vmem>>, vector<1x1x8x8x1xf32>
    %146 = vector.shape_cast %145 : vector<1x1x8x8x1xf32> to vector<8x8x1xf32>
    %c18 = arith.constant 18 : index
    %c0_113 = arith.constant 0 : index
    %147 = vector.load %arg2[%c18, %c0_113] : memref<25x64xf32, #tpu.memory_space<vmem>>, vector<1x64xf32>
    %148 = vector.shape_cast %147 : vector<1x64xf32> to vector<1x1x64xf32>
    %149 = vector.broadcast %146 : vector<8x8x1xf32> to vector<8x8x64xf32>
    %150 = vector.broadcast %148 : vector<1x1x64xf32> to vector<8x8x64xf32>
    %151 = arith.mulf %149, %150 : vector<8x8x64xf32>
    %152 = arith.addf %144, %151 : vector<8x8x64xf32>
    %c0_114 = arith.constant 0 : index
    %c2_115 = arith.constant 2 : index
    %c1_116 = arith.constant 1 : index
    %c2_117 = arith.constant 2 : index
    %c0_118 = arith.constant 0 : index
    %153 = vector.load %arg1[%c0_114, %c2_115, %c1_116, %c2_117, %c0_118] : memref<1x4x10x10x1xf32, #tpu.memory_space<vmem>>, vector<1x1x8x8x1xf32>
    %154 = vector.shape_cast %153 : vector<1x1x8x8x1xf32> to vector<8x8x1xf32>
    %c19 = arith.constant 19 : index
    %c0_119 = arith.constant 0 : index
    %155 = vector.load %arg2[%c19, %c0_119] : memref<25x64xf32, #tpu.memory_space<vmem>>, vector<1x64xf32>
    %156 = vector.shape_cast %155 : vector<1x64xf32> to vector<1x1x64xf32>
    %157 = vector.broadcast %154 : vector<8x8x1xf32> to vector<8x8x64xf32>
    %158 = vector.broadcast %156 : vector<1x1x64xf32> to vector<8x8x64xf32>
    %159 = arith.mulf %157, %158 : vector<8x8x64xf32>
    %160 = arith.addf %152, %159 : vector<8x8x64xf32>
    %c0_120 = arith.constant 0 : index
    %c0_121 = arith.constant 0 : index
    %c2_122 = arith.constant 2 : index
    %c0_123 = arith.constant 0 : index
    %c0_124 = arith.constant 0 : index
    %161 = vector.load %arg1[%c0_120, %c0_121, %c2_122, %c0_123, %c0_124] : memref<1x4x10x10x1xf32, #tpu.memory_space<vmem>>, vector<1x1x8x8x1xf32>
    %162 = vector.shape_cast %161 : vector<1x1x8x8x1xf32> to vector<8x8x1xf32>
    %c20 = arith.constant 20 : index
    %c0_125 = arith.constant 0 : index
    %163 = vector.load %arg2[%c20, %c0_125] : memref<25x64xf32, #tpu.memory_space<vmem>>, vector<1x64xf32>
    %164 = vector.shape_cast %163 : vector<1x64xf32> to vector<1x1x64xf32>
    %165 = vector.broadcast %162 : vector<8x8x1xf32> to vector<8x8x64xf32>
    %166 = vector.broadcast %164 : vector<1x1x64xf32> to vector<8x8x64xf32>
    %167 = arith.mulf %165, %166 : vector<8x8x64xf32>
    %168 = arith.addf %160, %167 : vector<8x8x64xf32>
    %c0_126 = arith.constant 0 : index
    %c1_127 = arith.constant 1 : index
    %c2_128 = arith.constant 2 : index
    %c0_129 = arith.constant 0 : index
    %c0_130 = arith.constant 0 : index
    %169 = vector.load %arg1[%c0_126, %c1_127, %c2_128, %c0_129, %c0_130] : memref<1x4x10x10x1xf32, #tpu.memory_space<vmem>>, vector<1x1x8x8x1xf32>
    %170 = vector.shape_cast %169 : vector<1x1x8x8x1xf32> to vector<8x8x1xf32>
    %c21 = arith.constant 21 : index
    %c0_131 = arith.constant 0 : index
    %171 = vector.load %arg2[%c21, %c0_131] : memref<25x64xf32, #tpu.memory_space<vmem>>, vector<1x64xf32>
    %172 = vector.shape_cast %171 : vector<1x64xf32> to vector<1x1x64xf32>
    %173 = vector.broadcast %170 : vector<8x8x1xf32> to vector<8x8x64xf32>
    %174 = vector.broadcast %172 : vector<1x1x64xf32> to vector<8x8x64xf32>
    %175 = arith.mulf %173, %174 : vector<8x8x64xf32>
    %176 = arith.addf %168, %175 : vector<8x8x64xf32>
    %c0_132 = arith.constant 0 : index
    %c0_133 = arith.constant 0 : index
    %c2_134 = arith.constant 2 : index
    %c1_135 = arith.constant 1 : index
    %c0_136 = arith.constant 0 : index
    %177 = vector.load %arg1[%c0_132, %c0_133, %c2_134, %c1_135, %c0_136] : memref<1x4x10x10x1xf32, #tpu.memory_space<vmem>>, vector<1x1x8x8x1xf32>
    %178 = vector.shape_cast %177 : vector<1x1x8x8x1xf32> to vector<8x8x1xf32>
    %c22 = arith.constant 22 : index
    %c0_137 = arith.constant 0 : index
    %179 = vector.load %arg2[%c22, %c0_137] : memref<25x64xf32, #tpu.memory_space<vmem>>, vector<1x64xf32>
    %180 = vector.shape_cast %179 : vector<1x64xf32> to vector<1x1x64xf32>
    %181 = vector.broadcast %178 : vector<8x8x1xf32> to vector<8x8x64xf32>
    %182 = vector.broadcast %180 : vector<1x1x64xf32> to vector<8x8x64xf32>
    %183 = arith.mulf %181, %182 : vector<8x8x64xf32>
    %184 = arith.addf %176, %183 : vector<8x8x64xf32>
    %c0_138 = arith.constant 0 : index
    %c1_139 = arith.constant 1 : index
    %c2_140 = arith.constant 2 : index
    %c1_141 = arith.constant 1 : index
    %c0_142 = arith.constant 0 : index
    %185 = vector.load %arg1[%c0_138, %c1_139, %c2_140, %c1_141, %c0_142] : memref<1x4x10x10x1xf32, #tpu.memory_space<vmem>>, vector<1x1x8x8x1xf32>
    %186 = vector.shape_cast %185 : vector<1x1x8x8x1xf32> to vector<8x8x1xf32>
    %c23 = arith.constant 23 : index
    %c0_143 = arith.constant 0 : index
    %187 = vector.load %arg2[%c23, %c0_143] : memref<25x64xf32, #tpu.memory_space<vmem>>, vector<1x64xf32>
    %188 = vector.shape_cast %187 : vector<1x64xf32> to vector<1x1x64xf32>
    %189 = vector.broadcast %186 : vector<8x8x1xf32> to vector<8x8x64xf32>
    %190 = vector.broadcast %188 : vector<1x1x64xf32> to vector<8x8x64xf32>
    %191 = arith.mulf %189, %190 : vector<8x8x64xf32>
    %192 = arith.addf %184, %191 : vector<8x8x64xf32>
    %c0_144 = arith.constant 0 : index
    %c0_145 = arith.constant 0 : index
    %c2_146 = arith.constant 2 : index
    %c2_147 = arith.constant 2 : index
    %c0_148 = arith.constant 0 : index
    %193 = vector.load %arg1[%c0_144, %c0_145, %c2_146, %c2_147, %c0_148] : memref<1x4x10x10x1xf32, #tpu.memory_space<vmem>>, vector<1x1x8x8x1xf32>
    %194 = vector.shape_cast %193 : vector<1x1x8x8x1xf32> to vector<8x8x1xf32>
    %c24 = arith.constant 24 : index
    %c0_149 = arith.constant 0 : index
    %195 = vector.load %arg2[%c24, %c0_149] : memref<25x64xf32, #tpu.memory_space<vmem>>, vector<1x64xf32>
    %196 = vector.shape_cast %195 : vector<1x64xf32> to vector<1x1x64xf32>
    %197 = vector.broadcast %194 : vector<8x8x1xf32> to vector<8x8x64xf32>
    %198 = vector.broadcast %196 : vector<1x1x64xf32> to vector<8x8x64xf32>
    %199 = arith.mulf %197, %198 : vector<8x8x64xf32>
    %200 = arith.addf %192, %199 : vector<8x8x64xf32>
    %c0_150 = arith.constant 0 : index
    %c0_151 = arith.constant 0 : index
    %201 = vector.load %arg3[%c0_150, %c0_151] : memref<1x64xf32, #tpu.memory_space<vmem>>, vector<1x64xf32>
    %202 = vector.shape_cast %201 : vector<1x64xf32> to vector<1x1x64xf32>
    %203 = vector.broadcast %202 : vector<1x1x64xf32> to vector<8x8x64xf32>
    %204 = arith.mulf %200, %203 : vector<8x8x64xf32>
    %c0_152 = arith.constant 0 : index
    %c0_153 = arith.constant 0 : index
    %205 = vector.load %arg4[%c0_152, %c0_153] : memref<1x64xf32, #tpu.memory_space<vmem>>, vector<1x64xf32>
    %206 = vector.shape_cast %205 : vector<1x64xf32> to vector<1x1x64xf32>
    %207 = vector.broadcast %206 : vector<1x1x64xf32> to vector<8x8x64xf32>
    %208 = arith.addf %204, %207 : vector<8x8x64xf32>
    %cst_154 = arith.constant 0.000000e+00 : f32
    %209 = vector.broadcast %cst_154 : f32 to vector<8x8x64xf32>
    %210 = arith.maximumf %208, %209 : vector<8x8x64xf32>
    %cst_155 = arith.constant 0.000000e+00 : f32
    %211 = vector.broadcast %cst_155 : f32 to vector<12x12x64xf32>
    %c0_156 = arith.constant 0 : index
    %c0_157 = arith.constant 0 : index
    %c0_158 = arith.constant 0 : index
    %212 = vector.load %arg11[%c0_156, %c0_157, %c0_158] : memref<12x12x64xf32, #tpu.memory_space<vmem>>, vector<12x12x64xf32>
    tpu.vector_store %arg11[%c0_156, %c0_157, %c0_158], %211 {strides = array<i32>} : memref<12x12x64xf32, #tpu.memory_space<vmem>>, vector<12x12x64xf32>,
    %c2_159 = arith.constant 2 : index
    %c2_160 = arith.constant 2 : index
    %c0_161 = arith.constant 0 : index
    %213 = vector.load %arg11[%c2_159, %c2_160, %c0_161] : memref<12x12x64xf32, #tpu.memory_space<vmem>>, vector<8x8x64xf32>
    tpu.vector_store %arg11[%c2_159, %c2_160, %c0_161], %210 {strides = array<i32>} : memref<12x12x64xf32, #tpu.memory_space<vmem>>, vector<8x8x64xf32>,
    %cst_162 = arith.constant 0.000000e+00 : f32
    %214 = vector.broadcast %cst_162 : f32 to vector<64x128xf32>
    %c0_163 = arith.constant 0 : index
    %c0_164 = arith.constant 0 : index
    %c0_165 = arith.constant 0 : index
    %215 = vector.load %arg11[%c0_163, %c0_164, %c0_165] : memref<12x12x64xf32, #tpu.memory_space<vmem>>, vector<8x8x64xf32>
    %216 = vector.shape_cast %215 : vector<8x8x64xf32> to vector<64x64xf32>
    %217 = arith.truncf %216 : vector<64x64xf32> to vector<64x64xbf16>
    %c0_166 = arith.constant 0 : index
    %c0_167 = arith.constant 0 : index
    %c0_168 = arith.constant 0 : index
    %218 = vector.load %arg5[%c0_166, %c0_167, %c0_168] : memref<25x64x128xbf16, #tpu.memory_space<vmem>>, vector<1x64x128xbf16>
    %219 = vector.shape_cast %218 : vector<1x64x128xbf16> to vector<64x128xbf16>
    %cst_169 = arith.constant dense<0.000000e+00> : vector<64x128xf32>
    %220 = tpu.matmul %217, %219, %cst_169 {dimension_numbers = #tpu.dot_dimension_numbers<[1], [0], [0], [1], [0, 0, 1, 1], [], []>} : vector<64x64xbf16>, vector<64x128xbf16>, vector<64x128xf32> -> vector<64x128xf32>
    %221 = arith.addf %214, %220 : vector<64x128xf32>
    %c0_170 = arith.constant 0 : index
    %c1_171 = arith.constant 1 : index
    %c0_172 = arith.constant 0 : index
    %222 = vector.load %arg11[%c0_170, %c1_171, %c0_172] : memref<12x12x64xf32, #tpu.memory_space<vmem>>, vector<8x8x64xf32>
    %223 = vector.shape_cast %222 : vector<8x8x64xf32> to vector<64x64xf32>
    %224 = arith.truncf %223 : vector<64x64xf32> to vector<64x64xbf16>
    %c1_173 = arith.constant 1 : index
    %c0_174 = arith.constant 0 : index
    %c0_175 = arith.constant 0 : index
    %225 = vector.load %arg5[%c1_173, %c0_174, %c0_175] : memref<25x64x128xbf16, #tpu.memory_space<vmem>>, vector<1x64x128xbf16>
    %226 = vector.shape_cast %225 : vector<1x64x128xbf16> to vector<64x128xbf16>
    %cst_176 = arith.constant dense<0.000000e+00> : vector<64x128xf32>
    %227 = tpu.matmul %224, %226, %cst_176 {dimension_numbers = #tpu.dot_dimension_numbers<[1], [0], [0], [1], [0, 0, 1, 1], [], []>} : vector<64x64xbf16>, vector<64x128xbf16>, vector<64x128xf32> -> vector<64x128xf32>
    %228 = arith.addf %221, %227 : vector<64x128xf32>
    %c0_177 = arith.constant 0 : index
    %c2_178 = arith.constant 2 : index
    %c0_179 = arith.constant 0 : index
    %229 = vector.load %arg11[%c0_177, %c2_178, %c0_179] : memref<12x12x64xf32, #tpu.memory_space<vmem>>, vector<8x8x64xf32>
    %230 = vector.shape_cast %229 : vector<8x8x64xf32> to vector<64x64xf32>
    %231 = arith.truncf %230 : vector<64x64xf32> to vector<64x64xbf16>
    %c2_180 = arith.constant 2 : index
    %c0_181 = arith.constant 0 : index
    %c0_182 = arith.constant 0 : index
    %232 = vector.load %arg5[%c2_180, %c0_181, %c0_182] : memref<25x64x128xbf16, #tpu.memory_space<vmem>>, vector<1x64x128xbf16>
    %233 = vector.shape_cast %232 : vector<1x64x128xbf16> to vector<64x128xbf16>
    %cst_183 = arith.constant dense<0.000000e+00> : vector<64x128xf32>
    %234 = tpu.matmul %231, %233, %cst_183 {dimension_numbers = #tpu.dot_dimension_numbers<[1], [0], [0], [1], [0, 0, 1, 1], [], []>} : vector<64x64xbf16>, vector<64x128xbf16>, vector<64x128xf32> -> vector<64x128xf32>
    %235 = arith.addf %228, %234 : vector<64x128xf32>
    %c0_184 = arith.constant 0 : index
    %c3_185 = arith.constant 3 : index
    %c0_186 = arith.constant 0 : index
    %236 = vector.load %arg11[%c0_184, %c3_185, %c0_186] : memref<12x12x64xf32, #tpu.memory_space<vmem>>, vector<8x8x64xf32>
    %237 = vector.shape_cast %236 : vector<8x8x64xf32> to vector<64x64xf32>
    %238 = arith.truncf %237 : vector<64x64xf32> to vector<64x64xbf16>
    %c3_187 = arith.constant 3 : index
    %c0_188 = arith.constant 0 : index
    %c0_189 = arith.constant 0 : index
    %239 = vector.load %arg5[%c3_187, %c0_188, %c0_189] : memref<25x64x128xbf16, #tpu.memory_space<vmem>>, vector<1x64x128xbf16>
    %240 = vector.shape_cast %239 : vector<1x64x128xbf16> to vector<64x128xbf16>
    %cst_190 = arith.constant dense<0.000000e+00> : vector<64x128xf32>
    %241 = tpu.matmul %238, %240, %cst_190 {dimension_numbers = #tpu.dot_dimension_numbers<[1], [0], [0], [1], [0, 0, 1, 1], [], []>} : vector<64x64xbf16>, vector<64x128xbf16>, vector<64x128xf32> -> vector<64x128xf32>
    %242 = arith.addf %235, %241 : vector<64x128xf32>
    %c0_191 = arith.constant 0 : index
    %c4_192 = arith.constant 4 : index
    %c0_193 = arith.constant 0 : index
    %243 = vector.load %arg11[%c0_191, %c4_192, %c0_193] : memref<12x12x64xf32, #tpu.memory_space<vmem>>, vector<8x8x64xf32>
    %244 = vector.shape_cast %243 : vector<8x8x64xf32> to vector<64x64xf32>
    %245 = arith.truncf %244 : vector<64x64xf32> to vector<64x64xbf16>
    %c4_194 = arith.constant 4 : index
    %c0_195 = arith.constant 0 : index
    %c0_196 = arith.constant 0 : index
    %246 = vector.load %arg5[%c4_194, %c0_195, %c0_196] : memref<25x64x128xbf16, #tpu.memory_space<vmem>>, vector<1x64x128xbf16>
    %247 = vector.shape_cast %246 : vector<1x64x128xbf16> to vector<64x128xbf16>
    %cst_197 = arith.constant dense<0.000000e+00> : vector<64x128xf32>
    %248 = tpu.matmul %245, %247, %cst_197 {dimension_numbers = #tpu.dot_dimension_numbers<[1], [0], [0], [1], [0, 0, 1, 1], [], []>} : vector<64x64xbf16>, vector<64x128xbf16>, vector<64x128xf32> -> vector<64x128xf32>
    %249 = arith.addf %242, %248 : vector<64x128xf32>
    %c1_198 = arith.constant 1 : index
    %c0_199 = arith.constant 0 : index
    %c0_200 = arith.constant 0 : index
    %250 = vector.load %arg11[%c1_198, %c0_199, %c0_200] : memref<12x12x64xf32, #tpu.memory_space<vmem>>, vector<8x8x64xf32>
    %251 = vector.shape_cast %250 : vector<8x8x64xf32> to vector<64x64xf32>
    %252 = arith.truncf %251 : vector<64x64xf32> to vector<64x64xbf16>
    %c5_201 = arith.constant 5 : index
    %c0_202 = arith.constant 0 : index
    %c0_203 = arith.constant 0 : index
    %253 = vector.load %arg5[%c5_201, %c0_202, %c0_203] : memref<25x64x128xbf16, #tpu.memory_space<vmem>>, vector<1x64x128xbf16>
    %254 = vector.shape_cast %253 : vector<1x64x128xbf16> to vector<64x128xbf16>
    %cst_204 = arith.constant dense<0.000000e+00> : vector<64x128xf32>
    %255 = tpu.matmul %252, %254, %cst_204 {dimension_numbers = #tpu.dot_dimension_numbers<[1], [0], [0], [1], [0, 0, 1, 1], [], []>} : vector<64x64xbf16>, vector<64x128xbf16>, vector<64x128xf32> -> vector<64x128xf32>
    %256 = arith.addf %249, %255 : vector<64x128xf32>
    %c1_205 = arith.constant 1 : index
    %c1_206 = arith.constant 1 : index
    %c0_207 = arith.constant 0 : index
    %257 = vector.load %arg11[%c1_205, %c1_206, %c0_207] : memref<12x12x64xf32, #tpu.memory_space<vmem>>, vector<8x8x64xf32>
    %258 = vector.shape_cast %257 : vector<8x8x64xf32> to vector<64x64xf32>
    %259 = arith.truncf %258 : vector<64x64xf32> to vector<64x64xbf16>
    %c6_208 = arith.constant 6 : index
    %c0_209 = arith.constant 0 : index
    %c0_210 = arith.constant 0 : index
    %260 = vector.load %arg5[%c6_208, %c0_209, %c0_210] : memref<25x64x128xbf16, #tpu.memory_space<vmem>>, vector<1x64x128xbf16>
    %261 = vector.shape_cast %260 : vector<1x64x128xbf16> to vector<64x128xbf16>
    %cst_211 = arith.constant dense<0.000000e+00> : vector<64x128xf32>
    %262 = tpu.matmul %259, %261, %cst_211 {dimension_numbers = #tpu.dot_dimension_numbers<[1], [0], [0], [1], [0, 0, 1, 1], [], []>} : vector<64x64xbf16>, vector<64x128xbf16>, vector<64x128xf32> -> vector<64x128xf32>
    %263 = arith.addf %256, %262 : vector<64x128xf32>
    %c1_212 = arith.constant 1 : index
    %c2_213 = arith.constant 2 : index
    %c0_214 = arith.constant 0 : index
    %264 = vector.load %arg11[%c1_212, %c2_213, %c0_214] : memref<12x12x64xf32, #tpu.memory_space<vmem>>, vector<8x8x64xf32>
    %265 = vector.shape_cast %264 : vector<8x8x64xf32> to vector<64x64xf32>
    %266 = arith.truncf %265 : vector<64x64xf32> to vector<64x64xbf16>
    %c7_215 = arith.constant 7 : index
    %c0_216 = arith.constant 0 : index
    %c0_217 = arith.constant 0 : index
    %267 = vector.load %arg5[%c7_215, %c0_216, %c0_217] : memref<25x64x128xbf16, #tpu.memory_space<vmem>>, vector<1x64x128xbf16>
    %268 = vector.shape_cast %267 : vector<1x64x128xbf16> to vector<64x128xbf16>
    %cst_218 = arith.constant dense<0.000000e+00> : vector<64x128xf32>
    %269 = tpu.matmul %266, %268, %cst_218 {dimension_numbers = #tpu.dot_dimension_numbers<[1], [0], [0], [1], [0, 0, 1, 1], [], []>} : vector<64x64xbf16>, vector<64x128xbf16>, vector<64x128xf32> -> vector<64x128xf32>
    %270 = arith.addf %263, %269 : vector<64x128xf32>
    %c1_219 = arith.constant 1 : index
    %c3_220 = arith.constant 3 : index
    %c0_221 = arith.constant 0 : index
    %271 = vector.load %arg11[%c1_219, %c3_220, %c0_221] : memref<12x12x64xf32, #tpu.memory_space<vmem>>, vector<8x8x64xf32>
    %272 = vector.shape_cast %271 : vector<8x8x64xf32> to vector<64x64xf32>
    %273 = arith.truncf %272 : vector<64x64xf32> to vector<64x64xbf16>
    %c8_222 = arith.constant 8 : index
    %c0_223 = arith.constant 0 : index
    %c0_224 = arith.constant 0 : index
    %274 = vector.load %arg5[%c8_222, %c0_223, %c0_224] : memref<25x64x128xbf16, #tpu.memory_space<vmem>>, vector<1x64x128xbf16>
    %275 = vector.shape_cast %274 : vector<1x64x128xbf16> to vector<64x128xbf16>
    %cst_225 = arith.constant dense<0.000000e+00> : vector<64x128xf32>
    %276 = tpu.matmul %273, %275, %cst_225 {dimension_numbers = #tpu.dot_dimension_numbers<[1], [0], [0], [1], [0, 0, 1, 1], [], []>} : vector<64x64xbf16>, vector<64x128xbf16>, vector<64x128xf32> -> vector<64x128xf32>
    %277 = arith.addf %270, %276 : vector<64x128xf32>
    %c1_226 = arith.constant 1 : index
    %c4_227 = arith.constant 4 : index
    %c0_228 = arith.constant 0 : index
    %278 = vector.load %arg11[%c1_226, %c4_227, %c0_228] : memref<12x12x64xf32, #tpu.memory_space<vmem>>, vector<8x8x64xf32>
    %279 = vector.shape_cast %278 : vector<8x8x64xf32> to vector<64x64xf32>
    %280 = arith.truncf %279 : vector<64x64xf32> to vector<64x64xbf16>
    %c9_229 = arith.constant 9 : index
    %c0_230 = arith.constant 0 : index
    %c0_231 = arith.constant 0 : index
    %281 = vector.load %arg5[%c9_229, %c0_230, %c0_231] : memref<25x64x128xbf16, #tpu.memory_space<vmem>>, vector<1x64x128xbf16>
    %282 = vector.shape_cast %281 : vector<1x64x128xbf16> to vector<64x128xbf16>
    %cst_232 = arith.constant dense<0.000000e+00> : vector<64x128xf32>
    %283 = tpu.matmul %280, %282, %cst_232 {dimension_numbers = #tpu.dot_dimension_numbers<[1], [0], [0], [1], [0, 0, 1, 1], [], []>} : vector<64x64xbf16>, vector<64x128xbf16>, vector<64x128xf32> -> vector<64x128xf32>
    %284 = arith.addf %277, %283 : vector<64x128xf32>
    %c2_233 = arith.constant 2 : index
    %c0_234 = arith.constant 0 : index
    %c0_235 = arith.constant 0 : index
    %285 = vector.load %arg11[%c2_233, %c0_234, %c0_235] : memref<12x12x64xf32, #tpu.memory_space<vmem>>, vector<8x8x64xf32>
    %286 = vector.shape_cast %285 : vector<8x8x64xf32> to vector<64x64xf32>
    %287 = arith.truncf %286 : vector<64x64xf32> to vector<64x64xbf16>
    %c10_236 = arith.constant 10 : index
    %c0_237 = arith.constant 0 : index
    %c0_238 = arith.constant 0 : index
    %288 = vector.load %arg5[%c10_236, %c0_237, %c0_238] : memref<25x64x128xbf16, #tpu.memory_space<vmem>>, vector<1x64x128xbf16>
    %289 = vector.shape_cast %288 : vector<1x64x128xbf16> to vector<64x128xbf16>
    %cst_239 = arith.constant dense<0.000000e+00> : vector<64x128xf32>
    %290 = tpu.matmul %287, %289, %cst_239 {dimension_numbers = #tpu.dot_dimension_numbers<[1], [0], [0], [1], [0, 0, 1, 1], [], []>} : vector<64x64xbf16>, vector<64x128xbf16>, vector<64x128xf32> -> vector<64x128xf32>
    %291 = arith.addf %284, %290 : vector<64x128xf32>
    %c2_240 = arith.constant 2 : index
    %c1_241 = arith.constant 1 : index
    %c0_242 = arith.constant 0 : index
    %292 = vector.load %arg11[%c2_240, %c1_241, %c0_242] : memref<12x12x64xf32, #tpu.memory_space<vmem>>, vector<8x8x64xf32>
    %293 = vector.shape_cast %292 : vector<8x8x64xf32> to vector<64x64xf32>
    %294 = arith.truncf %293 : vector<64x64xf32> to vector<64x64xbf16>
    %c11_243 = arith.constant 11 : index
    %c0_244 = arith.constant 0 : index
    %c0_245 = arith.constant 0 : index
    %295 = vector.load %arg5[%c11_243, %c0_244, %c0_245] : memref<25x64x128xbf16, #tpu.memory_space<vmem>>, vector<1x64x128xbf16>
    %296 = vector.shape_cast %295 : vector<1x64x128xbf16> to vector<64x128xbf16>
    %cst_246 = arith.constant dense<0.000000e+00> : vector<64x128xf32>
    %297 = tpu.matmul %294, %296, %cst_246 {dimension_numbers = #tpu.dot_dimension_numbers<[1], [0], [0], [1], [0, 0, 1, 1], [], []>} : vector<64x64xbf16>, vector<64x128xbf16>, vector<64x128xf32> -> vector<64x128xf32>
    %298 = arith.addf %291, %297 : vector<64x128xf32>
    %c2_247 = arith.constant 2 : index
    %c2_248 = arith.constant 2 : index
    %c0_249 = arith.constant 0 : index
    %299 = vector.load %arg11[%c2_247, %c2_248, %c0_249] : memref<12x12x64xf32, #tpu.memory_space<vmem>>, vector<8x8x64xf32>
    %300 = vector.shape_cast %299 : vector<8x8x64xf32> to vector<64x64xf32>
    %301 = arith.truncf %300 : vector<64x64xf32> to vector<64x64xbf16>
    %c12_250 = arith.constant 12 : index
    %c0_251 = arith.constant 0 : index
    %c0_252 = arith.constant 0 : index
    %302 = vector.load %arg5[%c12_250, %c0_251, %c0_252] : memref<25x64x128xbf16, #tpu.memory_space<vmem>>, vector<1x64x128xbf16>
    %303 = vector.shape_cast %302 : vector<1x64x128xbf16> to vector<64x128xbf16>
    %cst_253 = arith.constant dense<0.000000e+00> : vector<64x128xf32>
    %304 = tpu.matmul %301, %303, %cst_253 {dimension_numbers = #tpu.dot_dimension_numbers<[1], [0], [0], [1], [0, 0, 1, 1], [], []>} : vector<64x64xbf16>, vector<64x128xbf16>, vector<64x128xf32> -> vector<64x128xf32>
    %305 = arith.addf %298, %304 : vector<64x128xf32>
    %c2_254 = arith.constant 2 : index
    %c3_255 = arith.constant 3 : index
    %c0_256 = arith.constant 0 : index
    %306 = vector.load %arg11[%c2_254, %c3_255, %c0_256] : memref<12x12x64xf32, #tpu.memory_space<vmem>>, vector<8x8x64xf32>
    %307 = vector.shape_cast %306 : vector<8x8x64xf32> to vector<64x64xf32>
    %308 = arith.truncf %307 : vector<64x64xf32> to vector<64x64xbf16>
    %c13_257 = arith.constant 13 : index
    %c0_258 = arith.constant 0 : index
    %c0_259 = arith.constant 0 : index
    %309 = vector.load %arg5[%c13_257, %c0_258, %c0_259] : memref<25x64x128xbf16, #tpu.memory_space<vmem>>, vector<1x64x128xbf16>
    %310 = vector.shape_cast %309 : vector<1x64x128xbf16> to vector<64x128xbf16>
    %cst_260 = arith.constant dense<0.000000e+00> : vector<64x128xf32>
    %311 = tpu.matmul %308, %310, %cst_260 {dimension_numbers = #tpu.dot_dimension_numbers<[1], [0], [0], [1], [0, 0, 1, 1], [], []>} : vector<64x64xbf16>, vector<64x128xbf16>, vector<64x128xf32> -> vector<64x128xf32>
    %312 = arith.addf %305, %311 : vector<64x128xf32>
    %c2_261 = arith.constant 2 : index
    %c4_262 = arith.constant 4 : index
    %c0_263 = arith.constant 0 : index
    %313 = vector.load %arg11[%c2_261, %c4_262, %c0_263] : memref<12x12x64xf32, #tpu.memory_space<vmem>>, vector<8x8x64xf32>
    %314 = vector.shape_cast %313 : vector<8x8x64xf32> to vector<64x64xf32>
    %315 = arith.truncf %314 : vector<64x64xf32> to vector<64x64xbf16>
    %c14_264 = arith.constant 14 : index
    %c0_265 = arith.constant 0 : index
    %c0_266 = arith.constant 0 : index
    %316 = vector.load %arg5[%c14_264, %c0_265, %c0_266] : memref<25x64x128xbf16, #tpu.memory_space<vmem>>, vector<1x64x128xbf16>
    %317 = vector.shape_cast %316 : vector<1x64x128xbf16> to vector<64x128xbf16>
    %cst_267 = arith.constant dense<0.000000e+00> : vector<64x128xf32>
    %318 = tpu.matmul %315, %317, %cst_267 {dimension_numbers = #tpu.dot_dimension_numbers<[1], [0], [0], [1], [0, 0, 1, 1], [], []>} : vector<64x64xbf16>, vector<64x128xbf16>, vector<64x128xf32> -> vector<64x128xf32>
    %319 = arith.addf %312, %318 : vector<64x128xf32>
    %c3_268 = arith.constant 3 : index
    %c0_269 = arith.constant 0 : index
    %c0_270 = arith.constant 0 : index
    %320 = vector.load %arg11[%c3_268, %c0_269, %c0_270] : memref<12x12x64xf32, #tpu.memory_space<vmem>>, vector<8x8x64xf32>
    %321 = vector.shape_cast %320 : vector<8x8x64xf32> to vector<64x64xf32>
    %322 = arith.truncf %321 : vector<64x64xf32> to vector<64x64xbf16>
    %c15_271 = arith.constant 15 : index
    %c0_272 = arith.constant 0 : index
    %c0_273 = arith.constant 0 : index
    %323 = vector.load %arg5[%c15_271, %c0_272, %c0_273] : memref<25x64x128xbf16, #tpu.memory_space<vmem>>, vector<1x64x128xbf16>
    %324 = vector.shape_cast %323 : vector<1x64x128xbf16> to vector<64x128xbf16>
    %cst_274 = arith.constant dense<0.000000e+00> : vector<64x128xf32>
    %325 = tpu.matmul %322, %324, %cst_274 {dimension_numbers = #tpu.dot_dimension_numbers<[1], [0], [0], [1], [0, 0, 1, 1], [], []>} : vector<64x64xbf16>, vector<64x128xbf16>, vector<64x128xf32> -> vector<64x128xf32>
    %326 = arith.addf %319, %325 : vector<64x128xf32>
    %c3_275 = arith.constant 3 : index
    %c1_276 = arith.constant 1 : index
    %c0_277 = arith.constant 0 : index
    %327 = vector.load %arg11[%c3_275, %c1_276, %c0_277] : memref<12x12x64xf32, #tpu.memory_space<vmem>>, vector<8x8x64xf32>
    %328 = vector.shape_cast %327 : vector<8x8x64xf32> to vector<64x64xf32>
    %329 = arith.truncf %328 : vector<64x64xf32> to vector<64x64xbf16>
    %c16_278 = arith.constant 16 : index
    %c0_279 = arith.constant 0 : index
    %c0_280 = arith.constant 0 : index
    %330 = vector.load %arg5[%c16_278, %c0_279, %c0_280] : memref<25x64x128xbf16, #tpu.memory_space<vmem>>, vector<1x64x128xbf16>
    %331 = vector.shape_cast %330 : vector<1x64x128xbf16> to vector<64x128xbf16>
    %cst_281 = arith.constant dense<0.000000e+00> : vector<64x128xf32>
    %332 = tpu.matmul %329, %331, %cst_281 {dimension_numbers = #tpu.dot_dimension_numbers<[1], [0], [0], [1], [0, 0, 1, 1], [], []>} : vector<64x64xbf16>, vector<64x128xbf16>, vector<64x128xf32> -> vector<64x128xf32>
    %333 = arith.addf %326, %332 : vector<64x128xf32>
    %c3_282 = arith.constant 3 : index
    %c2_283 = arith.constant 2 : index
    %c0_284 = arith.constant 0 : index
    %334 = vector.load %arg11[%c3_282, %c2_283, %c0_284] : memref<12x12x64xf32, #tpu.memory_space<vmem>>, vector<8x8x64xf32>
    %335 = vector.shape_cast %334 : vector<8x8x64xf32> to vector<64x64xf32>
    %336 = arith.truncf %335 : vector<64x64xf32> to vector<64x64xbf16>
    %c17_285 = arith.constant 17 : index
    %c0_286 = arith.constant 0 : index
    %c0_287 = arith.constant 0 : index
    %337 = vector.load %arg5[%c17_285, %c0_286, %c0_287] : memref<25x64x128xbf16, #tpu.memory_space<vmem>>, vector<1x64x128xbf16>
    %338 = vector.shape_cast %337 : vector<1x64x128xbf16> to vector<64x128xbf16>
    %cst_288 = arith.constant dense<0.000000e+00> : vector<64x128xf32>
    %339 = tpu.matmul %336, %338, %cst_288 {dimension_numbers = #tpu.dot_dimension_numbers<[1], [0], [0], [1], [0, 0, 1, 1], [], []>} : vector<64x64xbf16>, vector<64x128xbf16>, vector<64x128xf32> -> vector<64x128xf32>
    %340 = arith.addf %333, %339 : vector<64x128xf32>
    %c3_289 = arith.constant 3 : index
    %c3_290 = arith.constant 3 : index
    %c0_291 = arith.constant 0 : index
    %341 = vector.load %arg11[%c3_289, %c3_290, %c0_291] : memref<12x12x64xf32, #tpu.memory_space<vmem>>, vector<8x8x64xf32>
    %342 = vector.shape_cast %341 : vector<8x8x64xf32> to vector<64x64xf32>
    %343 = arith.truncf %342 : vector<64x64xf32> to vector<64x64xbf16>
    %c18_292 = arith.constant 18 : index
    %c0_293 = arith.constant 0 : index
    %c0_294 = arith.constant 0 : index
    %344 = vector.load %arg5[%c18_292, %c0_293, %c0_294] : memref<25x64x128xbf16, #tpu.memory_space<vmem>>, vector<1x64x128xbf16>
    %345 = vector.shape_cast %344 : vector<1x64x128xbf16> to vector<64x128xbf16>
    %cst_295 = arith.constant dense<0.000000e+00> : vector<64x128xf32>
    %346 = tpu.matmul %343, %345, %cst_295 {dimension_numbers = #tpu.dot_dimension_numbers<[1], [0], [0], [1], [0, 0, 1, 1], [], []>} : vector<64x64xbf16>, vector<64x128xbf16>, vector<64x128xf32> -> vector<64x128xf32>
    %347 = arith.addf %340, %346 : vector<64x128xf32>
    %c3_296 = arith.constant 3 : index
    %c4_297 = arith.constant 4 : index
    %c0_298 = arith.constant 0 : index
    %348 = vector.load %arg11[%c3_296, %c4_297, %c0_298] : memref<12x12x64xf32, #tpu.memory_space<vmem>>, vector<8x8x64xf32>
    %349 = vector.shape_cast %348 : vector<8x8x64xf32> to vector<64x64xf32>
    %350 = arith.truncf %349 : vector<64x64xf32> to vector<64x64xbf16>
    %c19_299 = arith.constant 19 : index
    %c0_300 = arith.constant 0 : index
    %c0_301 = arith.constant 0 : index
    %351 = vector.load %arg5[%c19_299, %c0_300, %c0_301] : memref<25x64x128xbf16, #tpu.memory_space<vmem>>, vector<1x64x128xbf16>
    %352 = vector.shape_cast %351 : vector<1x64x128xbf16> to vector<64x128xbf16>
    %cst_302 = arith.constant dense<0.000000e+00> : vector<64x128xf32>
    %353 = tpu.matmul %350, %352, %cst_302 {dimension_numbers = #tpu.dot_dimension_numbers<[1], [0], [0], [1], [0, 0, 1, 1], [], []>} : vector<64x64xbf16>, vector<64x128xbf16>, vector<64x128xf32> -> vector<64x128xf32>
    %354 = arith.addf %347, %353 : vector<64x128xf32>
    %c4_303 = arith.constant 4 : index
    %c0_304 = arith.constant 0 : index
    %c0_305 = arith.constant 0 : index
    %355 = vector.load %arg11[%c4_303, %c0_304, %c0_305] : memref<12x12x64xf32, #tpu.memory_space<vmem>>, vector<8x8x64xf32>
    %356 = vector.shape_cast %355 : vector<8x8x64xf32> to vector<64x64xf32>
    %357 = arith.truncf %356 : vector<64x64xf32> to vector<64x64xbf16>
    %c20_306 = arith.constant 20 : index
    %c0_307 = arith.constant 0 : index
    %c0_308 = arith.constant 0 : index
    %358 = vector.load %arg5[%c20_306, %c0_307, %c0_308] : memref<25x64x128xbf16, #tpu.memory_space<vmem>>, vector<1x64x128xbf16>
    %359 = vector.shape_cast %358 : vector<1x64x128xbf16> to vector<64x128xbf16>
    %cst_309 = arith.constant dense<0.000000e+00> : vector<64x128xf32>
    %360 = tpu.matmul %357, %359, %cst_309 {dimension_numbers = #tpu.dot_dimension_numbers<[1], [0], [0], [1], [0, 0, 1, 1], [], []>} : vector<64x64xbf16>, vector<64x128xbf16>, vector<64x128xf32> -> vector<64x128xf32>
    %361 = arith.addf %354, %360 : vector<64x128xf32>
    %c4_310 = arith.constant 4 : index
    %c1_311 = arith.constant 1 : index
    %c0_312 = arith.constant 0 : index
    %362 = vector.load %arg11[%c4_310, %c1_311, %c0_312] : memref<12x12x64xf32, #tpu.memory_space<vmem>>, vector<8x8x64xf32>
    %363 = vector.shape_cast %362 : vector<8x8x64xf32> to vector<64x64xf32>
    %364 = arith.truncf %363 : vector<64x64xf32> to vector<64x64xbf16>
    %c21_313 = arith.constant 21 : index
    %c0_314 = arith.constant 0 : index
    %c0_315 = arith.constant 0 : index
    %365 = vector.load %arg5[%c21_313, %c0_314, %c0_315] : memref<25x64x128xbf16, #tpu.memory_space<vmem>>, vector<1x64x128xbf16>
    %366 = vector.shape_cast %365 : vector<1x64x128xbf16> to vector<64x128xbf16>
    %cst_316 = arith.constant dense<0.000000e+00> : vector<64x128xf32>
    %367 = tpu.matmul %364, %366, %cst_316 {dimension_numbers = #tpu.dot_dimension_numbers<[1], [0], [0], [1], [0, 0, 1, 1], [], []>} : vector<64x64xbf16>, vector<64x128xbf16>, vector<64x128xf32> -> vector<64x128xf32>
    %368 = arith.addf %361, %367 : vector<64x128xf32>
    %c4_317 = arith.constant 4 : index
    %c2_318 = arith.constant 2 : index
    %c0_319 = arith.constant 0 : index
    %369 = vector.load %arg11[%c4_317, %c2_318, %c0_319] : memref<12x12x64xf32, #tpu.memory_space<vmem>>, vector<8x8x64xf32>
    %370 = vector.shape_cast %369 : vector<8x8x64xf32> to vector<64x64xf32>
    %371 = arith.truncf %370 : vector<64x64xf32> to vector<64x64xbf16>
    %c22_320 = arith.constant 22 : index
    %c0_321 = arith.constant 0 : index
    %c0_322 = arith.constant 0 : index
    %372 = vector.load %arg5[%c22_320, %c0_321, %c0_322] : memref<25x64x128xbf16, #tpu.memory_space<vmem>>, vector<1x64x128xbf16>
    %373 = vector.shape_cast %372 : vector<1x64x128xbf16> to vector<64x128xbf16>
    %cst_323 = arith.constant dense<0.000000e+00> : vector<64x128xf32>
    %374 = tpu.matmul %371, %373, %cst_323 {dimension_numbers = #tpu.dot_dimension_numbers<[1], [0], [0], [1], [0, 0, 1, 1], [], []>} : vector<64x64xbf16>, vector<64x128xbf16>, vector<64x128xf32> -> vector<64x128xf32>
    %375 = arith.addf %368, %374 : vector<64x128xf32>
    %c4_324 = arith.constant 4 : index
    %c3_325 = arith.constant 3 : index
    %c0_326 = arith.constant 0 : index
    %376 = vector.load %arg11[%c4_324, %c3_325, %c0_326] : memref<12x12x64xf32, #tpu.memory_space<vmem>>, vector<8x8x64xf32>
    %377 = vector.shape_cast %376 : vector<8x8x64xf32> to vector<64x64xf32>
    %378 = arith.truncf %377 : vector<64x64xf32> to vector<64x64xbf16>
    %c23_327 = arith.constant 23 : index
    %c0_328 = arith.constant 0 : index
    %c0_329 = arith.constant 0 : index
    %379 = vector.load %arg5[%c23_327, %c0_328, %c0_329] : memref<25x64x128xbf16, #tpu.memory_space<vmem>>, vector<1x64x128xbf16>
    %380 = vector.shape_cast %379 : vector<1x64x128xbf16> to vector<64x128xbf16>
    %cst_330 = arith.constant dense<0.000000e+00> : vector<64x128xf32>
    %381 = tpu.matmul %378, %380, %cst_330 {dimension_numbers = #tpu.dot_dimension_numbers<[1], [0], [0], [1], [0, 0, 1, 1], [], []>} : vector<64x64xbf16>, vector<64x128xbf16>, vector<64x128xf32> -> vector<64x128xf32>
    %382 = arith.addf %375, %381 : vector<64x128xf32>
    %c4_331 = arith.constant 4 : index
    %c4_332 = arith.constant 4 : index
    %c0_333 = arith.constant 0 : index
    %383 = vector.load %arg11[%c4_331, %c4_332, %c0_333] : memref<12x12x64xf32, #tpu.memory_space<vmem>>, vector<8x8x64xf32>
    %384 = vector.shape_cast %383 : vector<8x8x64xf32> to vector<64x64xf32>
    %385 = arith.truncf %384 : vector<64x64xf32> to vector<64x64xbf16>
    %c24_334 = arith.constant 24 : index
    %c0_335 = arith.constant 0 : index
    %c0_336 = arith.constant 0 : index
    %386 = vector.load %arg5[%c24_334, %c0_335, %c0_336] : memref<25x64x128xbf16, #tpu.memory_space<vmem>>, vector<1x64x128xbf16>
    %387 = vector.shape_cast %386 : vector<1x64x128xbf16> to vector<64x128xbf16>
    %cst_337 = arith.constant dense<0.000000e+00> : vector<64x128xf32>
    %388 = tpu.matmul %385, %387, %cst_337 {dimension_numbers = #tpu.dot_dimension_numbers<[1], [0], [0], [1], [0, 0, 1, 1], [], []>} : vector<64x64xbf16>, vector<64x128xbf16>, vector<64x128xf32> -> vector<64x128xf32>
    %389 = arith.addf %382, %388 : vector<64x128xf32>
    %c0_338 = arith.constant 0 : index
    %c0_339 = arith.constant 0 : index
    %390 = vector.load %arg6[%c0_338, %c0_339] : memref<1x128xf32, #tpu.memory_space<vmem>>, vector<1x128xf32>
    %391 = vector.broadcast %390 : vector<1x128xf32> to vector<64x128xf32>
    %392 = arith.mulf %389, %391 : vector<64x128xf32>
    %c0_340 = arith.constant 0 : index
    %c0_341 = arith.constant 0 : index
    %393 = vector.load %arg7[%c0_340, %c0_341] : memref<1x128xf32, #tpu.memory_space<vmem>>, vector<1x128xf32>
    %394 = vector.broadcast %393 : vector<1x128xf32> to vector<64x128xf32>
    %395 = arith.addf %392, %394 : vector<64x128xf32>
    %cst_342 = arith.constant 0.000000e+00 : f32
    %396 = vector.broadcast %cst_342 : f32 to vector<64x128xf32>
    %397 = arith.maximumf %395, %396 : vector<64x128xf32>
    %398 = vector.extract_strided_slice %397 {offsets = [0, 0], sizes = [8, 128], strides = [1, 1]} : vector<64x128xf32> to vector<8x128xf32>
    %399 = vector.extract_strided_slice %397 {offsets = [16, 0], sizes = [8, 128], strides = [1, 1]} : vector<64x128xf32> to vector<8x128xf32>
    %400 = arith.maximumf %398, %399 : vector<8x128xf32>
    %401 = vector.extract_strided_slice %397 {offsets = [32, 0], sizes = [8, 128], strides = [1, 1]} : vector<64x128xf32> to vector<8x128xf32>
    %402 = arith.maximumf %400, %401 : vector<8x128xf32>
    %403 = vector.extract_strided_slice %397 {offsets = [48, 0], sizes = [8, 128], strides = [1, 1]} : vector<64x128xf32> to vector<8x128xf32>
    %404 = arith.maximumf %402, %403 : vector<8x128xf32>
    %405 = vector.extract_strided_slice %404 {offsets = [0, 0], sizes = [1, 128], strides = [1, 1]} : vector<8x128xf32> to vector<1x128xf32>
    %406 = vector.extract_strided_slice %404 {offsets = [2, 0], sizes = [1, 128], strides = [1, 1]} : vector<8x128xf32> to vector<1x128xf32>
    %407 = arith.maximumf %405, %406 : vector<1x128xf32>
    %408 = vector.extract_strided_slice %404 {offsets = [4, 0], sizes = [1, 128], strides = [1, 1]} : vector<8x128xf32> to vector<1x128xf32>
    %409 = arith.maximumf %407, %408 : vector<1x128xf32>
    %410 = vector.extract_strided_slice %404 {offsets = [6, 0], sizes = [1, 128], strides = [1, 1]} : vector<8x128xf32> to vector<1x128xf32>
    %411 = arith.maximumf %409, %410 : vector<1x128xf32>
    %c0_343 = arith.constant 0 : index
    %c0_344 = arith.constant 0 : index
    %412 = vector.load %arg8[%c0_343, %c0_344] : memref<128x128xf32, #tpu.memory_space<vmem>>, vector<128x128xf32>
    %cst_345 = arith.constant dense<0.000000e+00> : vector<1x128xf32>
    %413 = tpu.matmul %411, %412, %cst_345 {dimension_numbers = #tpu.dot_dimension_numbers<[1], [0], [0], [1], [0, 0, 1, 1], [], []>} : vector<1x128xf32>, vector<128x128xf32>, vector<1x128xf32> -> vector<1x128xf32>
    %c0_346 = arith.constant 0 : index
    %c0_347 = arith.constant 0 : index
    %414 = vector.load %arg9[%c0_346, %c0_347] : memref<1x128xf32, #tpu.memory_space<vmem>>, vector<1x128xf32>
    %415 = arith.addf %413, %414 : vector<1x128xf32>
    %416 = tpu.iota {dimensions = array<i32: 1>} : vector<1x128xi32>
    %cst_348 = arith.constant 0.000000e+00 : f32
    %417 = vector.broadcast %cst_348 : f32 to vector<1x128xf32>
    %c0_i32 = arith.constant 0 : i32
    %418 = vector.broadcast %c0_i32 : i32 to vector<1x128xi32>
    %419 = arith.cmpi sge, %416, %418 : vector<1x128xi32>
    %c3_i32 = arith.constant 3 : i32
    %420 = vector.broadcast %c3_i32 : i32 to vector<1x128xi32>
    %421 = arith.cmpi slt, %416, %420 : vector<1x128xi32>
    %422 = arith.andi %419, %421 : vector<1x128xi1>
    %cst_349 = arith.constant 0xFF800000 : f32
    %423 = vector.broadcast %cst_349 : f32 to vector<1x128xf32>
    %424 = arith.select %422, %415, %423 : vector<1x128xi1>, vector<1x128xf32>
    %cst_350 = arith.constant dense<0xFF800000> : vector<1xf32>
    %425 = vector.multi_reduction <maximumf>, %424, %cst_350 [1] : vector<1x128xf32> to vector<1xf32>
    %426 = vector.shape_cast %425 : vector<1xf32> to vector<1x1xf32>
    %427 = vector.broadcast %426 : vector<1x1xf32> to vector<1x128xf32>
    %428 = arith.subf %415, %427 : vector<1x128xf32>
    %cst_351 = arith.constant 0xFF800000 : f32
    %429 = vector.broadcast %cst_351 : f32 to vector<1x128xf32>
    %430 = arith.select %422, %428, %429 : vector<1x128xi1>, vector<1x128xf32>
    %431 = math.exp %430 : vector<1x128xf32>
    %432 = vector.broadcast %426 : vector<1x1xf32> to vector<1x128xf32>
    %433 = arith.subf %415, %432 : vector<1x128xf32>
    %cst_352 = arith.constant dense<0.000000e+00> : vector<1xf32>
    %434 = vector.multi_reduction <add>, %431, %cst_352 [1] : vector<1x128xf32> to vector<1xf32>
    %435 = vector.shape_cast %434 : vector<1xf32> to vector<1x1xf32>
    %436 = math.log %435 : vector<1x1xf32>
    %437 = vector.broadcast %436 : vector<1x1xf32> to vector<1x128xf32>
    %438 = arith.subf %433, %437 : vector<1x128xf32>
    %439 = arith.select %422, %438, %417 : vector<1x128xi1>, vector<1x128xf32>
    %c3_i32_353 = arith.constant 3 : i32
    %440 = vector.broadcast %c3_i32_353 : i32 to vector<1x128xi32>
    %441 = arith.cmpi sge, %416, %440 : vector<1x128xi32>
    %c8_i32 = arith.constant 8 : i32
    %442 = vector.broadcast %c8_i32 : i32 to vector<1x128xi32>
    %443 = arith.cmpi slt, %416, %442 : vector<1x128xi32>
    %444 = arith.andi %441, %443 : vector<1x128xi1>
    %cst_354 = arith.constant 0.000000e+00 : f32
    %445 = vector.broadcast %cst_354 : f32 to vector<1x128xf32>
    %446 = arith.subf %445, %415 : vector<1x128xf32>
    %447 = math.exp %446 : vector<1x128xf32>
    %cst_355 = arith.constant 1.000000e+00 : f32
    %448 = vector.broadcast %cst_355 : f32 to vector<1x128xf32>
    %449 = arith.addf %448, %447 : vector<1x128xf32>
    %450 = tpu.reciprocal %449 {approx = true} : vector<1x128xf32> -> vector<1x128xf32>
    %451 = arith.select %444, %450, %439 : vector<1x128xi1>, vector<1x128xf32>
    %c0_356 = arith.constant 0 : index
    %c0_357 = arith.constant 0 : index
    %c0_358 = arith.constant 0 : index
    %452 = vector.load %arg10[%c0_356, %c0_357, %c0_358] : memref<1x1x128xf32, #tpu.memory_space<vmem>>, vector<1x1x128xf32>
    %453 = vector.shape_cast %452 : vector<1x1x128xf32> to vector<1x128xf32>
    %454 = vector.shape_cast %451 : vector<1x128xf32> to vector<1x1x128xf32>
    tpu.vector_store %arg10[%c0_356, %c0_357, %c0_358], %454 {strides = array<i32>} : memref<1x1x128xf32, #tpu.memory_space<vmem>>, vector<1x1x128xf32>,
    return
  }
  func.func @transform_0(%arg0: i32) -> (i32, i32, i32, i32, i32) {
    %c0_i32 = arith.constant 0 : i32
    %c0_i32_0 = arith.constant 0 : i32
    %c0_i32_1 = arith.constant 0 : i32
    %c0_i32_2 = arith.constant 0 : i32
    %c0_i32_3 = arith.constant 0 : i32
    return %arg0, %c0_i32, %c0_i32_0, %c0_i32_1, %c0_i32_2 : i32, i32, i32, i32, i32
  }
  func.func @transform_1(%arg0: i32) -> (i32, i32) {
    %c0_i32 = arith.constant 0 : i32
    %c0_i32_0 = arith.constant 0 : i32
    %c0_i32_1 = arith.constant 0 : i32
    return %c0_i32, %c0_i32_0 : i32, i32
  }
  func.func @transform_2(%arg0: i32) -> (i32, i32) {
    %c0_i32 = arith.constant 0 : i32
    %c0_i32_0 = arith.constant 0 : i32
    %c0_i32_1 = arith.constant 0 : i32
    return %c0_i32, %c0_i32_0 : i32, i32
  }
  func.func @transform_3(%arg0: i32) -> (i32, i32) {
    %c0_i32 = arith.constant 0 : i32
    %c0_i32_0 = arith.constant 0 : i32
    %c0_i32_1 = arith.constant 0 : i32
    return %c0_i32, %c0_i32_0 : i32, i32
  }
  func.func @transform_4(%arg0: i32) -> (i32, i32, i32) {
    %c0_i32 = arith.constant 0 : i32
    %c0_i32_0 = arith.constant 0 : i32
    %c0_i32_1 = arith.constant 0 : i32
    %c0_i32_2 = arith.constant 0 : i32
    return %c0_i32, %c0_i32_0, %c0_i32_1 : i32, i32, i32
  }
  func.func @transform_5(%arg0: i32) -> (i32, i32) {
    %c0_i32 = arith.constant 0 : i32
    %c0_i32_0 = arith.constant 0 : i32
    %c0_i32_1 = arith.constant 0 : i32
    return %c0_i32, %c0_i32_0 : i32, i32
  }
  func.func @transform_6(%arg0: i32) -> (i32, i32) {
    %c0_i32 = arith.constant 0 : i32
    %c0_i32_0 = arith.constant 0 : i32
    %c0_i32_1 = arith.constant 0 : i32
    return %c0_i32, %c0_i32_0 : i32, i32
  }
  func.func @transform_7(%arg0: i32) -> (i32, i32) {
    %c0_i32 = arith.constant 0 : i32
    %c0_i32_0 = arith.constant 0 : i32
    %c0_i32_1 = arith.constant 0 : i32
    return %c0_i32, %c0_i32_0 : i32, i32
  }
  func.func @transform_8(%arg0: i32) -> (i32, i32) {
    %c0_i32 = arith.constant 0 : i32
    %c0_i32_0 = arith.constant 0 : i32
    %c0_i32_1 = arith.constant 0 : i32
    return %c0_i32, %c0_i32_0 : i32, i32
  }
  func.func @transform_9(%arg0: i32) -> (i32, i32, i32) {
    %c0_i32 = arith.constant 0 : i32
    %c0_i32_0 = arith.constant 0 : i32
    %c0_i32_1 = arith.constant 0 : i32
    return %arg0, %c0_i32, %c0_i32_0 : i32, i32, i32
  }
}

</mosaic_0001>

<bundles_post_ra>
// kernel: _lambda_.1
= control target key start
LH: loop header
LB: loop body
LE: loop exit
PB: predicated region body
PF: predicated region fallthrough
CT: control target
= control target key end

     0   :  { %s7041_s30 = smov 0   ;;  %s9089_s0 = inlined_call_operand.vmem [shape: f32[2,4,10,10,1], index: 0, kind: input, shape index: {}]   ;;  %s9090_s1 = inlined_call_operand.vmem [shape: f32[25,64], index: 1, kind: input, shape index: {}]   ;;  %s9091_s2 = inlined_call_operand.vmem [shape: f32[1,64], index: 2, kind: input, shape index: {}]   ;;  %s9092_s3 = inlined_call_operand.vmem [shape: f32[1,64], index: 3, kind: input, shape index: {}]   ;;  %s9093_s4 = inlined_call_operand.vmem [shape: bf16[25,64,128], index: 4, kind: input, shape index: {}]   ;;  %s9094_s5 = inlined_call_operand.vmem [shape: f32[1,128], index: 5, kind: input, shape index: {}]   ;;  %s9095_s6 = inlined_call_operand.vmem [shape: f32[1,128], index: 6, kind: input, shape index: {}]   ;;  %s9096_s7 = inlined_call_operand.vmem [shape: f32[128,128], index: 7, kind: input, shape index: {}]   ;;  %s9097_s8 = inlined_call_operand.vmem [shape: f32[1,128], index: 8, kind: input, shape index: {}]   ;;  %s9098_s9 = inlined_call_operand.vmem [shape: f32[2,1,128], index: 9, kind: output, shape index: {}]  }
   0x1 LB: > { %s5385_s10 = sadd.s32 4294967295, %s6985_s30   ;;  %p5389_p0 = scmp.ge.s32.totalorder %s6985_s30, 1  ;;  %s6985_s30 = sphi %s7041_s30, %s19_s30  }
   0x2   : > { %p287_p1 = scmp.lt.s32.totalorder %s6985_s30, 3 }
   0x4   : > { %p288_p2 = pnand %p5389_p0, %p287_p1 }
   0x6   : > { %291 = sbr.rel (%p288_p2) target bundleno = 1525 (0x5f5), region = 56 }
   0xd   : > { %p321_p3 = scmp.lt.s32.totalorder %s5385_s10, 1  ;;  %v6987_v0 = vmov 0   ;;  %vm2102_vm0 = vcmask 523264   ;;  %vm2104_vm1 = vcmask 519168   ;;  %vm6990_vm2 = vmmov 0  }
   0xe   : > { %6868 = vset.pattern.permute.xlu1 %v6987_v0  ;;  %6867 = vset.pattern.permute.xlu0 %v6987_v0  ;;  %vm5313_vm4 = vcmask 1040384  }
   0xf   : > { %s9252_s10 = smov (!%p321_p3, %s5385_s10), 1 }
  0x10   : > { %s6854_s11 = smul.u32 640, %s9252_s10  ;;  %s328_s26 = scalar_lea.vmem %s9098_s9, %s9252_s10 }
  0x12   : > { %s7055_s14 = scalar_lea.vmem %s9089_s0, %s6854_s11 }
  0x13   : > { %v5392_v1 = vld [vmem:[%s7055_s14 + $0xa0] sm:$0xff]  ;;  %v7060_v3 = vld [vmem:[%s7055_s14 + $0xb0] sm:$0xff] }
  0x14   : > { %v330_v2 = vld [vmem:[%s7055_s14] sm:$0xff]  ;;  %411 = vperm.xlu1 %6868, %v5392_v1   ;;  %v7063_v4 = vld [vmem:[%s7055_s14 + $0x10] sm:$0xff] }
  0x15   : > { %341 = vperm.xlu0 %6867, %v330_v2   ;;  %v7068_v5 = vld [vmem:[%s7055_s14 + $0x30] sm:$0xff]  ;;  %v7071_v6 = vld [vmem:[%s7055_s14 + $0x20] sm:$0xff] }
  0x16   : > { %v7076_v7 = vld [vmem:[%s7055_s14 + $0xd0] sm:$0xff]  ;;  %v7079_v8 = vld [vmem:[%s7055_s14 + $0xc0] sm:$0xff] }
  0x17   : > { %v7084_v9 = vld [vmem:[%s7055_s14 + $0x11] sm:$0xff]  ;;  %v469_v10 = vld [vmem:[%s7055_s14 + $0x1] sm:$0xff] }
  0x18   : > { %416 = vperm.xlu1 %6868, %v7060_v3   ;;  %v7089_v11 = vld [vmem:[%s7055_s14 + $0x31] sm:$0xff]  ;;  %v7092_v12 = vld [vmem:[%s7055_s14 + $0x21] sm:$0xff] }
  0x19   : > { %346 = vperm.xlu0 %6867, %v7063_v4   ;;  %v7097_v13 = vld [vmem:[%s7055_s14 + $0xb1] sm:$0xff]  ;;  %v5402_v14 = vld [vmem:[%s7055_s14 + $0xa1] sm:$0xff] }
  0x1a   : > { %v7101_v15 = vld [vmem:[%s7055_s14 + $0xd1] sm:$0xff]  ;;  %v7104_v16 = vld [vmem:[%s7055_s14 + $0xc1] sm:$0xff] }
  0x1b   : > { %v7108_v17 = vld [vmem:[%s7055_s14 + $0x12] sm:$0xff]  ;;  %v607_v18 = vld [vmem:[%s7055_s14 + $0x2] sm:$0xff] }
  0x1c   : > { %356 = vperm.xlu1 %6868, %v7068_v5   ;;  %v7114_v19 = vld [vmem:[%s7055_s14 + $0x32] sm:$0xff]  ;;  %v7117_v20 = vld [vmem:[%s7055_s14 + $0x22] sm:$0xff] }
  0x1d   : > { %351 = vperm.xlu0 %6867, %v7071_v6   ;;  %v7121_v21 = vld [vmem:[%s7055_s14 + $0x50] sm:$0xff]  ;;  %v7124_v22 = vld [vmem:[%s7055_s14 + $0x40] sm:$0xff] }
  0x1e   : > { %v7129_v23 = vld [vmem:[%s7055_s14 + $0xf0] sm:$0xff]  ;;  %v7132_v24 = vld [vmem:[%s7055_s14 + $0xe0] sm:$0xff] }
  0x1f   : > { %v7137_v25 = vld [vmem:[%s7055_s14 + $0x150] sm:$0xff]  ;;  %v5412_v26 = vld [vmem:[%s7055_s14 + $0x140] sm:$0xff] }
  0x20   : > { %426 = vperm.xlu1 %6868, %v7076_v7   ;;  %v7143_v27 = vld [vmem:[%s7055_s14 + $0x70] sm:$0xff]  ;;  %v7146_v28 = vld [vmem:[%s7055_s14 + $0x60] sm:$0xff] }
  0x21   : > { %421 = vperm.xlu0 %6867, %v7079_v8   ;;  %v7150_v29 = vld [vmem:[%s7055_s14 + $0x110] sm:$0xff]  ;;  %v7153_v30 = vld [vmem:[%s7055_s14 + $0x100] sm:$0xff] }
  0x22   : > { %v7158_v31 = vld [vmem:[%s7055_s14 + $0x170] sm:$0xff]  ;;  %v7161_v32 = vld [vmem:[%s7055_s14 + $0x160] sm:$0xff] }
  0x23   : > { %v7166_v33 = vld [vmem:[%s7055_s14 + $0x51] sm:$0xff]  ;;  %v7169_v34 = vld [vmem:[%s7055_s14 + $0x41] sm:$0xff] }
  0x24   : > { %485 = vperm.xlu1 %6868, %v7084_v9   ;;  %v7174_v35 = vld [vmem:[%s7055_s14 + $0x1f0] sm:$0xff]  ;;  %v5421_v36 = vld [vmem:[%s7055_s14 + $0x1e0] sm:$0xff] }
  0x25   : > { %480 = vperm.xlu0 %6867, %v469_v10   ;;  %v7180_v37 = vld [vmem:[%s7055_s14 + $0x71] sm:$0xff]  ;;  %v7183_v38 = vld [vmem:[%s7055_s14 + $0x61] sm:$0xff] }
  0x26   : > { %v7187_v39 = vld [vmem:[%s7055_s14 + $0x210] sm:$0xff]  ;;  %v7190_v40 = vld [vmem:[%s7055_s14 + $0x200] sm:$0xff] }
  0x27   : > { %v7195_v41 = vld [vmem:[%s7055_s14 + $0xf1] sm:$0xff]  ;;  %v7198_v42 = vld [vmem:[%s7055_s14 + $0xe1] sm:$0xff] }
  0x28   : > { %495 = vperm.xlu1 %6868, %v7089_v11   ;;  %v7203_v43 = vld [vmem:[%s7055_s14 + $0x151] sm:$0xff]  ;;  %v5430_v44 = vld [vmem:[%s7055_s14 + $0x141] sm:$0xff] }
  0x29   : > { %490 = vperm.xlu0 %6867, %v7092_v12   ;;  %v7209_v45 = vld [vmem:[%s7055_s14 + $0x111] sm:$0xff]  ;;  %v7212_v46 = vld [vmem:[%s7055_s14 + $0x101] sm:$0xff] }
  0x2a   : > { %v7216_v47 = vld [vmem:[%s7055_s14 + $0x171] sm:$0xff]  ;;  %v7221_v48 = vld [vmem:[%s7055_s14 + $0x161] sm:$0xff] }
  0x2b   : > { %v7226_v49 = vld [vmem:[%s7055_s14 + $0x52] sm:$0xff]  ;;  %v7229_v50 = vld [vmem:[%s7055_s14 + $0x42] sm:$0xff] }
  0x2c   : > { %554 = vperm.xlu1 %6868, %v7097_v13   ;;  %v7234_v51 = vld [vmem:[%s7055_s14 + $0x1f1] sm:$0xff]  ;;  %v5439_v52 = vld [vmem:[%s7055_s14 + $0x1e1] sm:$0xff] }
  0x2d   : > { %549 = vperm.xlu0 %6867, %v5402_v14   ;;  %v7239_v53 = vld [vmem:[%s7055_s14 + $0x72] sm:$0xff]  ;;  %v7242_v54 = vld [vmem:[%s7055_s14 + $0x62] sm:$0xff] }
  0x2e   : > { %v7247_v55 = vld [vmem:[%s7055_s14 + $0x211] sm:$0xff]  ;;  %v7250_v56 = vld [vmem:[%s7055_s14 + $0x201] sm:$0xff] }
  0x2f   : > { %v7255_v57 = vld [vmem:[%s7055_s14 + $0x190] sm:$0xff]  ;;  %v7258_v58 = vld [vmem:[%s7055_s14 + $0x180] sm:$0xff] }
  0x30   : > { %564 = vperm.xlu1 %6868, %v7101_v15   ;;  %v7263_v59 = vld [vmem:[%s7055_s14 + $0x152] sm:$0xff]  ;;  %v5448_v60 = vld [vmem:[%s7055_s14 + $0x142] sm:$0xff] }
  0x31   : > { %559 = vperm.xlu0 %6867, %v7104_v16   ;;  %v7268_v61 = vld [vmem:[%s7055_s14 + $0x1b0] sm:$0xff]  ;;  %v7271_v62 = vld [vmem:[%s7055_s14 + $0x1a0] sm:$0xff] }
  0x32   : > { %v7276_v63 = vld [vmem:[%s7055_s14 + $0x172] sm:$0xff]  ;;  %v7279_v0 = vld [vmem:[%s7055_s14 + $0x162] sm:$0xff] }
  0x33   : > { %v7284_v1 = vld [vmem:[%s7055_s14 + $0x230] sm:$0xff]  ;;  %v7287_v2 = vld [vmem:[%s7055_s14 + $0x220] sm:$0xff] }
  0x34   : > { %623 = vperm.xlu1 %6868, %v7108_v17  }
  0x35   : > { %618 = vperm.xlu0 %6867, %v607_v18  }
  0x38   : > { %633 = vperm.xlu1 %6868, %v7114_v19  }
  0x39   : > { %628 = vperm.xlu0 %6867, %v7117_v20  }
  0x3c   : > { %366 = vperm.xlu1 %6868, %v7121_v21  }
  0x3d   : > { %361 = vperm.xlu0 %6867, %v7124_v22  }
  0x40   : > { %436 = vperm.xlu1 %6868, %v7129_v23  }
  0x41   : > { %431 = vperm.xlu0 %6867, %v7132_v24  }
  0x44   : > { %693 = vperm.xlu1 %6868, %v7137_v25  }
  0x45   : > { %688 = vperm.xlu0 %6867, %v5412_v26  }
  0x48   : > { %376 = vperm.xlu1 %6868, %v7143_v27  }
  0x49   : > { %371 = vperm.xlu0 %6867, %v7146_v28  }
  0x4c   : > { %446 = vperm.xlu1 %6868, %v7150_v29  }
  0x4d   : > { %441 = vperm.xlu0 %6867, %v7153_v30  }
  0x50   : > { %703 = vperm.xlu1 %6868, %v7158_v31  }
  0x51   : > { %698 = vperm.xlu0 %6867, %v7161_v32  }
  0x54   : > { %505 = vperm.xlu1 %6868, %v7166_v33  }
  0x55   : > { %500 = vperm.xlu0 %6867, %v7169_v34  }
  0x58   : > { %763 = vperm.xlu1 %6868, %v7174_v35  }
  0x59   : > { %758 = vperm.xlu0 %6867, %v5421_v36   ;;  %v7302_v36 = vld [vmem:[%s7055_s14 + $0x250] sm:$0xff] }
  0x5c   : > { %515 = vperm.xlu1 %6868, %v7180_v37  }
  0x5d   : > { %510 = vperm.xlu0 %6867, %v7183_v38  }
  0x60   : > { %773 = vperm.xlu1 %6868, %v7187_v39  }
  0x61   : > { %768 = vperm.xlu0 %6867, %v7190_v40  }
  0x64   : > { %574 = vperm.xlu1 %6868, %v7195_v41  }
  0x65   : > { %569 = vperm.xlu0 %6867, %v7198_v42  }
  0x68   : > { %832 = vperm.xlu1 %6868, %v7203_v43  }
  0x69   : > { %827 = vperm.xlu0 %6867, %v5430_v44   ;;  %v7305_v44 = vld [vmem:[%s7055_s14 + $0x240] sm:$0xff] }
  0x6c   : > { %584 = vperm.xlu1 %6868, %v7209_v45  }
  0x6d   : > { %579 = vperm.xlu0 %6867, %v7212_v46  }
  0x70   : > { %842 = vperm.xlu1 %6868, %v7216_v47  }
  0x71   : > { %837 = vperm.xlu0 %6867, %v7221_v48  }
  0x74   : > { %643 = vperm.xlu1 %6868, %v7226_v49  }
  0x75   : > { %638 = vperm.xlu0 %6867, %v7229_v50  }
  0x78   : > { %901 = vperm.xlu1 %6868, %v7234_v51  }
  0x79   : > { %896 = vperm.xlu0 %6867, %v5439_v52  }
  0x7c   : > { %653 = vperm.xlu1 %6868, %v7239_v53  }
  0x7d   : > { %648 = vperm.xlu0 %6867, %v7242_v54  }
  0x80   : > { %911 = vperm.xlu1 %6868, %v7247_v55  }
  0x81   : > { %906 = vperm.xlu0 %6867, %v7250_v56  }
  0x84   : > { %713 = vperm.xlu1 %6868, %v7255_v57  }
  0x85   : > { %708 = vperm.xlu0 %6867, %v7258_v58  }
  0x88   : > { %970 = vperm.xlu1 %6868, %v7263_v59  }
  0x89   : > { %965 = vperm.xlu0 %6867, %v5448_v60  }
  0x8c   : > { %723 = vperm.xlu1 %6868, %v7268_v61  }
  0x8d   : > { %718 = vperm.xlu0 %6867, %v7271_v62  }
  0x90   : > { %980 = vperm.xlu1 %6868, %v7276_v63  }
  0x91   : > { %975 = vperm.xlu0 %6867, %v7279_v0  }
  0x93   : > { %v7289_v10 = vpop.permute.xlu1 %411 }
  0x94   : > { %v7291_v14 = vpop.permute.xlu0 %341  ;;  %783 = vperm.xlu1 %6868, %v7284_v1  }
  0x95   : > { %778 = vperm.xlu0 %6867, %v7287_v2  }
  0x97   : > { %v7295_v18 = vpop.permute.xlu1 %416 }
  0x98   : > { %9112 = vst [vmem:[#allocation3_spill] sm:$0xff] %v7295_v18  ;;  %v7297_v26 = vpop.permute.xlu0 %346  ;;  %1040 = vperm.xlu1 %6868, %v7071_v6   ;;  %v7323_v6 = vld [vmem:[%s7055_s14 + $0x181] sm:$0xff] }
  0x99   : > { %9113 = vst [vmem:[#allocation4_spill] sm:$0xff] %v7297_v26  ;;  %1035 = vperm.xlu0 %6867, %v7063_v4   ;;  %v7320_v4 = vld [vmem:[%s7055_s14 + $0x191] sm:$0xff] }
  0x9a   : > { %9118 = vst [vmem:[#allocation9_spill] sm:$0xff] %v7320_v4 }
  0x9b   : > { %v7307_v52 = vpop.permute.xlu1 %356 }
  0x9c   : > { %9114 = vst [vmem:[#allocation5_spill] sm:$0xff] %v7307_v52  ;;  %v7309_v60 = vpop.permute.xlu0 %351  ;;  %793 = vperm.xlu1 %6868, %v7302_v36  }
  0x9d   : > { %9115 = vst [vmem:[#allocation6_spill] sm:$0xff] %v7309_v60  ;;  %788 = vperm.xlu0 %6867, %v7305_v44  }
  0x9f   : > { %v7313_v18 = vpop.permute.xlu1 %426 }
  0xa0   : > { %9116 = vst [vmem:[#allocation7_spill] sm:$0xff] %v7313_v18  ;;  %v7315_v26 = vpop.permute.xlu0 %421  ;;  %1050 = vperm.xlu1 %6868, %v7124_v22   ;;  %v7341_v22 = vld [vmem:[%s7055_s14 + $0x1a1] sm:$0xff] }
  0xa1   : > { %9117 = vst [vmem:[#allocation8_spill] sm:$0xff] %v7315_v26  ;;  %1045 = vperm.xlu0 %6867, %v7068_v5   ;;  %v7338_v5 = vld [vmem:[%s7055_s14 + $0x1b1] sm:$0xff] }
  0xa2   : > { %9122 = vst [vmem:[#allocation13_spill] sm:$0xff] %v7338_v5 }
  0xa3   : > { %v7325_v52 = vpop.permute.xlu1 %485 }
  0xa4   : > { %9119 = vst [vmem:[#allocation10_spill] sm:$0xff] %v7325_v52  ;;  %v7327_v60 = vpop.permute.xlu0 %480  ;;  %852 = vperm.xlu1 %6868, %v7320_v4  }
  0xa5   : > { %9120 = vst [vmem:[#allocation11_spill] sm:$0xff] %v7327_v60  ;;  %847 = vperm.xlu0 %6867, %v7323_v6  }
  0xa7   : > { %v7331_v18 = vpop.permute.xlu1 %495 }
  0xa8   : > { %v7333_v26 = vpop.permute.xlu0 %490  ;;  %1110 = vperm.xlu1 %6868, %v7079_v8   ;;  %v7359_v8 = vld [vmem:[%s7055_s14 + $0x221] sm:$0xff] }
  0xa9   : > { %9121 = vst [vmem:[#allocation12_spill] sm:$0xff] %v7333_v26  ;;  %1105 = vperm.xlu0 %6867, %v7060_v3   ;;  %v7356_v3 = vld [vmem:[%s7055_s14 + $0x231] sm:$0xff] }
  0xaa   : > { %9126 = vst [vmem:[#allocation17_spill] sm:$0xff] %v7356_v3 }
  0xab   : > { %v7343_v52 = vpop.permute.xlu1 %554 }
  0xac   : > { %9123 = vst [vmem:[#allocation14_spill] sm:$0xff] %v7343_v52  ;;  %v7345_v60 = vpop.permute.xlu0 %549  ;;  %862 = vperm.xlu1 %6868, %v7338_v5  }
  0xad   : > { %9124 = vst [vmem:[#allocation15_spill] sm:$0xff] %v7345_v60  ;;  %857 = vperm.xlu0 %6867, %v7341_v22  }
  0xaf   : > { %v7349_v4 = vpop.permute.xlu1 %564 }
  0xb0   : > { %v7351_v26 = vpop.permute.xlu0 %559  ;;  %1120 = vperm.xlu1 %6868, %v7132_v24   ;;  %v7377_v24 = vld [vmem:[%s7055_s14 + $0x241] sm:$0xff] }
  0xb1   : > { %9125 = vst [vmem:[#allocation16_spill] sm:$0xff] %v7351_v26  ;;  %1115 = vperm.xlu0 %6867, %v7076_v7   ;;  %v7374_v7 = vld [vmem:[%s7055_s14 + $0x251] sm:$0xff]  ;;  %9131 = vst [vmem:[#allocation22_spill] sm:$0xff] %v7377_v24 }
  0xb2   : > { %9130 = vst [vmem:[#allocation21_spill] sm:$0xff] %v7374_v7 }
  0xb3   : > { %v7361_v52 = vpop.permute.xlu1 %623 }
  0xb4   : > { %9127 = vst [vmem:[#allocation18_spill] sm:$0xff] %v7361_v52  ;;  %v7363_v60 = vpop.permute.xlu0 %618  ;;  %921 = vperm.xlu1 %6868, %v7356_v3  }
  0xb5   : > { %9128 = vst [vmem:[#allocation19_spill] sm:$0xff] %v7363_v60  ;;  %916 = vperm.xlu0 %6867, %v7359_v8  }
  0xb7   : > { %v7367_v5 = vpop.permute.xlu1 %633 }
  0xb8   : > { %v7369_v26 = vpop.permute.xlu0 %628  ;;  %1179 = vperm.xlu1 %6868, %v7092_v12   ;;  %v7395_v12 = vld [vmem:[%s7055_s14 + $0x182] sm:$0xff] }
  0xb9   : > { %9129 = vst [vmem:[#allocation20_spill] sm:$0xff] %v7369_v26  ;;  %1174 = vperm.xlu0 %6867, %v7084_v9   ;;  %v7392_v9 = vld [vmem:[%s7055_s14 + $0x192] sm:$0xff] }
  0xba   : > { %9135 = vst [vmem:[#allocation26_spill] sm:$0xff] %v7392_v9 }
  0xbb   : > { %v7379_v52 = vpop.permute.xlu1 %366 }
  0xbc   : > { %9132 = vst [vmem:[#allocation23_spill] sm:$0xff] %v7379_v52  ;;  %v7381_v60 = vpop.permute.xlu0 %361  ;;  %931 = vperm.xlu1 %6868, %v7374_v7  }
  0xbd   : > { %9133 = vst [vmem:[#allocation24_spill] sm:$0xff] %v7381_v60  ;;  %926 = vperm.xlu0 %6867, %v7377_v24  }
  0xbf   : > { %v7385_v3 = vpop.permute.xlu1 %436 }
  0xc0   : > { %v7387_v26 = vpop.permute.xlu0 %431  ;;  %1189 = vperm.xlu1 %6868, %v7169_v34   ;;  %v7413_v34 = vld [vmem:[%s7055_s14 + $0x1a2] sm:$0xff] }
  0xc1   : > { %9134 = vst [vmem:[#allocation25_spill] sm:$0xff] %v7387_v26  ;;  %1184 = vperm.xlu0 %6867, %v7089_v11   ;;  %v7410_v11 = vld [vmem:[%s7055_s14 + $0x1b2] sm:$0xff]  ;;  %9140 = vst [vmem:[#allocation31_spill] sm:$0xff] %v7413_v34 }
  0xc2   : > { %9139 = vst [vmem:[#allocation30_spill] sm:$0xff] %v7410_v11 }
  0xc3   : > { %v7397_v52 = vpop.permute.xlu1 %693 }
  0xc4   : > { %v7399_v60 = vpop.permute.xlu0 %688  ;;  %990 = vperm.xlu1 %6868, %v7392_v9  }
  0xc5   : > { %9136 = vst [vmem:[#allocation27_spill] sm:$0xff] %v7399_v60  ;;  %985 = vperm.xlu0 %6867, %v7395_v12  }
  0xc7   : > { %v7403_v7 = vpop.permute.xlu1 %376 }
  0xc8   : > { %9137 = vst [vmem:[#allocation28_spill] sm:$0xff] %v7403_v7  ;;  %v7405_v24 = vpop.permute.xlu0 %371  ;;  %1248 = vperm.xlu1 %6868, %v7104_v16  }
  0xc9   : > { %9138 = vst [vmem:[#allocation29_spill] sm:$0xff] %v7405_v24  ;;  %1243 = vperm.xlu0 %6867, %v7097_v13  }
  0xcb   : > { %v7415_v26 = vpop.permute.xlu1 %446 }
  0xcc   : > { %v7417_v60 = vpop.permute.xlu0 %441  ;;  %1000 = vperm.xlu1 %6868, %v7410_v11  }
  0xcd   : > { %995 = vperm.xlu0 %6867, %v7413_v34   ;;  %v7440_v34 = vld [vmem:[%s7055_s14 + $0x80] sm:$0xff] }
  0xce   : > { %9141 = vst [vmem:[#allocation32_spill] sm:$0xff] %v7440_v34 }
  0xcf   : > { %v7421_v9 = vpop.permute.xlu1 %703 }
  0xd0   : > { %v7423_v24 = vpop.permute.xlu0 %698  ;;  %1258 = vperm.xlu1 %6868, %v7198_v42  }
  0xd1   : > { %1253 = vperm.xlu0 %6867, %v7101_v15  }
  0xd3   : > { %v7427_v13 = vpop.permute.xlu1 %505 }
  0xd4   : > { %v7429_v16 = vpop.permute.xlu0 %500  ;;  %1060 = vperm.xlu1 %6868, %v7146_v28  }
  0xd5   : > { %1055 = vperm.xlu0 %6867, %v7121_v21  }
  0xd7   : > { %v7433_v7 = vpop.permute.xlu1 %763 }
  0xd8   : > { %v7435_v11 = vpop.permute.xlu0 %758  ;;  %1317 = vperm.xlu1 %6868, %v7117_v20  }
  0xd9   : > { %1312 = vperm.xlu0 %6867, %v7108_v17  }
  0xdb   : > { %v7442_v42 = vpop.permute.xlu1 %515 }
  0xdc   : > { %v7444_v15 = vpop.permute.xlu0 %510  ;;  %1070 = vperm.xlu1 %6868, %v7440_v34  }
  0xdd   : > { %9142 = vst [vmem:[#allocation33_spill] sm:$0xff] %v7444_v15  ;;  %1065 = vperm.xlu0 %6867, %v7143_v27   ;;  %v7467_v27 = vld [vmem:[%s7055_s14 + $0x120] sm:$0xff] }
  0xde   : > { %9143 = vst [vmem:[#allocation34_spill] sm:$0xff] %v7467_v27 }
  0xdf   : > { %v7448_v21 = vpop.permute.xlu1 %773 }
  0xe0   : > { %v7450_v28 = vpop.permute.xlu0 %768  ;;  %1327 = vperm.xlu1 %6868, %v7229_v50  }
  0xe1   : > { %1322 = vperm.xlu0 %6867, %v7114_v19  }
  0xe3   : > { %v7454_v17 = vpop.permute.xlu1 %574 }
  0xe4   : > { %v7456_v20 = vpop.permute.xlu0 %569  ;;  %1130 = vperm.xlu1 %6868, %v7153_v30  }
  0xe5   : > { %1125 = vperm.xlu0 %6867, %v7129_v23  }
  0xe7   : > { %v7460_v15 = vpop.permute.xlu1 %832 }
  0xe8   : > { %v7462_v34 = vpop.permute.xlu0 %827  ;;  %1387 = vperm.xlu1 %6868, %v7161_v32  }
  0xe9   : > { %1382 = vperm.xlu0 %6867, %v7137_v25  }
  0xeb   : > { %v7469_v50 = vpop.permute.xlu1 %584 }
  0xec   : > { %v7471_v19 = vpop.permute.xlu0 %579  ;;  %1140 = vperm.xlu1 %6868, %v7467_v27  }
  0xed   : > { %9144 = vst [vmem:[#allocation35_spill] sm:$0xff] %v7471_v19  ;;  %1135 = vperm.xlu0 %6867, %v7150_v29   ;;  %v7494_v29 = vld [vmem:[%s7055_s14 + $0x81] sm:$0xff] }
  0xee   : > { %9145 = vst [vmem:[#allocation36_spill] sm:$0xff] %v7494_v29 }
  0xef   : > { %v7475_v23 = vpop.permute.xlu1 %842 }
  0xf0   : > { %v7477_v30 = vpop.permute.xlu0 %837  ;;  %1397 = vperm.xlu1 %6868, %v7258_v58  }
  0xf1   : > { %1392 = vperm.xlu0 %6867, %v7158_v31  }
  0xf3   : > { %v7481_v25 = vpop.permute.xlu1 %643 }
  0xf4   : > { %v7483_v32 = vpop.permute.xlu0 %638  ;;  %1199 = vperm.xlu1 %6868, %v7183_v38  }
  0xf5   : > { %1194 = vperm.xlu0 %6867, %v7166_v33  }
  0xf7   : > { %v7487_v19 = vpop.permute.xlu1 %901 }
  0xf8   : > { %v7489_v27 = vpop.permute.xlu0 %896  ;;  %1457 = vperm.xlu1 %6868, %v7190_v40  }
  0xf9   : > { %1452 = vperm.xlu0 %6867, %v7174_v35  }
  0xfb   : > { %v7496_v58 = vpop.permute.xlu1 %653 }
  0xfc   : > { %v7498_v31 = vpop.permute.xlu0 %648  ;;  %1209 = vperm.xlu1 %6868, %v7494_v29  }
  0xfd   : > { %9146 = vst [vmem:[#allocation37_spill] sm:$0xff] %v7498_v31  ;;  %1204 = vperm.xlu0 %6867, %v7180_v37   ;;  %v7521_v37 = vld [vmem:[%s7055_s14 + $0x121] sm:$0xff] }
  0xfe   : > { %9147 = vst [vmem:[#allocation38_spill] sm:$0xff] %v7521_v37 }
  0xff   : > { %v7502_v33 = vpop.permute.xlu1 %911 }
 0x100   : > { %v7504_v38 = vpop.permute.xlu0 %906  ;;  %1467 = vperm.xlu1 %6868, %v7287_v2  }
 0x101   : > { %1462 = vperm.xlu0 %6867, %v7187_v39  }
 0x103   : > { %v7508_v35 = vpop.permute.xlu1 %713 }
 0x104   : > { %v7510_v40 = vpop.permute.xlu0 %708  ;;  %1268 = vperm.xlu1 %6868, %v7212_v46  }
 0x105   : > { %1263 = vperm.xlu0 %6867, %v7195_v41  }
 0x107   : > { %v7514_v31 = vpop.permute.xlu1 %970 }
 0x108   : > { %v7516_v29 = vpop.permute.xlu0 %965  ;;  %1526 = vperm.xlu1 %6868, %v7221_v48  }
 0x109   : > { %1521 = vperm.xlu0 %6867, %v7203_v43  }
 0x10b   : > { %v7523_v2 = vpop.permute.xlu1 %723 }
 0x10c   : > { %9148 = vst [vmem:[#allocation39_spill] sm:$0xff] %v7523_v2  ;;  %v7525_v39 = vpop.permute.xlu0 %718  ;;  %1278 = vperm.xlu1 %6868, %v7521_v37  }
 0x10d   : > { %9149 = vst [vmem:[#allocation40_spill] sm:$0xff] %v7525_v39  ;;  %1273 = vperm.xlu0 %6867, %v7209_v45   ;;  %v5500_v45 = vld [vmem:[%s7055_s14 + $0x82] sm:$0xff] }
 0x10f   : > { %v7529_v41 = vpop.permute.xlu1 %980 }
 0x110   : > { %9150 = vst [vmem:[#allocation41_spill] sm:$0xff] %v7529_v41  ;;  %v7531_v46 = vpop.permute.xlu0 %975  ;;  %1536 = vperm.xlu1 %6868, %v7323_v6  }
 0x111   : > { %9151 = vst [vmem:[#allocation42_spill] sm:$0xff] %v7531_v46  ;;  %1531 = vperm.xlu0 %6867, %v7216_v47  }
 0x113   : > { %v7535_v43 = vpop.permute.xlu1 %783 }
 0x114   : > { %9152 = vst [vmem:[#allocation43_spill] sm:$0xff] %v7535_v43  ;;  %v7537_v48 = vpop.permute.xlu0 %778  ;;  %1337 = vperm.xlu1 %6868, %v7242_v54   ;;  %v9188_v43 = vld [vmem:[#allocation15_spill] sm:$0xff] }
 0x115   : > { %9153 = vst [vmem:[#allocation44_spill] sm:$0xff] %v7537_v48  ;;  %1332 = vperm.xlu0 %6867, %v7226_v49   ;;  %v9187_v48 = vld [vmem:[#allocation14_spill] sm:$0xff] }
 0x117   : > { %v7541_v39 = vpop.permute.xlu1 %1040 }
 0x118   : > { %9154 = vst [vmem:[#allocation45_spill] sm:$0xff] %v7541_v39  ;;  %v7543_v37 = vpop.permute.xlu0 %1035  ;;  %1595 = vperm.xlu1 %6868, %v7250_v56  }
 0x119   : > { %9155 = vst [vmem:[#allocation46_spill] sm:$0xff] %v7543_v37  ;;  %1590 = vperm.xlu0 %6867, %v7234_v51   ;;  %v7654_v37 = vld [vmem:[%s9090_s1 + $0x4] ss:$0 sm:$0xff] }
 0x11b   : > { %v7548_v6 = vpop.permute.xlu1 %793 }
 0x11c   : > { %9156 = vst [vmem:[#allocation47_spill] sm:$0xff] %v7548_v6  ;;  %v7550_v47 = vpop.permute.xlu0 %788  ;;  %1347 = vperm.xlu1 %6868, %v5500_v45  }
 0x11d   : > { %9157 = vst [vmem:[#allocation48_spill] sm:$0xff] %v7550_v47  ;;  %1342 = vperm.xlu0 %6867, %v7239_v53   ;;  %v5509_v53 = vld [vmem:[%s7055_s14 + $0x1c0] sm:$0xff] }
 0x11f   : > { %v7553_v54 = vpop.permute.xlu1 %1050 }
 0x120   : > { %9158 = vst [vmem:[#allocation49_spill] sm:$0xff] %v7553_v54  ;;  %v7555_v49 = vpop.permute.xlu0 %1045  ;;  %1605 = vperm.xlu1 %6868, %v7359_v8  }
 0x121   : > { %9159 = vst [vmem:[#allocation50_spill] sm:$0xff] %v7555_v49  ;;  %1600 = vperm.xlu0 %6867, %v7247_v55   ;;  %v9181_v49 = vld [vmem:[#allocation10_spill] sm:$0xff] }
 0x123   : > { %v7559_v56 = vpop.permute.xlu1 %852 }
 0x124   : > { %9160 = vst [vmem:[#allocation51_spill] sm:$0xff] %v7559_v56  ;;  %v7561_v51 = vpop.permute.xlu0 %847  ;;  %1407 = vperm.xlu1 %6868, %v7271_v62   ;;  %v9180_v56 = vld [vmem:[#allocation5_spill] sm:$0xff] }
 0x125   : > { %9161 = vst [vmem:[#allocation52_spill] sm:$0xff] %v7561_v51  ;;  %1402 = vperm.xlu0 %6867, %v7255_v57  }
 0x127   : > { %v7565_v47 = vpop.permute.xlu1 %1110 }
 0x128   : > { %9162 = vst [vmem:[#allocation53_spill] sm:$0xff] %v7565_v47  ;;  %v7567_v45 = vpop.permute.xlu0 %1105  ;;  %1664 = vperm.xlu1 %6868, %v7279_v0   ;;  %v9179_v47 = vld [vmem:[#allocation8_spill] sm:$0xff] }
 0x129   : > { %9163 = vst [vmem:[#allocation54_spill] sm:$0xff] %v7567_v45  ;;  %1659 = vperm.xlu0 %6867, %v7263_v59  }
 0x12b   : > { %v7572_v55 = vpop.permute.xlu1 %862 }
 0x12c   : > { %9164 = vst [vmem:[#allocation55_spill] sm:$0xff] %v7572_v55  ;;  %v7574_v8 = vpop.permute.xlu0 %857  ;;  %1417 = vperm.xlu1 %6868, %v5509_v53   ;;  %v5548_v53 = vld [vmem:[%s7055_s14 + $0x30] sm:$0xff] }
 0x12d   : > { %9165 = vst [vmem:[#allocation56_spill] sm:$0xff] %v7574_v8  ;;  %1412 = vperm.xlu0 %6867, %v7268_v61   ;;  %v5547_v61 = vld [vmem:[%s7055_s14 + $0x20] sm:$0xff] }
 0x12f   : > { %v7577_v57 = vpop.permute.xlu1 %1120 }
 0x130   : > { %9166 = vst [vmem:[#allocation57_spill] sm:$0xff] %v7577_v57  ;;  %v7579_v62 = vpop.permute.xlu0 %1115  ;;  %1674 = vperm.xlu1 %6868, %v7395_v12   ;;  %v5518_v12 = vld [vmem:[%s7055_s14 + $0x260] sm:$0xff] }
 0x131   : > { %9167 = vst [vmem:[#allocation58_spill] sm:$0xff] %v7579_v62  ;;  %1669 = vperm.xlu0 %6867, %v7276_v63   ;;  %v7599_v63 = vld [vmem:[%s9090_s1 + $0x1] ss:$0 sm:$0xff]  ;;  %v9175_v62 = vld [vmem:[#allocation4_spill] sm:$0xff] }
 0x132   : > { %v455_v51 = vmul.f32 %v7599_v63, %v9179_v47 }
 0x133   : > { %v7583_v0 = vpop.permute.xlu1 %921 }
 0x134   : > { %9168 = vst [vmem:[#allocation59_spill] sm:$0xff] %v7583_v0  ;;  %v7585_v59 = vpop.permute.xlu0 %916  ;;  %1477 = vperm.xlu1 %6868, %v7305_v44  }
 0x135   : > { %9169 = vst [vmem:[#allocation60_spill] sm:$0xff] %v7585_v59  ;;  %1472 = vperm.xlu0 %6867, %v7284_v1   ;;  %v7608_v1 = vld [vmem:[%s9090_s1] ss:$0 sm:$0xff] }
 0x137   : > { %v7591_v8 = vpop.permute.xlu1 %1179 }
 0x138   : > { %9170 = vst [vmem:[#allocation61_spill] sm:$0xff] %v7591_v8  ;;  %v7593_v57 = vpop.permute.xlu0 %1174  ;;  %1734 = vperm.xlu1 %6868, %v5548_v53   ;;  %v5550_v53 = vld [vmem:[%s7055_s14 + $0x50] sm:$0xff]  ;;  %v7618_v8 = vld [vmem:[%s9090_s1 + $0x2] ss:$0 sm:$0xff] }
 0x139   : > { %9171 = vst [vmem:[#allocation62_spill] sm:$0xff] %v7593_v57  ;;  %1729 = vperm.xlu0 %6867, %v5547_v61   ;;  %v5549_v61 = vld [vmem:[%s7055_s14 + $0x40] sm:$0xff]  ;;  %v453_v57 = vmul.f32 %v7599_v63, %v7289_v10  ;;  %v525_v47 = vmul.f32 %v7618_v8, %v7331_v18 }
 0x13b   : > { %v7601_v59 = vpop.permute.xlu1 %931 }
 0x13c   : > { %9172 = vst [vmem:[#allocation63_spill] sm:$0xff] %v7601_v59  ;;  %v7603_v44 = vpop.permute.xlu0 %926  ;;  %1487 = vperm.xlu1 %6868, %v5518_v12   ;;  %v9174_v59 = vld [vmem:[#allocation3_spill] sm:$0xff]  ;;  %v384_v12 = vmul.f32 %v7608_v1, %v9175_v62 }
 0x13d   : > { %9173 = vst [vmem:[#allocation64_spill] sm:$0xff] %v7603_v44  ;;  %1482 = vperm.xlu0 %6867, %v7302_v36   ;;  %v383_v44 = vmul.f32 %v7608_v1, %v7291_v14  ;;  %v454_v0 = vmul.f32 %v7599_v63, %v9174_v59  ;;  %v9176_v36 = vld [vmem:[#allocation7_spill] sm:$0xff]  ;;  %v386_v14 = vmul.f32 %v7608_v1, %v9180_v56 }
 0x13e   : > { %v456_v55 = vmul.f32 %v7599_v63, %v9176_v36  ;;  %v523_v59 = vmul.f32 %v7618_v8, %v9181_v49  ;;  %v7641_v62 = vld [vmem:[%s9090_s1 + $0x3] ss:$0 sm:$0xff]  ;;  %v9182_v36 = vld [vmem:[#allocation6_spill] sm:$0xff] }
 0x13f   : > { %v7628_v45 = vpop.permute.xlu1 %1189  ;;  %v461_v49 = vadd.f32 %v453_v57, %v383_v44  ;;  %v592_v18 = vmul.f32 %v7641_v62, %v9187_v48  ;;  %v9189_v57 = vld [vmem:[#allocation9_spill] sm:$0xff]  ;;  %v9190_v44 = vld [vmem:[#allocation16_spill] sm:$0xff]  ;;  %v9191_v48 = vld [vmem:[#allocation18_spill] sm:$0xff] }
 0x140   : > { %9177 = vst [vmem:[#allocation3_spill] sm:$0xff] %v7628_v45  ;;  %v7630_v10 = vpop.permute.xlu0 %1184  ;;  %1744 = vperm.xlu1 %6868, %v5550_v53   ;;  %v385_v45 = vmul.f32 %v7608_v1, %v9182_v36  ;;  %v9184_v53 = vld [vmem:[#allocation12_spill] sm:$0xff]  ;;  %v464_v6 = vadd.f32 %v456_v55, %v386_v14  ;;  %v5557_v14 = vld [vmem:[%s7055_s14 + $0xd0] sm:$0xff]  ;;  %v661_v46 = vmul.f32 %v7654_v37, %v9191_v48 }
 0x141   : > { %9178 = vst [vmem:[#allocation4_spill] sm:$0xff] %v7630_v10  ;;  %1739 = vperm.xlu0 %6867, %v5549_v61   ;;  %v9183_v10 = vld [vmem:[#allocation11_spill] sm:$0xff]  ;;  %v524_v56 = vmul.f32 %v7618_v8, %v9184_v53  ;;  %v462_v61 = vadd.f32 %v454_v0, %v384_v12  ;;  %v591_v53 = vmul.f32 %v7641_v62, %v9188_v43 }
 0x142   : > { %v522_v54 = vmul.f32 %v7618_v8, %v9183_v10  ;;  %v463_v10 = vadd.f32 %v455_v51, %v385_v45  ;;  %v594_v0 = vmul.f32 %v7641_v62, %v7349_v4  ;;  %v593_v12 = vmul.f32 %v7641_v62, %v9190_v44  ;;  %v9192_v43 = vld [vmem:[#allocation19_spill] sm:$0xff] }
 0x143   : > { %v7656_v36 = vpop.permute.xlu1 %990  ;;  %v531_v55 = vadd.f32 %v523_v59, %v462_v61  ;;  %v533_v45 = vadd.f32 %v525_v47, %v464_v6  ;;  %v660_v4 = vmul.f32 %v7654_v37, %v9192_v43  ;;  %v663_v59 = vmul.f32 %v7654_v37, %v7367_v5  ;;  %v9193_v61 = vld [vmem:[#allocation20_spill] sm:$0xff]  ;;  %v9197_v5 = vld [vmem:[#allocation23_spill] sm:$0xff] }
 0x144   : > { %9185 = vst [vmem:[#allocation7_spill] sm:$0xff] %v7656_v36  ;;  %v7658_v39 = vpop.permute.xlu0 %985  ;;  %1546 = vperm.xlu1 %6868, %v7341_v22   ;;  %v530_v51 = vadd.f32 %v522_v54, %v461_v49  ;;  %v532_v36 = vadd.f32 %v524_v56, %v463_v10  ;;  %v7677_v22 = vld [vmem:[%s9090_s1 + $0x5] ss:$0 sm:$0xff]  ;;  %v662_v54 = vmul.f32 %v7654_v37, %v9193_v61 }
 0x145   : > { %9186 = vst [vmem:[#allocation8_spill] sm:$0xff] %v7658_v39  ;;  %1541 = vperm.xlu0 %6867, %v9189_v57   ;;  %v5556_v39 = vld [vmem:[%s7055_s14 + $0xc0] sm:$0xff]  ;;  %v458_v6 = vmul.f32 %v7599_v63, %v7385_v3  ;;  %v600_v49 = vadd.f32 %v592_v18, %v531_v55  ;;  %v9196_v57 = vld [vmem:[#allocation25_spill] sm:$0xff]  ;;  %v602_v48 = vadd.f32 %v594_v0, %v533_v45 }
 0x146   : > { %v599_v10 = vadd.f32 %v591_v53, %v530_v51  ;;  %v457_v44 = vmul.f32 %v7599_v63, %v9196_v57  ;;  %v601_v43 = vadd.f32 %v593_v12, %v532_v36  ;;  %v388_v41 = vmul.f32 %v7608_v1, %v9197_v5  ;;  %v5527_v3 = vld [vmem:[%s7055_s14 + $0x1c1] sm:$0xff]  ;;  %v9200_v45 = vld [vmem:[#allocation13_spill] sm:$0xff] }
 0x147   : > { %v7687_v47 = vpop.permute.xlu1 %1248  ;;  %v731_v61 = vmul.f32 %v7677_v22, %v7397_v52  ;;  %v669_v2 = vadd.f32 %v661_v46, %v600_v49  ;;  %v671_v53 = vadd.f32 %v663_v59, %v602_v48  ;;  %v9199_v46 = vld [vmem:[#allocation27_spill] sm:$0xff]  ;;  %v460_v51 = vmul.f32 %v7599_v63, %v7415_v26  ;;  %v9203_v57 = vld [vmem:[#allocation33_spill] sm:$0xff] }
 0x148   : > { %9194 = vst [vmem:[#allocation5_spill] sm:$0xff] %v7687_v47  ;;  %v7689_v56 = vpop.permute.xlu0 %1243  ;;  %1804 = vperm.xlu1 %6868, %v5557_v14   ;;  %v9198_v47 = vld [vmem:[#allocation24_spill] sm:$0xff]  ;;  %v668_v18 = vadd.f32 %v660_v4, %v599_v10  ;;  %v670_v55 = vadd.f32 %v662_v54, %v601_v43  ;;  %v466_v14 = vadd.f32 %v458_v6, %v388_v41  ;;  %v5559_v6 = vld [vmem:[%s7055_s14 + $0xf0] sm:$0xff] }
 0x149   : > { %9195 = vst [vmem:[#allocation10_spill] sm:$0xff] %v7689_v56  ;;  %1799 = vperm.xlu0 %6867, %v5556_v39   ;;  %v387_v56 = vmul.f32 %v7608_v1, %v9198_v47  ;;  %v7703_v39 = vld [vmem:[%s9090_s1 + $0x6] ss:$0 sm:$0xff]  ;;  %v730_v12 = vmul.f32 %v7677_v22, %v9199_v46  ;;  %v739_v41 = vadd.f32 %v731_v61, %v669_v2 }
 0x14a   : > { %v459_v4 = vmul.f32 %v7599_v63, %v7417_v60  ;;  %v733_v59 = vmul.f32 %v7677_v22, %v7421_v9  ;;  %v732_v54 = vmul.f32 %v7677_v22, %v7423_v24  ;;  %v5558_v47 = vld [vmem:[%s7055_s14 + $0xe0] sm:$0xff]  ;;  %v527_v26 = vmul.f32 %v7618_v8, %v7427_v13  ;;  %v9202_v63 = vld [vmem:[#allocation29_spill] sm:$0xff] }
 0x14b   : > { %v7705_v36 = vpop.permute.xlu1 %1000  ;;  %v465_v52 = vadd.f32 %v457_v44, %v387_v56  ;;  %v9201_v56 = vld [vmem:[#allocation28_spill] sm:$0xff]  ;;  %v526_v2 = vmul.f32 %v7618_v8, %v7429_v16  ;;  %v801_v60 = vmul.f32 %v7703_v39, %v7433_v7  ;;  %v389_v9 = vmul.f32 %v7608_v1, %v9202_v63 }
 0x14c   : > { %v7707_v0 = vpop.permute.xlu0 %995  ;;  %1556 = vperm.xlu1 %6868, %v5527_v3   ;;  %v390_v49 = vmul.f32 %v7608_v1, %v9201_v56  ;;  %v800_v24 = vmul.f32 %v7703_v39, %v7435_v11  ;;  %v529_v10 = vmul.f32 %v7618_v8, %v7442_v42  ;;  %v528_v44 = vmul.f32 %v7618_v8, %v9203_v57  ;;  %v7749_v8 = vld [vmem:[%s9090_s1 + $0x7] ss:$0 sm:$0xff] }
 0x14d   : > { %1551 = vperm.xlu0 %6867, %v9200_v45   ;;  %v738_v16 = vadd.f32 %v730_v12, %v668_v18  ;;  %v803_v7 = vmul.f32 %v7703_v39, %v7448_v21  ;;  %v467_v1 = vadd.f32 %v459_v4, %v389_v9  ;;  %v741_v5 = vadd.f32 %v733_v59, %v671_v53  ;;  %v9205_v4 = vld [vmem:[#allocation17_spill] sm:$0xff] }
 0x14e   : > { %v468_v43 = vadd.f32 %v460_v51, %v390_v49  ;;  %v740_v11 = vadd.f32 %v732_v54, %v670_v55  ;;  %v802_v42 = vmul.f32 %v7703_v39, %v7450_v28  ;;  %v535_v61 = vadd.f32 %v527_v26, %v466_v14  ;;  %v9206_v54 = vld [vmem:[#allocation35_spill] sm:$0xff] }
 0x14f   : > { %v7738_v48 = vpop.permute.xlu1 %1258  ;;  %v534_v3 = vadd.f32 %v526_v2, %v465_v52  ;;  %v809_v18 = vadd.f32 %v801_v60, %v739_v41  ;;  %v596_v46 = vmul.f32 %v7641_v62, %v7454_v17  ;;  %v808_v21 = vadd.f32 %v800_v24, %v738_v16  ;;  %v7766_v17 = vld [vmem:[%s9090_s1 + $0x8] ss:$0 sm:$0xff]  ;;  %v9204_v41 = vld [vmem:[#allocation22_spill] sm:$0xff]  ;;  %v9207_v24 = vld [vmem:[#allocation37_spill] sm:$0xff] }
 0x150   : > { %v7740_v13 = vpop.permute.xlu0 %1253  ;;  %1814 = vperm.xlu1 %6868, %v5559_v6   ;;  %v537_v12 = vadd.f32 %v529_v10, %v468_v43  ;;  %v536_v53 = vadd.f32 %v528_v44, %v467_v1  ;;  %v595_v55 = vmul.f32 %v7641_v62, %v7456_v20  ;;  %v811_v45 = vadd.f32 %v803_v7, %v741_v5  ;;  %v5536_v44 = vld [vmem:[%s7055_s14 + $0x261] sm:$0xff] }
 0x151   : > { %1809 = vperm.xlu0 %6867, %v5558_v47   ;;  %v870_v14 = vmul.f32 %v7749_v8, %v7460_v15  ;;  %v869_v52 = vmul.f32 %v7749_v8, %v7462_v34  ;;  %v810_v20 = vadd.f32 %v802_v42, %v740_v11  ;;  %v598_v59 = vmul.f32 %v7641_v62, %v7469_v50  ;;  %v5566_v34 = vld [vmem:[%s7055_s14 + $0x31] sm:$0xff]  ;;  %v5565_v47 = vld [vmem:[%s7055_s14 + $0x21] sm:$0xff] }
 0x152   : > { %v597_v6 = vmul.f32 %v7641_v62, %v9206_v54  ;;  %v872_v15 = vmul.f32 %v7749_v8, %v7475_v23  ;;  %v604_v56 = vadd.f32 %v596_v46, %v535_v61  ;;  %v871_v49 = vmul.f32 %v7749_v8, %v7477_v30  ;;  %v9213_v54 = vld [vmem:[#allocation43_spill] sm:$0xff] }
 0x153   : > { %v7755_v28 = vpop.permute.xlu1 %1060  ;;  %v665_v26 = vmul.f32 %v7654_v37, %v7481_v25  ;;  %v664_v2 = vmul.f32 %v7654_v37, %v7483_v32  ;;  %v603_v60 = vadd.f32 %v595_v55, %v534_v3  ;;  %v939_v50 = vmul.f32 %v7766_v17, %v7487_v19 }
 0x154   : > { %v7757_v51 = vpop.permute.xlu0 %1055  ;;  %1615 = vperm.xlu1 %6868, %v9204_v41   ;;  %v938_v23 = vmul.f32 %v7766_v17, %v7489_v27  ;;  %v667_v62 = vmul.f32 %v7654_v37, %v7496_v58  ;;  %v878_v9 = vadd.f32 %v870_v14, %v809_v18  ;;  %v877_v25 = vadd.f32 %v869_v52, %v808_v21  ;;  %v7801_v58 = vld [vmem:[%s9090_s1 + $0x9] ss:$0 sm:$0xff]  ;;  %v9208_v21 = vld [vmem:[#allocation21_spill] sm:$0xff] }
 0x155   : > { %1610 = vperm.xlu0 %6867, %v9205_v4   ;;  %v666_v32 = vmul.f32 %v7654_v37, %v9207_v24  ;;  %v606_v10 = vadd.f32 %v598_v59, %v537_v12  ;;  %v605_v57 = vadd.f32 %v597_v6, %v536_v53  ;;  %v880_v19 = vadd.f32 %v872_v15, %v811_v45  ;;  %v9209_v53 = vld [vmem:[#allocation39_spill] sm:$0xff]  ;;  %v9210_v45 = vld [vmem:[#allocation40_spill] sm:$0xff]  ;;  %v5568_v14 = vld [vmem:[%s7055_s14 + $0x51] sm:$0xff] }
 0x156   : > { %v941_v27 = vmul.f32 %v7766_v17, %v7502_v33  ;;  %v879_v16 = vadd.f32 %v871_v49, %v810_v20  ;;  %v673_v43 = vadd.f32 %v665_v26, %v604_v56  ;;  %v672_v7 = vadd.f32 %v664_v2, %v603_v60  ;;  %v9211_v41 = vld [vmem:[#allocation41_spill] sm:$0xff]  ;;  %v9212_v20 = vld [vmem:[#allocation42_spill] sm:$0xff] }
 0x157   : > { %v7790_v63 = vpop.permute.xlu1 %1317  ;;  %v940_v37 = vmul.f32 %v7766_v17, %v7504_v38  ;;  %v947_v1 = vadd.f32 %v939_v50, %v878_v9  ;;  %v946_v5 = vadd.f32 %v938_v23, %v877_v25  ;;  %v675_v11 = vadd.f32 %v667_v62, %v606_v10  ;;  %v7819_v38 = vld [vmem:[%s9090_s1 + $0xa] ss:$0 sm:$0xff]  ;;  %v9217_v23 = vld [vmem:[#allocation47_spill] sm:$0xff] }
 0x158   : > { %v7792_v30 = vpop.permute.xlu0 %1312  ;;  %1873 = vperm.xlu1 %6868, %v5566_v34   ;;  %v735_v33 = vmul.f32 %v7677_v22, %v7508_v35  ;;  %v674_v3 = vadd.f32 %v666_v32, %v605_v57  ;;  %v734_v18 = vmul.f32 %v7677_v22, %v7510_v40  ;;  %v1008_v46 = vmul.f32 %v7801_v58, %v7514_v31  ;;  %v5567_v31 = vld [vmem:[%s7055_s14 + $0x41] sm:$0xff] }
 0x159   : > { %1868 = vperm.xlu0 %6867, %v5565_v47   ;;  %v949_v35 = vadd.f32 %v941_v27, %v880_v19  ;;  %v1007_v12 = vmul.f32 %v7801_v58, %v7516_v29  ;;  %v737_v55 = vmul.f32 %v7677_v22, %v9209_v53  ;;  %v736_v40 = vmul.f32 %v7677_v22, %v9210_v45  ;;  %v9214_v29 = vld [vmem:[#allocation44_spill] sm:$0xff]  ;;  %v9215_v47 = vld [vmem:[#allocation45_spill] sm:$0xff]  ;;  %v9216_v22 = vld [vmem:[#allocation46_spill] sm:$0xff] }
 0x15a   : > { %v948_v52 = vadd.f32 %v940_v37, %v879_v16  ;;  %v1010_v4 = vmul.f32 %v7801_v58, %v9211_v41  ;;  %v1009_v59 = vmul.f32 %v7801_v58, %v9212_v20  ;;  %v805_v6 = vmul.f32 %v7703_v39, %v9213_v54  ;;  %v9218_v32 = vld [vmem:[#allocation48_spill] sm:$0xff]  ;;  %v9223_v53 = vld [vmem:[#allocation31_spill] sm:$0xff]  ;;  %v5575_v20 = vld [vmem:[%s7055_s14 + $0xd1] sm:$0xff] }
 0x15b   : > { %v7808_v42 = vpop.permute.xlu1 %1070  ;;  %v743_v15 = vadd.f32 %v735_v33, %v673_v43  ;;  %v804_v34 = vmul.f32 %v7703_v39, %v9214_v29  ;;  %v1078_v56 = vmul.f32 %v7819_v38, %v9215_v47  ;;  %v1077_v49 = vmul.f32 %v7819_v38, %v9216_v22  ;;  %v7855_v43 = vld [vmem:[%s9090_s1 + $0xb] ss:$0 sm:$0xff]  ;;  %v9227_v41 = vld [vmem:[#allocation55_spill] sm:$0xff]  ;;  %v9229_v29 = vld [vmem:[#allocation57_spill] sm:$0xff] }
 0x15c   : > { %v7810_v61 = vpop.permute.xlu0 %1065  ;;  %1625 = vperm.xlu1 %6868, %v5536_v44   ;;  %v742_v60 = vadd.f32 %v734_v18, %v672_v7  ;;  %v1016_v50 = vadd.f32 %v1008_v46, %v947_v1  ;;  %v807_v62 = vmul.f32 %v7703_v39, %v9217_v23  ;;  %v1015_v9 = vadd.f32 %v1007_v12, %v946_v5  ;;  %v9219_v44 = vld [vmem:[#allocation49_spill] sm:$0xff]  ;;  %v9220_v5 = vld [vmem:[#allocation50_spill] sm:$0xff]  ;;  %v9221_v18 = vld [vmem:[#allocation51_spill] sm:$0xff] }
 0x15d   : > { %1620 = vperm.xlu0 %6867, %v9208_v21   ;;  %v745_v25 = vadd.f32 %v737_v55, %v675_v11  ;;  %v744_v24 = vadd.f32 %v736_v40, %v674_v3  ;;  %v806_v10 = vmul.f32 %v7703_v39, %v9218_v32  ;;  %v1018_v57 = vadd.f32 %v1010_v4, %v949_v35  ;;  %v9222_v21 = vld [vmem:[#allocation52_spill] sm:$0xff]  ;;  %v9224_v55 = vld [vmem:[#allocation26_spill] sm:$0xff]  ;;  %v9225_v40 = vld [vmem:[#allocation53_spill] sm:$0xff] }
 0x15e   : > { %v1017_v19 = vadd.f32 %v1009_v59, %v948_v52  ;;  %v813_v27 = vadd.f32 %v805_v6, %v743_v15  ;;  %v1080_v16 = vmul.f32 %v7819_v38, %v9219_v44  ;;  %v812_v7 = vadd.f32 %v804_v34, %v742_v60  ;;  %v7870_v12 = vld [vmem:[%s9090_s1 + $0xc] ss:$0 sm:$0xff]  ;;  %v5574_v59 = vld [vmem:[%s7055_s14 + $0xc1] sm:$0xff]  ;;  %v9230_v47 = vld [vmem:[#allocation58_spill] sm:$0xff] }
 0x15f   : > { %v7842_v26 = vpop.permute.xlu1 %1327  ;;  %v1086_v37 = vadd.f32 %v1078_v56, %v1016_v50  ;;  %v1085_v1 = vadd.f32 %v1077_v49, %v1015_v9  ;;  %v1079_v11 = vmul.f32 %v7819_v38, %v9220_v5  ;;  %v815_v3 = vadd.f32 %v807_v62, %v745_v25  ;;  %v9228_v6 = vld [vmem:[#allocation56_spill] sm:$0xff]  ;;  %v9231_v49 = vld [vmem:[#allocation59_spill] sm:$0xff]  ;;  %v9233_v62 = vld [vmem:[#allocation61_spill] sm:$0xff] }
 0x160   : > { %v7844_v2 = vpop.permute.xlu0 %1322  ;;  %1883 = vperm.xlu1 %6868, %v5568_v14   ;;  %v874_v46 = vmul.f32 %v7749_v8, %v9221_v18  ;;  %v873_v35 = vmul.f32 %v7749_v8, %v9222_v21  ;;  %v814_v45 = vadd.f32 %v806_v10, %v744_v24  ;;  %v1148_v14 = vmul.f32 %v7855_v43, %v9225_v40  ;;  %v9232_v50 = vld [vmem:[#allocation60_spill] sm:$0xff]  ;;  %v9234_v10 = vld [vmem:[#allocation62_spill] sm:$0xff]  ;;  %v9235_v5 = vld [vmem:[#allocation63_spill] sm:$0xff] }
 0x161   : > { %1878 = vperm.xlu0 %6867, %v5567_v31   ;;  %v9226_v31 = vld [vmem:[#allocation54_spill] sm:$0xff]  ;;  %v876_v4 = vmul.f32 %v7749_v8, %v9227_v41  ;;  %v1088_v54 = vadd.f32 %v1080_v16, %v1018_v57  ;;  %v875_v15 = vmul.f32 %v7749_v8, %v9228_v6  ;;  %v1150_v34 = vmul.f32 %v7855_v43, %v9229_v29  ;;  %v5545_v18 = vld [vmem:[%s7055_s14 + $0x1c2] sm:$0xff] }
 0x162   : > { %v1147_v52 = vmul.f32 %v7855_v43, %v9226_v31  ;;  %v1149_v56 = vmul.f32 %v7855_v43, %v9230_v47  ;;  %v1087_v22 = vadd.f32 %v1079_v11, %v1017_v19  ;;  %v943_v60 = vmul.f32 %v7766_v17, %v9231_v49  ;;  %v9236_v40 = vld [vmem:[#allocation7_spill] sm:$0xff]  ;;  %v5577_v47 = vld [vmem:[%s7055_s14 + $0xf1] sm:$0xff] }
 0x163   : > { %v7859_v39 = vpop.permute.xlu1 %1130  ;;  %v942_v23 = vmul.f32 %v7766_v17, %v9232_v50  ;;  %v1217_v9 = vmul.f32 %v7870_v12, %v9233_v62  ;;  %v882_v8 = vadd.f32 %v874_v46, %v813_v27  ;;  %v881_v32 = vadd.f32 %v873_v35, %v812_v7  ;;  %v7908_v7 = vld [vmem:[%s9090_s1 + $0xd] ss:$0 sm:$0xff]  ;;  %v9242_v49 = vld [vmem:[#allocation10_spill] sm:$0xff] }
 0x164   : > { %v7861_v33 = vpop.permute.xlu0 %1125  ;;  %1684 = vperm.xlu1 %6868, %v9223_v53   ;;  %v1216_v57 = vmul.f32 %v7870_v12, %v9234_v10  ;;  %v1156_v19 = vadd.f32 %v1148_v14, %v1086_v37  ;;  %v1155_v44 = vadd.f32 %v1147_v52, %v1085_v1  ;;  %v884_v16 = vadd.f32 %v876_v4, %v815_v3  ;;  %v9237_v3 = vld [vmem:[#allocation8_spill] sm:$0xff]  ;;  %v9239_v4 = vld [vmem:[#allocation3_spill] sm:$0xff] }
 0x165   : > { %1679 = vperm.xlu0 %6867, %v9224_v55   ;;  %v945_v11 = vmul.f32 %v7766_v17, %v9235_v5  ;;  %v883_v21 = vadd.f32 %v875_v15, %v814_v45  ;;  %v1158_v53 = vadd.f32 %v1150_v34, %v1088_v54  ;;  %v7901_v55 = vadd.f32 %v1149_v56, %v1087_v22  ;;  %v9238_v52 = vld [vmem:[#allocation64_spill] sm:$0xff]  ;;  %v9240_v54 = vld [vmem:[#allocation30_spill] sm:$0xff]  ;;  %v9241_v15 = vld [vmem:[#allocation5_spill] sm:$0xff] }
 0x166   : > { %v1012_v27 = vmul.f32 %v7801_v58, %v9236_v40  ;;  %v951_v46 = vadd.f32 %v943_v60, %v882_v8  ;;  %v950_v37 = vadd.f32 %v942_v23, %v881_v32  ;;  %v1225_v1 = vadd.f32 %v1217_v9, %v1156_v19  ;;  %v5576_v56 = vld [vmem:[%s7055_s14 + $0xe1] sm:$0xff]  ;;  %v7945_v8 = vld [vmem:[%s9090_s1 + $0xf] ss:$0 sm:$0xff] }
 0x167   : > { %v1388_v25 = vpop.permute.xlu1 %1387  ;;  %v1011_v35 = vmul.f32 %v7801_v58, %v9237_v3  ;;  %v1224_v31 = vadd.f32 %v1216_v57, %v1155_v44  ;;  %v944_v41 = vmul.f32 %v7766_v17, %v9238_v52  ;;  %v953_v6 = vadd.f32 %v945_v11, %v884_v16  ;;  %v5552_v44 = vld [vmem:[%s7055_s14 + $0x70] sm:$0xff]  ;;  %v5551_v16 = vld [vmem:[%s7055_s14 + $0x60] sm:$0xff] }
 0x168   : > { %v7894_v24 = vpop.permute.xlu0 %1382  ;;  %1942 = vperm.xlu1 %6868, %v5575_v20   ;;  %v1219_v20 = vmul.f32 %v7870_v12, %v9239_v4  ;;  %v1286_v29 = vmul.f32 %v7908_v7, %v9241_v15  ;;  %v1082_v34 = vmul.f32 %v7819_v38, %v7755_v28  ;;  %v1081_v17 = vmul.f32 %v7819_v38, %v7757_v51  ;;  %v5583_v4 = vld [vmem:[%s7055_s14 + $0x22] sm:$0xff] }
 0x169   : > { %1937 = vperm.xlu0 %6867, %v5574_v59   ;;  %v7919_v59 = vld [vmem:[%s9090_s1 + $0xe] ss:$0 sm:$0xff]  ;;  %v1020_v22 = vadd.f32 %v1012_v27, %v951_v46  ;;  %v1285_v60 = vmul.f32 %v7908_v7, %v9242_v49  ;;  %v1014_v50 = vmul.f32 %v7801_v58, %v7705_v36  ;;  %v1013_v23 = vmul.f32 %v7801_v58, %v7707_v0 }
 0x16a   : > { %v1019_v62 = vadd.f32 %v1011_v35, %v950_v37  ;;  %v1355_v28 = vmul.f32 %v7919_v59, %v7790_v63  ;;  %v1152_v51 = vmul.f32 %v7855_v43, %v7859_v39  ;;  %v1151_v9 = vmul.f32 %v7855_v43, %v7861_v33  ;;  %v9243_v63 = vld [vmem:[#allocation4_spill] sm:$0xff] }
 0x16b   : > { %v1141_v45 = vpop.permute.xlu1 %1140  ;;  %v952_v58 = vadd.f32 %v944_v41, %v883_v21  ;;  %v7951_v32 = vadd.f32 %v1219_v20, %v1158_v53  ;;  %v7955_v10 = vmul.f32 %v7870_v12, %v9243_v63  ;;  %v1294_v39 = vadd.f32 %v1286_v29, %v1225_v1  ;;  %v5584_v41 = vld [vmem:[%s7055_s14 + $0x32] sm:$0xff]  ;;  %v9244_v63 = vld [vmem:[#allocation32_spill] sm:$0xff] }
 0x16c   : > { %v1136_v14 = vpop.permute.xlu0 %1135  ;;  %1694 = vperm.xlu1 %6868, %v5545_v18   ;;  %v1090_v33 = vadd.f32 %v1082_v34, %v1020_v22  ;;  %v1089_v57 = vadd.f32 %v1081_v17, %v1019_v62  ;;  %v1354_v19 = vmul.f32 %v7919_v59, %v7792_v30  ;;  %v1293_v5 = vadd.f32 %v1285_v60, %v1224_v31 }
 0x16d   : > { %1689 = vperm.xlu0 %6867, %v9240_v54   ;;  %v1022_v11 = vadd.f32 %v1014_v50, %v953_v6  ;;  %v1021_v18 = vadd.f32 %v1013_v23, %v952_v58  ;;  %v1425_v21 = vmul.f32 %v7945_v8, %v1388_v25  ;;  %v1288_v53 = vmul.f32 %v7908_v7, %v7738_v48 }
 0x16e   : > { %v1363_v40 = vadd.f32 %v1355_v28, %v1294_v39  ;;  %v1160_v27 = vadd.f32 %v1152_v51, %v1090_v33  ;;  %v1159_v46 = vadd.f32 %v1151_v9, %v1089_v57  ;;  %v1424_v30 = vmul.f32 %v7945_v8, %v7894_v24  ;;  %v7977_v24 = vld [vmem:[%s9090_s1 + $0x10] ss:$0 sm:$0xff]  ;;  %v5586_v39 = vld [vmem:[%s7055_s14 + $0x52] sm:$0xff]  ;;  %v5585_v33 = vld [vmem:[%s7055_s14 + $0x42] sm:$0xff] }
 0x16f   : > { %v7947_v36 = vpop.permute.xlu1 %1397  ;;  %v1287_v25 = vmul.f32 %v7908_v7, %v7740_v13  ;;  %v1362_v48 = vadd.f32 %v1354_v19, %v1293_v5  ;;  %v1084_v31 = vmul.f32 %v7819_v38, %v7808_v42  ;;  %v1083_v52 = vmul.f32 %v7819_v38, %v7810_v61 }
 0x170   : > { %v7949_v0 = vpop.permute.xlu0 %1392  ;;  %1952 = vperm.xlu1 %6868, %v5577_v47   ;;  %v1433_v20 = vadd.f32 %v1425_v21, %v1363_v40  ;;  %v1154_v54 = vmul.f32 %v7855_v43, %v1141_v45  ;;  %v1153_v15 = vmul.f32 %v7855_v43, %v1136_v14  ;;  %v9111_v17 = vmov 0.0   ;;  %v5561_v21 = vld [vmem:[%s7055_s14 + $0x110] sm:$0xff] }
 0x171   : > { %1947 = vperm.xlu0 %6867, %v5576_v56   ;;  %v1432_v61 = vadd.f32 %v1424_v30, %v1362_v48  ;;  %2110 = vst.msk [vmem:[#allocation2 + $0x30] sm:$0xff] %vm2102_vm0, %v9111_v17  ;;  %2103 = vst.msk [vmem:[#allocation2] sm:$0xff] %vm2102_vm0, %v9111_v17  ;;  %v1226_v43 = vadd.f32 %v7955_v10, %v7901_v55  ;;  %v1092_v45 = vadd.f32 %v1084_v31, %v1022_v11  ;;  %v5554_v56 = vld [vmem:[%s7055_s14 + $0x90] sm:$0xff]  ;;  %v6869_v55 = vld [vmem:[%s9093_s4 + $0x20] sm:$0xff]  }
 0x172   : > { %2111 = vst.msk [vmem:[#allocation2 + $0x38] sm:$0xf] %vm2104_vm1, %v9111_v17  ;;  %2105 = vst.msk [vmem:[#allocation2 + $0x8] sm:$0xf] %vm2104_vm1, %v9111_v17  ;;  %v1091_v14 = vadd.f32 %v1083_v52, %v1021_v18  ;;  %v1357_v47 = vmul.f32 %v7919_v59, %v7842_v26  ;;  %v1296_v22 = vadd.f32 %v1288_v53, %v7951_v32  ;;  %6207 = vmatprep.subr.bf16.mxu1 %v6869_v55  ;;  %v5560_v53 = vld [vmem:[%s7055_s14 + $0x100] sm:$0xff]  ;;  %v5563_v48 = vld [vmem:[%s7055_s14 + $0x130] sm:$0xff] }
 0x173   : > { %v1200_v37 = vpop.permute.xlu1 %1199  ;;  %2106 = vst.msk [vmem:[#allocation2 + $0x10] sm:$0xff] %vm2102_vm0, %v9111_v17  ;;  %2108 = vst.msk [vmem:[#allocation2 + $0x20] sm:$0xff] %vm2102_vm0, %v9111_v17  ;;  %v1356_v49 = vmul.f32 %v7919_v59, %v7844_v2  ;;  %v1295_v23 = vadd.f32 %v1287_v25, %v1226_v43  ;;  %v1162_v62 = vadd.f32 %v1154_v54, %v1092_v45  ;;  %6208 = vmatpush3.bf16.msra.mxu1 %v6869_v55  ;;  %v8083_v25 = vld [vmem:[%s9090_s1 + $0x11] ss:$0 sm:$0xff] }
 0x174   : > { %v1195_v1 = vpop.permute.xlu0 %1194  ;;  %v1221_v3 = vmul.f32 %v7870_v12, %v1200_v37  ;;  %1754 = vperm.xlu1 %6868, %v5552_v44   ;;  %2107 = vst.msk [vmem:[#allocation2 + $0x18] sm:$0xf] %vm2104_vm1, %v9111_v17  ;;  %2109 = vst.msk [vmem:[#allocation2 + $0x28] sm:$0xf] %vm2104_vm1, %v9111_v17  ;;  %v1161_v28 = vadd.f32 %v1153_v15, %v1091_v14  ;;  %v1427_v26 = vmul.f32 %v7945_v8, %v7947_v36  ;;  %v6872_v37 = vld [vmem:[%s9093_s4 + $0x180] sm:$0xff]   ;;  %v6875_v14 = vld [vmem:[%s9093_s4 + $0x190] sm:$0xff]  }
 0x175   : > { %v1220_v35 = vmul.f32 %v7870_v12, %v1195_v1  ;;  %1749 = vperm.xlu0 %6867, %v5551_v16   ;;  %2112 = vst.msk [vmem:[#allocation2 + $0x40] sm:$0xff] %vm2102_vm0, %v9111_v17  ;;  %2114 = vst.msk [vmem:[#allocation2 + $0x50] sm:$0xff] %vm2102_vm0, %v9111_v17  ;;  %v1426_v2 = vmul.f32 %v7945_v8, %v7949_v0  ;;  %v1365_v10 = vadd.f32 %v1357_v47, %v1296_v22  ;;  %v6870_v0 = vld [vmem:[%s9093_s4 + $0x28] sm:$0xff]  }
 0x176   : > { %v7982_v6 = vadd.f32 %v1221_v3, %v1160_v27  ;;  %2113 = vst.msk [vmem:[#allocation2 + $0x48] sm:$0xf] %vm2104_vm1, %v9111_v17  ;;  %2115 = vst.msk [vmem:[#allocation2 + $0x58] sm:$0xf] %vm2104_vm1, %v9111_v17  ;;  %v1364_v57 = vadd.f32 %v1356_v49, %v1295_v23  ;;  %6209 = vmatprep.subr.bf16.mxu1 %v6870_v0  ;;  %6399 = vmatprep.subr.bf16.mxu0 %v6872_v37 }
 0x177   : > { %v7984_v13 = vadd.f32 %v1220_v35, %v1159_v46  ;;  %v1458_v42 = vpop.permute.xlu1 %1457  ;;  %2116 = vst.msk [vmem:[#allocation2 + $0x60] sm:$0xff] %vm2102_vm0, %v9111_v17  ;;  %2118 = vst.msk [vmem:[#allocation2 + $0x70] sm:$0xff] %vm2102_vm0, %v9111_v17  ;;  %6210 = vmatpush3.bf16.msra.mxu1 %v6870_v0  ;;  %v6871_v46 = vld [vmem:[%s9093_s4 + $0x30] sm:$0xff]   ;;  %6400 = vmatpush3.bf16.msra.mxu0 %v6872_v37 }
 0x178   : > { %v1453_v29 = vpop.permute.xlu0 %1452  ;;  %v1495_v38 = vmul.f32 %v7977_v24, %v1458_v42  ;;  %2011 = vperm.xlu1 %6868, %v5584_v41   ;;  %2117 = vst.msk [vmem:[#allocation2 + $0x68] sm:$0xf] %vm2104_vm1, %v9111_v17  ;;  %2119 = vst.msk [vmem:[#allocation2 + $0x78] sm:$0xf] %vm2104_vm1, %v9111_v17  ;;  %v1434_v5 = vadd.f32 %v1426_v2, %v1364_v57  ;;  %6211 = vmatprep.subr.bf16.mxu1 %v6871_v46  ;;  %v6873_v41 = vld [vmem:[%s9093_s4 + $0x38] sm:$0xff]   ;;  %v5578_v2 = vld [vmem:[%s7055_s14 + $0x101] sm:$0xff] }
 0x179   : > { %v1494_v34 = vmul.f32 %v7977_v24, %v1453_v29  ;;  %2006 = vperm.xlu0 %6867, %v5583_v4   ;;  %2120 = vst.msk [vmem:[#allocation2 + $0x80] sm:$0xff] %vm2102_vm0, %v9111_v17  ;;  %2122 = vst.msk [vmem:[#allocation2 + $0x90] sm:$0xff] %vm2102_vm0, %v9111_v17  ;;  %v6874_v4 = vld [vmem:[%s9093_s4 + $0x188] sm:$0xff]   ;;  %v8123_v57 = vld [vmem:[%s9090_s1 + $0x12] ss:$0 sm:$0xff] }
 0x17a   : > { %2121 = vst.msk [vmem:[#allocation2 + $0x88] sm:$0xf] %vm2104_vm1, %v9111_v17  ;;  %2123 = vst.msk [vmem:[#allocation2 + $0x98] sm:$0xf] %vm2104_vm1, %v9111_v17  ;;  %v8045_v60 = vadd.f32 %v1495_v38, %v1433_v20  ;;  %v5569_v38 = vld [vmem:[%s7055_s14 + $0x61] sm:$0xff]  ;;  %6401 = vmatprep.subr.bf16.mxu0 %v6874_v4 }
 0x17b   : > { %2124 = vst.msk [vmem:[#allocation2 + $0xa0] sm:$0xff] %vm2102_vm0, %v9111_v17  ;;  %2126 = vst.msk [vmem:[#allocation2 + $0xb0] sm:$0xff] %vm2102_vm0, %v9111_v17  ;;  %v8047_v50 = vadd.f32 %v1494_v34, %v1432_v61  ;;  %v1210_v51 = vpop.permute.xlu1 %1209  ;;  %6212 = vmatpush3.bf16.msra.mxu1 %v6871_v46  ;;  %v2158_v29 = vld [vmem:[#allocation2 + $0x11] sm:$0xff]  ;;  %6402 = vmatpush3.bf16.msra.mxu0 %v6874_v4  ;;  %v6977_v4 = vld [vmem:[%s7055_s14 + $0x82] sm:$0xff] }
 0x17c   : > { %2125 = vst.msk [vmem:[#allocation2 + $0xa8] sm:$0xf] %vm2104_vm1, %v9111_v17  ;;  %2127 = vst.msk [vmem:[#allocation2 + $0xb8] sm:$0xf] %vm2104_vm1, %v9111_v17  ;;  %v1205_v9 = vpop.permute.xlu0 %1204  ;;  %v1223_v58 = vmul.f32 %v7870_v12, %v1210_v51  ;;  %1764 = vperm.xlu1 %6868, %v5554_v56   ;;  %v5570_v61 = vld [vmem:[%s7055_s14 + $0x71] sm:$0xff]  ;;  %6213 = vmatprep.subr.bf16.mxu1 %v6873_v41  ;;  %v9246_v51 = vld [vmem:[#allocation36_spill] sm:$0xff] }
 0x17d   : > { %v1222_v32 = vmul.f32 %v7870_v12, %v1205_v9  ;;  %1759 = vperm.xlu0 %6867, %v9244_v63   ;;  %v1435_v12 = vadd.f32 %v1427_v26, %v1365_v10  ;;  %6403 = vmatprep.subr.bf16.mxu0 %v6875_v14  ;;  %v5579_v9 = vld [vmem:[%s7055_s14 + $0x111] sm:$0xff] }
 0x17e   : > { %v8061_v36 = vadd.f32 %v1223_v58, %v1162_v62 }
 0x17f   : > { %v8063_v19 = vadd.f32 %v1222_v32, %v1161_v28  ;;  %v1468_v44 = vpop.permute.xlu1 %1467  ;;  %6214 = vmatpush3.bf16.msra.mxu1 %v6873_v41  ;;  %6404 = vmatpush3.bf16.msra.mxu0 %v6875_v14  ;;  %v6876_v28 = vld [vmem:[%s9093_s4 + $0x198] sm:$0xff]  }
 0x180   : > { %v1463_v16 = vpop.permute.xlu0 %1462  ;;  %v1497_v11 = vmul.f32 %v7977_v24, %v1468_v44  ;;  %2021 = vperm.xlu1 %6868, %v5586_v39   ;;  %6405 = vmatprep.subr.bf16.mxu0 %v6876_v28 }
 0x181   : > { %v1496_v18 = vmul.f32 %v7977_v24, %v1463_v16  ;;  %2016 = vperm.xlu0 %6867, %v5585_v33  }
 0x182   : > { %v1505_v40 = vadd.f32 %v1497_v11, %v1435_v12  ;;  %v9247_v11 = vld [vmem:[#allocation38_spill] sm:$0xff] }
 0x183   : > { %v1504_v27 = vadd.f32 %v1496_v18, %v1434_v5  ;;  %v1269_v1 = vpop.permute.xlu1 %1268  ;;  %6406 = vmatpush3.bf16.msra.mxu0 %v6876_v28  ;;  %v5588_v18 = vld [vmem:[%s7055_s14 + $0x72] sm:$0xff] }
 0x184   : > { %v1264_v30 = vpop.permute.xlu0 %1263  ;;  %v1290_v3 = vmul.f32 %v7908_v7, %v1269_v1  ;;  %1824 = vperm.xlu1 %6868, %v5561_v21   ;;  %v5587_v21 = vld [vmem:[%s7055_s14 + $0x62] sm:$0xff] }
 0x185   : > { %v1289_v35 = vmul.f32 %v7908_v7, %v1264_v30  ;;  %1819 = vperm.xlu0 %6867, %v5560_v53   ;;  %v5590_v30 = vld [vmem:[%s7055_s14 + $0x92] sm:$0xff] }
 0x186   : > { %v1298_v31 = vadd.f32 %v1290_v3, %v7982_v6  ;;  %v9245_v6 = vld [vmem:[#allocation34_spill] sm:$0xff] }
 0x187   : > { %v1297_v52 = vadd.f32 %v1289_v35, %v7984_v13  ;;  %v1527_v20 = vpop.permute.xlu1 %1526  ;;  %v2157_v13 = vld [vmem:[#allocation2 + $0x1] sm:$0xff] }
 0x188   : > { %v1522_v54 = vpop.permute.xlu0 %1521  ;;  %v1564_v15 = vmul.f32 %v8083_v25, %v1527_v20  ;;  %1834 = vperm.xlu1 %6868, %v5563_v48   ;;  %v2165_v34 = vpack.c.bf16 %v2158_v29, %v2157_v13  ;;  %v8142_v13 = vld [vmem:[%s9090_s1 + $0x13] ss:$0 sm:$0xff] }
 0x189   : > { %v1563_v42 = vmul.f32 %v8083_v25, %v1522_v54  ;;  %1829 = vperm.xlu0 %6867, %v9245_v6  }
 0x18a   : > { %v1572_v43 = vadd.f32 %v1564_v15, %v8045_v60  ;;  %6215 = vmatprep.mubr.msk.bf16.mxu1 %vm2102_vm0, %v2165_v34  ;;  %v5572_v60 = vld [vmem:[%s7055_s14 + $0x91] sm:$0xff] }
 0x18b   : > { %v1571_v45 = vadd.f32 %v1563_v42, %v8047_v50  ;;  %v1279_v47 = vpop.permute.xlu1 %1278 }
 0x18c   : > { %v1274_v56 = vpop.permute.xlu0 %1273  ;;  %v1292_v22 = vmul.f32 %v7908_v7, %v1279_v47  ;;  %1893 = vperm.xlu1 %6868, %v5570_v61  }
 0x18d   : > { %v1291_v49 = vmul.f32 %v7908_v7, %v1274_v56  ;;  %1888 = vperm.xlu0 %6867, %v5569_v38  }
 0x18e   : > { %v1300_v50 = vadd.f32 %v1292_v22, %v8061_v36  ;;  %v5581_v36 = vld [vmem:[%s7055_s14 + $0x131] sm:$0xff]  ;;  %v8159_v22 = vld [vmem:[%s9093_s4 + $0x1a0] sm:$0xff]  }
 0x18f   : > { %v1299_v55 = vadd.f32 %v1291_v49, %v8063_v19  ;;  %v1537_v23 = vpop.permute.xlu1 %1536  ;;  %6415 = vmatprep.subr.bf16.mxu0 %v8159_v22 }
 0x190   : > { %v1532_v62 = vpop.permute.xlu0 %1531  ;;  %v1566_v26 = vmul.f32 %v8083_v25, %v1537_v23  ;;  %1903 = vperm.xlu1 %6868, %v5572_v60  }
 0x191   : > { %v1565_v7 = vmul.f32 %v8083_v25, %v1532_v62  ;;  %1898 = vperm.xlu0 %6867, %v9246_v51  }
 0x192   : > { %v1574_v58 = vadd.f32 %v1566_v26, %v1505_v40 }
 0x193   : > { %v1573_v32 = vadd.f32 %v1565_v7, %v1504_v27  ;;  %v1338_v63 = vpop.permute.xlu1 %1337 }
 0x194   : > { %v1333_v10 = vpop.permute.xlu0 %1332  ;;  %v1359_v39 = vmul.f32 %v7919_v59, %v1338_v63  ;;  %1962 = vperm.xlu1 %6868, %v5579_v9  }
 0x195   : > { %v1358_v33 = vmul.f32 %v7919_v59, %v1333_v10  ;;  %1957 = vperm.xlu0 %6867, %v5578_v2  }
 0x196   : > { %v1367_v19 = vadd.f32 %v1359_v39, %v1298_v31 }
 0x197   : > { %v1366_v0 = vadd.f32 %v1358_v33, %v1297_v52  ;;  %v1596_v12 = vpop.permute.xlu1 %1595 }
 0x198   : > { %v1591_v44 = vpop.permute.xlu0 %1590  ;;  %v1633_v16 = vmul.f32 %v8123_v57, %v1596_v12  ;;  %1972 = vperm.xlu1 %6868, %v5581_v36  }
 0x199   : > { %v1632_v5 = vmul.f32 %v8123_v57, %v1591_v44  ;;  %1967 = vperm.xlu0 %6867, %v9247_v11  }
 0x19a   : > { %v1641_v53 = vadd.f32 %v1633_v16, %v1572_v43  ;;  %v8147_v43 = vld [vmem:[%s9093_s4] sm:$0xff]  }
 0x19b   : > { %v1640_v40 = vadd.f32 %v1632_v5, %v1571_v45  ;;  %v1348_v27 = vpop.permute.xlu1 %1347  ;;  %6223 = vmatprep.subr.bf16.mxu1 %v8147_v43 }
 0x19c   : > { %v1343_v46 = vpop.permute.xlu0 %1342  ;;  %v1361_v37 = vmul.f32 %v7919_v59, %v1348_v27  ;;  %2031 = vperm.xlu1 %6868, %v5588_v18  }
 0x19d   : > { %v1360_v1 = vmul.f32 %v7919_v59, %v1343_v46  ;;  %2026 = vperm.xlu0 %6867, %v5587_v21  }
 0x19e   : > { %v1369_v3 = vadd.f32 %v1361_v37, %v1300_v50 }
 0x19f   : > { %v1368_v35 = vadd.f32 %v1360_v1, %v1299_v55  ;;  %v1606_v48 = vpop.permute.xlu1 %1605 }
 0x1a0   : > { %v1601_v31 = vpop.permute.xlu0 %1600  ;;  %v1635_v52 = vmul.f32 %v8123_v57, %v1606_v48  ;;  %2041 = vperm.xlu1 %6868, %v5590_v30  }
 0x1a1   : > { %v1634_v41 = vmul.f32 %v8123_v57, %v1601_v31  ;;  %2036 = vperm.xlu0 %6867, %v6977_v4  }
 0x1a2   : > { %v1643_v20 = vadd.f32 %v1635_v52, %v1574_v58 }
 0x1a3   : > { %v1642_v54 = vadd.f32 %v1634_v41, %v1573_v32  ;;  %v1408_v15 = vpop.permute.xlu1 %1407 }
 0x1a4   : > { %v1403_v42 = vpop.permute.xlu0 %1402  ;;  %v1429_v59 = vmul.f32 %v7945_v8, %v1408_v15 }
 0x1a5   : > { %v1428_v6 = vmul.f32 %v7945_v8, %v1403_v42 }
 0x1a6   : > { %v1437_v29 = vadd.f32 %v1429_v59, %v1367_v19 }
 0x1a7   : > { %v1436_v61 = vadd.f32 %v1428_v6, %v1366_v0  ;;  %v1665_v38 = vpop.permute.xlu1 %1664 }
 0x1a8   : > { %v1660_v34 = vpop.permute.xlu0 %1659  ;;  %v1702_v45 = vmul.f32 %v8142_v13, %v1665_v38 }
 0x1a9   : > { %v1701_v14 = vmul.f32 %v8142_v13, %v1660_v34 }
 0x1aa   : > { %v8152_v47 = vadd.f32 %v1702_v45, %v1641_v53 }
 0x1ab   : > { %v8154_v56 = vadd.f32 %v1701_v14, %v1640_v40  ;;  %v1418_v49 = vpop.permute.xlu1 %1417  ;;  %v8201_v14 = vld [vmem:[%s9090_s1 + $0x14] ss:$0 sm:$0xff] }
 0x1ac   : > { %v1413_v60 = vpop.permute.xlu0 %1412  ;;  %v1431_v50 = vmul.f32 %v7945_v8, %v1418_v49 }
 0x1ad   : > { %v1430_v55 = vmul.f32 %v7945_v8, %v1413_v60 }
 0x1ae   : > { %v1439_v23 = vadd.f32 %v1431_v50, %v1369_v3  ;;  %v8210_v50 = vld [vmem:[%s9090_s1 + $0x15] ss:$0 sm:$0xff] }
 0x1af   : > { %v1438_v62 = vadd.f32 %v1430_v55, %v1368_v35  ;;  %v1675_v28 = vpop.permute.xlu1 %1674 }
 0x1b0   : > { %v1670_v26 = vpop.permute.xlu0 %1669  ;;  %v1704_v7 = vmul.f32 %v8142_v13, %v1675_v28 }
 0x1b1   : > { %v1703_v51 = vmul.f32 %v8142_v13, %v1670_v26 }
 0x1b2   : > { %v8166_v9 = vadd.f32 %v1704_v7, %v1643_v20 }
 0x1b3   : > { %v8168_v2 = vadd.f32 %v1703_v51, %v1642_v54  ;;  %v1478_v58 = vpop.permute.xlu1 %1477 }
 0x1b4   : > { %v1473_v32 = vpop.permute.xlu0 %1472  ;;  %v1499_v63 = vmul.f32 %v7977_v24, %v1478_v58  ;;  %v8224_v58 = vld [vmem:[%s9090_s1 + $0x17] ss:$0 sm:$0xff] }
 0x1b5   : > { %v1498_v8 = vmul.f32 %v7977_v24, %v1473_v32 }
 0x1b6   : > { %v1507_v10 = vadd.f32 %v1499_v63, %v1437_v29 }
 0x1b7   : > { %v1506_v39 = vadd.f32 %v1498_v8, %v1436_v61  ;;  %v1735_v33 = vpop.permute.xlu1 %1734 }
 0x1b8   : > { %v1730_v36 = vpop.permute.xlu0 %1729  ;;  %v1772_v55 = vmul.f32 %v8201_v14, %v1735_v33 }
 0x1ba   : > { %v1780_v32 = vadd.f32 %v1772_v55, %v8152_v47 }
 0x1bb   : > { %v1488_v19 = vpop.permute.xlu1 %1487 }
 0x1bc   : > { %v1483_v0 = vpop.permute.xlu0 %1482  ;;  %v1501_v12 = vmul.f32 %v7977_v24, %v1488_v19 }
 0x1bd   : > { %v1500_v44 = vmul.f32 %v7977_v24, %v1483_v0 }
 0x1be   : > { %v1509_v16 = vadd.f32 %v1501_v12, %v1439_v23  ;;  %v1771_v23 = vmul.f32 %v8201_v14, %v1730_v36 }
 0x1bf   : > { %v1508_v5 = vadd.f32 %v1500_v44, %v1438_v62  ;;  %v1745_v11 = vpop.permute.xlu1 %1744  ;;  %v8217_v62 = vld [vmem:[%s9090_s1 + $0x16] ss:$0 sm:$0xff] }
 0x1c0   : > { %v1740_v18 = vpop.permute.xlu0 %1739  ;;  %v1779_v63 = vadd.f32 %v1771_v23, %v8154_v56  ;;  %v1774_v44 = vmul.f32 %v8201_v14, %v1745_v11  ;;  %v8241_v56 = vld [vmem:[%s9090_s1 + $0x18] ss:$0 sm:$0xff] }
 0x1c1   : > { %v1773_v47 = vmul.f32 %v8201_v14, %v1740_v18 }
 0x1c2   : > { %v1782_v18 = vadd.f32 %v1774_v44, %v8166_v9  ;;  %v8261_v9 = vld [vmem:[%s9092_s3] ss:$0 sm:$0xff] }
 0x1c3   : > { %v1547_v21 = vpop.permute.xlu1 %1546 }
 0x1c4   : > { %v1542_v53 = vpop.permute.xlu0 %1541  ;;  %v1568_v40 = vmul.f32 %v8083_v25, %v1547_v21 }
 0x1c5   : > { %v1567_v27 = vmul.f32 %v8083_v25, %v1542_v53 }
 0x1c6   : > { %v8176_v46 = vadd.f32 %v1568_v40, %v1507_v10 }
 0x1c7   : > { %v8178_v37 = vadd.f32 %v1567_v27, %v1506_v39  ;;  %v1805_v1 = vpop.permute.xlu1 %1804 }
 0x1c8   : > { %v1800_v30 = vpop.permute.xlu0 %1799  ;;  %v1842_v7 = vmul.f32 %v8210_v50, %v1805_v1 }
 0x1c9   : > { %v1841_v51 = vmul.f32 %v8210_v50, %v1800_v30 }
 0x1ca   : > { %v1850_v36 = vadd.f32 %v1842_v7, %v1780_v32 }
 0x1cb   : > { %v1557_v3 = vpop.permute.xlu1 %1556  ;;  %v1849_v19 = vadd.f32 %v1841_v51, %v1779_v63 }
 0x1cc   : > { %v1552_v35 = vpop.permute.xlu0 %1551  ;;  %v1570_v24 = vmul.f32 %v8083_v25, %v1557_v3 }
 0x1cd   : > { %v1569_v48 = vmul.f32 %v8083_v25, %v1552_v35  ;;  %v1781_v35 = vadd.f32 %v1773_v47, %v8168_v2 }
 0x1ce   : > { %v8182_v31 = vadd.f32 %v1570_v24, %v1509_v16 }
 0x1cf   : > { %v8184_v52 = vadd.f32 %v1569_v48, %v1508_v5  ;;  %v1815_v41 = vpop.permute.xlu1 %1814 }
 0x1d0   : > { %v1810_v4 = vpop.permute.xlu0 %1809  ;;  %v1844_v21 = vmul.f32 %v8210_v50, %v1815_v41  ;;  %v8254_v41 = vld [vmem:[%s9091_s2] ss:$0 sm:$0xff] }
 0x1d1   : > { %v1843_v53 = vmul.f32 %v8210_v50, %v1810_v4 }
 0x1d3   : > { %v8186_v20 = vpop.permute.xlu1 %1615 }
 0x1d4   : > { %v8188_v54 = vpop.permute.xlu0 %1610 }
 0x1d7   : > { %v1874_v15 = vpop.permute.xlu1 %1873 }
 0x1d8   : > { %v1869_v42 = vpop.permute.xlu0 %1868  ;;  %v1911_v8 = vmul.f32 %v8217_v62, %v1874_v15 }
 0x1d9   : > { %v1910_v10 = vmul.f32 %v8217_v62, %v1869_v42  ;;  %v1852_v42 = vadd.f32 %v1844_v21, %v1782_v18  ;;  %v8287_v18 = vld [vmem:[#allocation2 + $0x13] sm:$0xff] }
 0x1da   : > { %v1919_v16 = vadd.f32 %v1911_v8, %v1850_v36 }
 0x1db   : > { %v8190_v59 = vpop.permute.xlu1 %1625  ;;  %v1918_v5 = vadd.f32 %v1910_v10, %v1849_v19 }
 0x1dc   : > { %v8192_v6 = vpop.permute.xlu0 %1620 }
 0x1df   : > { %v1884_v29 = vpop.permute.xlu1 %1883 }
 0x1e0   : > { %v1879_v61 = vpop.permute.xlu0 %1878  ;;  %v1913_v24 = vmul.f32 %v8217_v62, %v1884_v29 }
 0x1e1   : > { %v1912_v48 = vmul.f32 %v8217_v62, %v1879_v61 }
 0x1e2   : > { %v1921_v7 = vadd.f32 %v1913_v24, %v1852_v42 }
 0x1e3   : > { %v8194_v38 = vpop.permute.xlu1 %1684 }
 0x1e4   : > { %v8196_v25 = vpop.permute.xlu0 %1679 }
 0x1e7   : > { %v1943_v34 = vpop.permute.xlu1 %1942 }
 0x1e8   : > { %v1938_v45 = vpop.permute.xlu0 %1937  ;;  %v1980_v0 = vmul.f32 %v8224_v58, %v1943_v34  ;;  %v1851_v34 = vadd.f32 %v1843_v53, %v1781_v35  ;;  %v8289_v35 = vld [vmem:[#allocation2 + $0x14] sm:$0xff] }
 0x1e9   : > { %v1979_v12 = vmul.f32 %v8224_v58, %v1938_v45 }
 0x1ea   : > { %v1988_v1 = vadd.f32 %v1980_v0, %v1919_v16  ;;  %v1920_v51 = vadd.f32 %v1912_v48, %v1851_v34  ;;  %v6879_v34 = vld [vmem:[%s9093_s4 + $0x8] sm:$0xff]  }
 0x1eb   : > { %v8203_v49 = vpop.permute.xlu1 %1694  ;;  %v1987_v30 = vadd.f32 %v1979_v12, %v1918_v5 }
 0x1ec   : > { %v8205_v60 = vpop.permute.xlu0 %1689 }
 0x1ef   : > { %v1953_v28 = vpop.permute.xlu1 %1952 }
 0x1f0   : > { %v1948_v26 = vpop.permute.xlu0 %1947  ;;  %v1982_v45 = vmul.f32 %v8224_v58, %v1953_v28 }
 0x1f1   : > { %v1981_v55 = vmul.f32 %v8224_v58, %v1948_v26 }
 0x1f2   : > { %v1990_v26 = vadd.f32 %v1982_v45, %v1921_v7 }
 0x1f3   : > { %v8230_v39 = vpop.permute.xlu1 %1754  ;;  %v1989_v63 = vadd.f32 %v1981_v55, %v1920_v51  ;;  %v1637_v55 = vmul.f32 %v8123_v57, %v8186_v20  ;;  %v1638_v20 = vmul.f32 %v8123_v57, %v8192_v6 }
 0x1f4   : > { %v8232_v33 = vpop.permute.xlu0 %1749 }
 0x1f7   : > { %v2012_v40 = vpop.permute.xlu1 %2011 }
 0x1f8   : > { %v2007_v27 = vpop.permute.xlu0 %2006  ;;  %v2049_v3 = vmul.f32 %v8241_v56, %v2012_v40 }
 0x1f9   : > { %v2048_v11 = vmul.f32 %v8241_v56, %v2007_v27 }
 0x1fa   : > { %v2057_v4 = vadd.f32 %v2049_v3, %v1988_v1 }
 0x1fb   : > { %v2056_v15 = vadd.f32 %v2048_v11, %v1987_v30  ;;  %v8263_v2 = vpop.permute.xlu1 %1764 }
 0x1fc   : > { %v8265_v29 = vpop.permute.xlu0 %1759  ;;  %v2072_v61 = vmul.f32 %v8254_v41, %v2057_v4 }
 0x1fd   : > { %v2071_v23 = vmul.f32 %v8254_v41, %v2056_v15 }
 0x1fe   : > { %v2087_v32 = vadd.f32 %v8261_v9, %v2072_v61 }
 0x1ff   : > { %v2086_v28 = vadd.f32 %v8261_v9, %v2071_v23  ;;  %v2022_v8 = vpop.permute.xlu1 %2021 }
 0x200   : > { %v2017_v10 = vpop.permute.xlu0 %2016  ;;  %v2095_v36 = vmax.f32 %v2087_v32, 0.0  ;;  %v2051_v0 = vmul.f32 %v8241_v56, %v2022_v8  ;;  %v6892_v8 = vld [vmem:[%s9093_s4 + $0x1d8] sm:$0xff]   ;;  %v6893_v32 = vld [vmem:[%s9093_s4 + $0x60] sm:$0xff]  }
 0x201   : > { %v2094_v19 = vmax.f32 %v2086_v28, 0.0  ;;  %v2050_v12 = vmul.f32 %v8241_v56, %v2017_v10  ;;  %v1636_v28 = vmul.f32 %v8123_v57, %v8188_v54  ;;  %v1705_v54 = vmul.f32 %v8142_v13, %v8196_v25 }
 0x202   : > { %2130 = vst.msk [vmem:[#allocation2 + $0x32] sm:$0xff] %vm2102_vm0, %v2095_v36  ;;  %v2059_v44 = vadd.f32 %v2051_v0, %v1990_v26  ;;  %v1639_v26 = vmul.f32 %v8123_v57, %v8190_v59  ;;  %v6881_v59 = vld [vmem:[%s9093_s4 + $0x10] sm:$0xff]   ;;  %v1645_v57 = vadd.f32 %v1637_v55, %v8176_v46  ;;  %v1775_v46 = vmul.f32 %v8201_v14, %v8232_v33 }
 0x203   : > { %2129 = vst.msk [vmem:[#allocation2 + $0x22] sm:$0xff] %vm2102_vm0, %v2094_v19  ;;  %v2058_v47 = vadd.f32 %v2050_v12, %v1989_v63  ;;  %v8275_v16 = vpop.permute.xlu1 %1824  ;;  %v1706_v63 = vmul.f32 %v8142_v13, %v8194_v38  ;;  %v1644_v10 = vadd.f32 %v1636_v28, %v8178_v37  ;;  %v1646_v19 = vadd.f32 %v1638_v20, %v8184_v52  ;;  %v6883_v52 = vld [vmem:[%s9093_s4 + $0x18] sm:$0xff]  }
 0x204   : > { %v8277_v5 = vpop.permute.xlu0 %1819  ;;  %v2074_v21 = vmul.f32 %v8254_v41, %v2059_v44  ;;  %v1647_v36 = vadd.f32 %v1639_v26, %v8182_v31  ;;  %v6880_v31 = vld [vmem:[%s9093_s4 + $0x1a8] sm:$0xff]   ;;  %v1707_v33 = vmul.f32 %v8142_v13, %v8205_v60  ;;  %v1778_v28 = vmul.f32 %v8201_v14, %v8263_v2  ;;  %v8393_v2 = vld [vmem:[%s9093_s4 + $0x40] sm:$0xff]  }
 0x205   : > { %v2073_v53 = vmul.f32 %v8254_v41, %v2058_v47  ;;  %v1714_v0 = vadd.f32 %v1706_v63, %v1645_v57  ;;  %v1713_v47 = vadd.f32 %v1705_v54, %v1644_v10  ;;  %v1777_v26 = vmul.f32 %v8201_v14, %v8265_v29 }
 0x206   : > { %v2089_v40 = vadd.f32 %v8261_v9, %v2074_v21  ;;  %v1715_v29 = vadd.f32 %v1707_v33, %v1646_v19 }
 0x207   : > { %v2088_v27 = vadd.f32 %v8261_v9, %v2073_v53  ;;  %v8283_v1 = vpop.permute.xlu1 %1834  ;;  %v1708_v53 = vmul.f32 %v8142_v13, %v8203_v49  ;;  %v1846_v49 = vmul.f32 %v8210_v50, %v8275_v16  ;;  %v1845_v13 = vmul.f32 %v8210_v50, %v8277_v5 }
 0x208   : > { %v8285_v30 = vpop.permute.xlu0 %1829  ;;  %v2097_v3 = vmax.f32 %v2089_v40, 0.0  ;;  %v1783_v5 = vadd.f32 %v1775_v46, %v1713_v47  ;;  %v1848_v54 = vmul.f32 %v8210_v50, %v8283_v1 }
 0x209   : > { %v2096_v11 = vmax.f32 %v2088_v27, 0.0  ;;  %v2160_v48 = vld [vmem:[#allocation2 + $0x31] sm:$0xff] }
 0x20a   : > { %v8291_v24 = vld [vmem:[#allocation2 + $0x21] sm:$0xff]  ;;  %2132 = vst.msk [vmem:[#allocation2 + $0x52] sm:$0xff] %vm2102_vm0, %v2097_v3  ;;  %v8296_v42 = vld [vmem:[#allocation2 + $0x32] sm:$0xff]  ;;  %v1853_v10 = vadd.f32 %v1845_v13, %v1783_v5 }
 0x20b   : > { %v3593_v4 = vld [vmem:[#allocation2 + $0x22] sm:$0xff]  ;;  %2131 = vst.msk [vmem:[#allocation2 + $0x42] sm:$0xff] %vm2102_vm0, %v2096_v11  ;;  %v2166_v15 = vpack.c.bf16 %v2160_v48, %v8291_v24  ;;  %v1894_v61 = vpop.permute.xlu1 %1893  ;;  %v8362_v11 = vld [vmem:[#allocation2 + $0x33] sm:$0xff] }
 0x20c   : > { %v8301_v45 = vld [vmem:[#allocation2 + $0x23] sm:$0xff]  ;;  %v1889_v23 = vpop.permute.xlu0 %1888  ;;  %v8306_v7 = vpack.c.bf16 %v8296_v42, %v3593_v4  ;;  %v8375_v60 = vld [vmem:[#allocation2 + $0x34] sm:$0xff]  ;;  %v1915_v20 = vmul.f32 %v8217_v62, %v1894_v61 }
 0x20d   : > { %v8308_v51 = vld [vmem:[#allocation2 + $0x24] sm:$0xff]  ;;  %6216 = vmatmul.mubr.msk.bf16.vlgmr.msra.gmra.mrb[0].mxu1 %vm2102_vm0, %v2166_v15  ;;  %v1914_v63 = vmul.f32 %v8217_v62, %v1889_v23 }
 0x20e   : > { %6407 = vmatprep.mubr.msk.bf16.mxu0 %vm2102_vm0, %v8306_v7  ;;  %6224 = vmatpush3.bf16.msra.mxu1 %v8147_v43  ;;  %v1776_v43 = vmul.f32 %v8201_v14, %v8230_v39  ;;  %v1716_v14 = vadd.f32 %v1708_v53, %v1647_v36 }
 0x20f   : > { %6225 = vmatprep.subr.bf16.mxu1 %v6879_v34  ;;  %v1904_v6 = vpop.permute.xlu1 %1903 }
 0x210   : > { %v1899_v38 = vpop.permute.xlu0 %1898  ;;  %v1786_v19 = vadd.f32 %v1778_v28, %v1716_v14  ;;  %v1917_v1 = vmul.f32 %v8217_v62, %v1904_v6  ;;  %v6884_v6 = vld [vmem:[%s9093_s4 + $0x1b8] sm:$0xff]  }
 0x211   : > { %v8337_v12 = vld [vmem:[#allocation2 + $0x51] sm:$0xff] }
 0x212   : > { %v2161_v25 = vld [vmem:[#allocation2 + $0x41] sm:$0xff]  ;;  %6226 = vmatpush3.bf16.msra.mxu1 %v6879_v34  ;;  %v8344_v21 = vld [vmem:[#allocation2 + $0x52] sm:$0xff]  ;;  %v1784_v34 = vadd.f32 %v1776_v43, %v1714_v0  ;;  %v1785_v0 = vadd.f32 %v1777_v26, %v1715_v29  ;;  %v1856_v47 = vadd.f32 %v1848_v54, %v1786_v19 }
 0x213   : > { %v8339_v44 = vld [vmem:[#allocation2 + $0x42] sm:$0xff]  ;;  %v2167_v37 = vpack.c.bf16 %v8337_v12, %v2161_v25  ;;  %6227 = vmatprep.subr.bf16.mxu1 %v6881_v59  ;;  %v8352_v39 = vpack.c.bf16 %v2161_v25, %v2160_v48  ;;  %v1963_v40 = vpop.permute.xlu1 %1962  ;;  %v1916_v25 = vmul.f32 %v8217_v62, %v1899_v38 }
 0x214   : > { %v1958_v27 = vpop.permute.xlu0 %1957  ;;  %v8360_v3 = vpack.c.bf16 %v8344_v21, %v8339_v44  ;;  %v8364_v4 = vld [vmem:[#allocation2 + $0x43] sm:$0xff]  ;;  %v4212_v48 = vpack.c.bf16 %v8339_v44, %v8296_v42  ;;  %v1854_v23 = vadd.f32 %v1846_v49, %v1784_v34  ;;  %v1984_v43 = vmul.f32 %v8224_v58, %v1963_v40  ;;  %v6921_v44 = vld [vmem:[%s9093_s4 + $0xd0] sm:$0xff]  }
 0x215   : > { %v8366_v15 = vld [vmem:[#allocation2 + $0x44] sm:$0xff]  ;;  %6219 = vmatprep.mubr.msk.bf16.mxu1 %vm2102_vm0, %v2167_v37  ;;  %v4334_v55 = vpack.c.bf16 %v8364_v4, %v8362_v11  ;;  %v1983_v36 = vmul.f32 %v8224_v58, %v1958_v27  ;;  %v1925_v27 = vadd.f32 %v1917_v1, %v1856_v47 }
 0x216   : > { %6408 = vmatmul.mubr.msk.bf16.vlgmr.msra.gmra.mrb[0].mxu0 %vm2102_vm0, %v8360_v3  ;;  %6228 = vmatpush3.bf16.msra.mxu1 %v6881_v59  ;;  %v4456_v16 = vpack.c.bf16 %v8366_v15, %v8375_v60  ;;  %v1847_v59 = vmul.f32 %v8210_v50, %v8285_v30  ;;  %v1923_v50 = vadd.f32 %v1915_v20, %v1854_v23  ;;  %v8417_v20 = vld [vmem:[%s9093_s4 + $0x1c0] sm:$0xff]   ;;  %v6920_v42 = vld [vmem:[%s9093_s4 + $0x248] sm:$0xff]  }
 0x217   : > { %6416 = vmatpush3.bf16.msra.mxu0 %v8159_v22  ;;  %6229 = vmatprep.subr.bf16.mxu1 %v6883_v52  ;;  %v1973_v57 = vpop.permute.xlu1 %1972  ;;  %v6882_v22 = vld [vmem:[%s9093_s4 + $0x1b0] sm:$0xff]   ;;  %v1922_v30 = vadd.f32 %v1914_v63, %v1853_v10 }
 0x218   : > { %v1968_v61 = vpop.permute.xlu0 %1967  ;;  %6417 = vmatprep.subr.bf16.mxu0 %v6880_v31  ;;  %v1855_v46 = vadd.f32 %v1847_v59, %v1785_v0  ;;  %v1986_v37 = vmul.f32 %v8224_v58, %v1973_v57  ;;  %v1992_v62 = vadd.f32 %v1984_v43, %v1923_v50  ;;  %v8434_v50 = vld [vmem:[#allocation2 + $0x10] sm:$0xff] }
 0x219   : > { %v1985_v53 = vmul.f32 %v8224_v58, %v1968_v61  ;;  %v1991_v38 = vadd.f32 %v1983_v36, %v1922_v30 }
 0x21a   : > { %6230 = vmatpush3.bf16.msra.mxu1 %v6883_v52  ;;  %v1924_v34 = vadd.f32 %v1916_v25, %v1855_v46  ;;  %v1994_v28 = vadd.f32 %v1986_v37, %v1925_v27  ;;  %v2137_v25 = vld [vmem:[#allocation2] sm:$0xff] }
 0x21b   : > { %6418 = vmatpush3.bf16.msra.mxu0 %v6880_v31  ;;  %6239 = vmatprep.subr.bf16.mxu1 %v8393_v2  ;;  %v2032_v33 = vpop.permute.xlu1 %2031  ;;  %v2145_v46 = vpack.c.bf16 %v8434_v50, %v2137_v25 }
 0x21c   : > { %v2027_v40 = vpop.permute.xlu0 %2026  ;;  %6419 = vmatprep.subr.bf16.mxu0 %v6882_v22  ;;  %v2053_v52 = vmul.f32 %v8241_v56, %v2032_v33  ;;  %v1993_v58 = vadd.f32 %v1985_v53, %v1924_v34  ;;  %v3718_v53 = vld [vmem:[#allocation2 + $0x53] sm:$0xff] }
 0x21d   : > { %v2052_v31 = vmul.f32 %v8241_v56, %v2027_v40  ;;  %v8524_v25 = vpack.c.bf16 %v3718_v53, %v8364_v4 }
 0x21e   : > { %v2061_v49 = vadd.f32 %v2053_v52, %v1992_v62  ;;  %v8450_v62 = vld [vmem:[#allocation2 + $0x54] sm:$0xff] }
 0x21f   : > { %v2060_v13 = vadd.f32 %v2052_v31, %v1991_v38  ;;  %6420 = vmatpush3.bf16.msra.mxu0 %v6882_v22  ;;  %v2042_v26 = vpop.permute.xlu1 %2041 }
 0x220   : > { %v2037_v5 = vpop.permute.xlu0 %2036  ;;  %6421 = vmatprep.subr.bf16.mxu0 %v6884_v6  ;;  %v2076_v63 = vmul.f32 %v8254_v41, %v2061_v49  ;;  %v2055_v29 = vmul.f32 %v8241_v56, %v2042_v26  ;;  %v8469_v26 = vld [vmem:[#allocation2 + $0x30] sm:$0xff] }
 0x221   : > { %v2075_v14 = vmul.f32 %v8254_v41, %v2060_v13  ;;  %v2054_v54 = vmul.f32 %v8241_v56, %v2037_v5  ;;  %v8466_v13 = vld [vmem:[#allocation2 + $0x20] sm:$0xff] }
 0x222   : > { %v2091_v59 = vadd.f32 %v8261_v9, %v2076_v63  ;;  %v2063_v61 = vadd.f32 %v2055_v29, %v1994_v28 }
 0x223   : > { %v2090_v57 = vadd.f32 %v8261_v9, %v2075_v14  ;;  %v2062_v22 = vadd.f32 %v2054_v54, %v1993_v58  ;;  %6422 = vmatpush3.bf16.msra.mxu0 %v6884_v6  ;;  %v8481_v54 = vpack.c.bf16 %v8362_v11, %v8301_v45  ;;  %v6928_v11 = vld [vmem:[%s9093_s4 + $0x268] sm:$0xff]  }
 0x224   : > { %6431 = vmatprep.subr.bf16.mxu0 %v8417_v20  ;;  %v2099_v23 = vmax.f32 %v2091_v59, 0.0  ;;  %v2078_v43 = vmul.f32 %v8254_v41, %v2063_v61 }
 0x225   : > { %v2098_v10 = vmax.f32 %v2090_v57, 0.0  ;;  %v2077_v36 = vmul.f32 %v8254_v41, %v2062_v22 }
 0x226   : > { %2134 = vst.msk [vmem:[#allocation2 + $0x72] sm:$0xff] %vm2102_vm0, %v2099_v23  ;;  %v2093_v56 = vadd.f32 %v8261_v9, %v2078_v43  ;;  %v8494_v23 = vld [vmem:[#allocation2 + $0x40] sm:$0xff] }
 0x227   : > { %2133 = vst.msk [vmem:[#allocation2 + $0x62] sm:$0xff] %vm2102_vm0, %v2098_v10  ;;  %v2092_v19 = vadd.f32 %v8261_v9, %v2077_v36  ;;  %v8496_v10 = vld [vmem:[#allocation2 + $0x50] sm:$0xff] }
 0x228   : > { %v2101_v0 = vmax.f32 %v2093_v56, 0.0 }
 0x229   : > { %v2100_v1 = vmax.f32 %v2092_v19, 0.0  ;;  %v2146_v19 = vpack.c.bf16 %v8469_v26, %v8466_v13 }
 0x22a   : > { %2136 = vst.msk [vmem:[#allocation2 + $0x92] sm:$0xff] %vm2102_vm0, %v2101_v0  ;;  %v6887_v0 = vld [vmem:[%s9093_s4 + $0x48] sm:$0xff]  }
 0x22b   : > { %2135 = vst.msk [vmem:[#allocation2 + $0x82] sm:$0xff] %vm2102_vm0, %v2100_v1  ;;  %v8517_v1 = vpack.c.bf16 %v8496_v10, %v8494_v23 }
 0x22d   : > { %v8438_v41 = vld [vmem:[#allocation2 + $0x71] sm:$0xff] }
 0x22e   : > { %v8436_v30 = vld [vmem:[#allocation2 + $0x61] sm:$0xff]  ;;  %v3598_v37 = vld [vmem:[#allocation2 + $0x72] sm:$0xff] }
 0x22f   : > { %v8440_v47 = vld [vmem:[#allocation2 + $0x62] sm:$0xff]  ;;  %v2168_v9 = vpack.c.bf16 %v8438_v41, %v8436_v30  ;;  %v3720_v31 = vld [vmem:[#allocation2 + $0x73] sm:$0xff] }
 0x230   : > { %v3719_v33 = vld [vmem:[#allocation2 + $0x63] sm:$0xff]  ;;  %v4213_v40 = vpack.c.bf16 %v8440_v47, %v8344_v21  ;;  %v8448_v6 = vpack.c.bf16 %v3598_v37, %v8440_v47  ;;  %v8471_v5 = vld [vmem:[#allocation2 + $0x74] sm:$0xff] }
 0x231   : > { %v8452_v38 = vld [vmem:[#allocation2 + $0x64] sm:$0xff]  ;;  %v8454_v52 = vpack.c.bf16 %v3719_v33, %v3718_v53  ;;  %6220 = vmatmul.mubr.msk.bf16.gmra.mrb[4].mxu1 %vm2102_vm0, %v2168_v9  ;;  %v8463_v49 = vld [vmem:[#allocation2 + $0x92] sm:$0xff] }
 0x232   : > { %v8459_v27 = vpack.c.bf16 %v8452_v38, %v8450_v62  ;;  %6411 = vmatprep.mubr.msk.bf16.mxu0 %vm2102_vm0, %v8448_v6  ;;  %v3599_v34 = vld [vmem:[#allocation2 + $0x82] sm:$0xff]  ;;  %6231 = vmatprep.mubr.msk.bf16.mxu1 %vm2102_vm0, %v2145_v46  ;;  %v8485_v57 = vld [vmem:[#allocation2 + $0x90] sm:$0xff] }
 0x233   : > { %v3721_v28 = vld [vmem:[#allocation2 + $0x83] sm:$0xff]  ;;  %v3604_v58 = vpack.c.bf16 %v8463_v49, %v3599_v34  ;;  %v8475_v14 = vpack.c.bf16 %v3599_v34, %v3598_v37  ;;  %v8498_v43 = vld [vmem:[#allocation2 + $0x91] sm:$0xff] }
 0x234   : > { %v8473_v63 = vld [vmem:[#allocation2 + $0x84] sm:$0xff]  ;;  %v8477_v29 = vpack.c.bf16 %v3721_v28, %v3720_v31  ;;  %v8531_v37 = vld [vmem:[#allocation2 + $0x70] sm:$0xff] }
 0x235   : > { %v8483_v59 = vld [vmem:[#allocation2 + $0x80] sm:$0xff]  ;;  %v8491_v22 = vpack.c.bf16 %v8473_v63, %v8471_v5  ;;  %6412 = vmatmul.mubr.msk.bf16.gmra.mrb[4].mxu0 %vm2102_vm0, %v3604_v58  ;;  %v6888_v46 = vld [vmem:[%s9093_s4 + $0x1c8] sm:$0xff]   ;;  %v6889_v34 = vld [vmem:[%s9093_s4 + $0x50] sm:$0xff]  }
 0x236   : > { %v8487_v61 = vld [vmem:[#allocation2 + $0x81] sm:$0xff]  ;;  %6423 = vmatprep.mubr.msk.bf16.mxu0 %vm2102_vm0, %v8481_v54  ;;  %v8504_v36 = vpack.c.bf16 %v8485_v57, %v8483_v59  ;;  %v6978_v21 = vld [vmem:[#allocation2 + $0x11] sm:$0xff] }
 0x237   : > { %v8508_v56 = vpack.c.bf16 %v8498_v43, %v8487_v61  ;;  %v8529_v9 = vld [vmem:[#allocation2 + $0x60] sm:$0xff] }
 0x238   : > { %v2372_v58 = vld [vmem:[#allocation2 + $0x2] sm:$0xff]  ;;  %v8545_v53 = vpack.c.bf16 %v8531_v37, %v8529_v9 }
 0x239   : > { %6232 = vmatmul.mubr.msk.bf16.vlgmr.msra.gmra.mrb[0].mxu1 %vm2102_vm0, %v2146_v19  ;;  %v6890_v19 = vld [vmem:[%s9093_s4 + $0x1d0] sm:$0xff]  }
 0x23a   : > { %6235 = vmatprep.mubr.msk.bf16.mxu1 %vm2102_vm0, %v8517_v1  ;;  %6240 = vmatpush3.bf16.msra.mxu1 %v8393_v2  ;;  %v8538_v2 = vpack.c.bf16 %v3720_v31, %v3719_v33  ;;  %v6891_v33 = vld [vmem:[%s9093_s4 + $0x58] sm:$0xff]  }
 0x23b   : > { %6241 = vmatprep.subr.bf16.mxu1 %v6887_v0  ;;  %v8553_v31 = vld [vmem:[#allocation2 + $0x12] sm:$0xff] }
 0x23d   : > { %6424 = vmatmul.mubr.msk.bf16.vlgmr.msra.gmra.mrb[0].mxu0 %vm2102_vm0, %v8524_v25 }
 0x23e   : > { %6432 = vmatpush3.bf16.msra.mxu0 %v8417_v20  ;;  %6242 = vmatpush3.bf16.msra.mxu1 %v6887_v0  ;;  %v8555_v20 = vld [vmem:[#allocation2 + $0x93] sm:$0xff]  ;;  %v2380_v0 = vpack.c.bf16 %v8553_v31, %v2372_v58  ;;  %v6896_v58 = vld [vmem:[%s9093_s4 + $0x1e8] sm:$0xff]  }
 0x23f   : > { %6427 = vmatprep.mubr.msk.bf16.mxu0 %vm2102_vm0, %v8538_v2  ;;  %6433 = vmatprep.subr.bf16.mxu0 %v6888_v46  ;;  %v3726_v17 = vpack.c.bf16 %v8555_v20, %v3721_v28  ;;  %v6894_v28 = vld [vmem:[%s9093_s4 + $0x1e0] sm:$0xff]  }
 0x240   : > { %6243 = vmatprep.subr.bf16.mxu1 %v6889_v34 }
 0x241   : > { %6236 = vmatmul.mubr.msk.bf16.gmra.mrb[4].mxu1 %vm2102_vm0, %v8545_v53 }
 0x242   : > { %6434 = vmatpush3.bf16.msra.mxu0 %v6888_v46  ;;  %6244 = vmatpush3.bf16.msra.mxu1 %v6889_v34  ;;  %v8571_v46 = vpack.c.bf16 %v8375_v60, %v8308_v51  ;;  %v6895_v34 = vld [vmem:[%s9093_s4 + $0x68] sm:$0xff]  }
 0x243   : > { %6435 = vmatprep.subr.bf16.mxu0 %v6890_v19  ;;  %6245 = vmatprep.subr.bf16.mxu1 %v6891_v33 }
 0x244   : > { %6247 = vmatprep.mubr.msk.bf16.mxu1 %vm2102_vm0, %v2380_v0  ;;  %v8622_v0 = vpack.c.bf16 %v8494_v23, %v8469_v26  ;;  %v6903_v26 = vld [vmem:[%s9093_s4 + $0x88] sm:$0xff]   ;;  %v8642_v23 = vpack.c.bf16 %v8529_v9, %v8496_v10  ;;  %v6906_v10 = vld [vmem:[%s9093_s4 + $0x210] sm:$0xff]   ;;  %v8664_v9 = vld [vmem:[#allocation2 + $0xa0] sm:$0xff] }
 0x245   : > { %6428 = vmatmul.mubr.msk.bf16.gmra.mrb[4].mxu0 %vm2102_vm0, %v3726_v17  ;;  %v8587_v17 = vpack.c.bf16 %v8450_v62, %v8366_v15  ;;  %v8610_v62 = vld [vmem:[#allocation2 + $0x94] sm:$0xff] }
 0x246   : > { %6436 = vmatpush3.bf16.msra.mxu0 %v6890_v19  ;;  %6246 = vmatpush3.bf16.msra.mxu1 %v6891_v33  ;;  %v2494_v19 = vld [vmem:[#allocation2 + $0x3] sm:$0xff]  ;;  %v8594_v33 = vpack.c.bf16 %v8471_v5, %v8452_v38  ;;  %v3848_v38 = vpack.c.bf16 %v8610_v62, %v8473_v63  ;;  %v6900_v5 = vld [vmem:[%s9093_s4 + $0x1f8] sm:$0xff]  }
 0x247   : > { %6439 = vmatprep.mubr.msk.bf16.mxu0 %vm2102_vm0, %v8571_v46  ;;  %6437 = vmatprep.subr.bf16.mxu0 %v6892_v8  ;;  %v6902_v63 = vld [vmem:[%s9093_s4 + $0x200] sm:$0xff]  }
 0x248   : > { %6255 = vmatprep.subr.bf16.mxu1 %v6893_v32 }
 0x249   : > { %6248 = vmatmul.mubr.msk.bf16.vlgmr.msra.gmra.mrb[0].mxu1 %vm2102_vm0, %v8306_v7  ;;  %v6897_v7 = vld [vmem:[%s9093_s4 + $0x70] sm:$0xff]  }
 0x24a   : > { %6438 = vmatpush3.bf16.msra.mxu0 %v6892_v8  ;;  %6251 = vmatprep.mubr.msk.bf16.mxu1 %vm2102_vm0, %v8360_v3  ;;  %v6898_v8 = vld [vmem:[%s9093_s4 + $0x1f0] sm:$0xff]   ;;  %v6899_v3 = vld [vmem:[%s9093_s4 + $0x78] sm:$0xff]  }
 0x24b   : > { %6256 = vmatpush3.bf16.msra.mxu1 %v6893_v32  ;;  %6447 = vmatprep.subr.bf16.mxu0 %v6894_v28  ;;  %v2502_v32 = vpack.c.bf16 %v8287_v18, %v2494_v19  ;;  %v6908_v19 = vld [vmem:[%s9093_s4 + $0x218] sm:$0xff]  }
 0x24c   : > { %6257 = vmatprep.subr.bf16.mxu1 %v6895_v34 }
 0x24d   : > { %6440 = vmatmul.mubr.msk.bf16.vlgmr.msra.gmra.mrb[0].mxu0 %vm2102_vm0, %v8587_v17 }
 0x24e   : > { %6448 = vmatpush3.bf16.msra.mxu0 %v6894_v28  ;;  %6443 = vmatprep.mubr.msk.bf16.mxu0 %vm2102_vm0, %v8594_v33  ;;  %v6904_v28 = vld [vmem:[%s9093_s4 + $0x208] sm:$0xff]  }
 0x24f   : > { %6258 = vmatpush3.bf16.msra.mxu1 %v6895_v34  ;;  %6449 = vmatprep.subr.bf16.mxu0 %v6896_v58  ;;  %v8649_v34 = vpack.c.bf16 %v8483_v59, %v8531_v37  ;;  %v6907_v59 = vld [vmem:[%s9093_s4 + $0x98] sm:$0xff]  }
 0x250   : > { %6259 = vmatprep.subr.bf16.mxu1 %v6897_v7 }
 0x251   : > { %6252 = vmatmul.mubr.msk.bf16.gmra.mrb[4].mxu1 %vm2102_vm0, %v8448_v6  ;;  %v6901_v6 = vld [vmem:[%s9093_s4 + $0x80] sm:$0xff]  }
 0x252   : > { %6450 = vmatpush3.bf16.msra.mxu0 %v6896_v58  ;;  %6263 = vmatprep.mubr.msk.bf16.mxu1 %vm2102_vm0, %v2502_v32  ;;  %v3971_v58 = vpack.c.bf16 %v8664_v9, %v8485_v57  ;;  %v6910_v57 = vld [vmem:[%s9093_s4 + $0x220] sm:$0xff]   ;;  %v8693_v32 = vpack.c.bf16 %v8436_v30, %v8337_v12  ;;  %v6914_v12 = vld [vmem:[%s9093_s4 + $0x230] sm:$0xff]   ;;  %v6915_v30 = vld [vmem:[%s9093_s4 + $0xb8] sm:$0xff]  }
 0x253   : > { %6260 = vmatpush3.bf16.msra.mxu1 %v6897_v7  ;;  %6451 = vmatprep.subr.bf16.mxu0 %v6898_v8  ;;  %v6909_v7 = vld [vmem:[%s9093_s4 + $0xa0] sm:$0xff]  }
 0x254   : > { %6261 = vmatprep.subr.bf16.mxu1 %v6899_v3 }
 0x255   : > { %6444 = vmatmul.mubr.msk.bf16.gmra.mrb[4].mxu0 %vm2102_vm0, %v3848_v38  ;;  %v6916_v38 = vld [vmem:[%s9093_s4 + $0x238] sm:$0xff]  }
 0x256   : > { %6452 = vmatpush3.bf16.msra.mxu0 %v6898_v8  ;;  %6455 = vmatprep.mubr.msk.bf16.mxu0 %vm2102_vm0, %v8622_v0  ;;  %v6912_v8 = vld [vmem:[%s9093_s4 + $0x228] sm:$0xff]  }
 0x257   : > { %6262 = vmatpush3.bf16.msra.mxu1 %v6899_v3  ;;  %6453 = vmatprep.subr.bf16.mxu0 %v6900_v5  ;;  %v8700_v3 = vpack.c.bf16 %v8487_v61, %v8438_v41  ;;  %v8715_v41 = vld [vmem:[#allocation2 + $0xa1] sm:$0xff]  ;;  %v2747_v61 = vpack.c.bf16 %v8466_v13, %v8434_v50 }
 0x258   : > { %6271 = vmatprep.subr.bf16.mxu1 %v6901_v6  ;;  %v6917_v50 = vld [vmem:[%s9093_s4 + $0xc0] sm:$0xff]  }
 0x259   : > { %v6918_v13 = vld [vmem:[%s9093_s4 + $0x240] sm:$0xff]  }
 0x25a   : > { %6264 = vmatmul.mubr.msk.bf16.vlgmr.msra.gmra.mrb[0].mxu1 %vm2102_vm0, %v8481_v54  ;;  %6454 = vmatpush3.bf16.msra.mxu0 %v6900_v5  ;;  %v6905_v54 = vld [vmem:[%s9093_s4 + $0x90] sm:$0xff]   ;;  %v8763_v5 = vld [vmem:[#allocation2 + $0xa2] sm:$0xff] }
 0x25b   : > { %6267 = vmatprep.mubr.msk.bf16.mxu1 %vm2102_vm0, %v8524_v25  ;;  %6272 = vmatpush3.bf16.msra.mxu1 %v6901_v6  ;;  %v2616_v25 = vld [vmem:[#allocation2 + $0x4] sm:$0xff]  ;;  %v6924_v6 = vld [vmem:[%s9093_s4 + $0x258] sm:$0xff]  }
 0x25c   : > { %6463 = vmatprep.subr.bf16.mxu0 %v6902_v63  ;;  %6273 = vmatprep.subr.bf16.mxu1 %v6903_v26  ;;  %v2624_v37 = vpack.c.bf16 %v8289_v35, %v2616_v25  ;;  %v6932_v25 = vld [vmem:[%s9093_s4 + $0x278] sm:$0xff]  }
 0x25d   : > { %6456 = vmatmul.mubr.msk.bf16.vlgmr.msra.gmra.mrb[0].mxu0 %vm2102_vm0, %v8642_v23 }
 0x25e   : > { %6464 = vmatpush3.bf16.msra.mxu0 %v6902_v63  ;;  %6459 = vmatprep.mubr.msk.bf16.mxu0 %vm2102_vm0, %v8649_v34  ;;  %v6927_v63 = vld [vmem:[%s9093_s4 + $0xe8] sm:$0xff]  }
 0x25f   : > { %6274 = vmatpush3.bf16.msra.mxu1 %v6903_v26  ;;  %6465 = vmatprep.subr.bf16.mxu0 %v6904_v28  ;;  %v6930_v26 = vld [vmem:[%s9093_s4 + $0x270] sm:$0xff]  }
 0x260   : > { %6275 = vmatprep.subr.bf16.mxu1 %v6905_v54 }
 0x262   : > { %6268 = vmatmul.mubr.msk.bf16.gmra.mrb[4].mxu1 %vm2102_vm0, %v8538_v2  ;;  %6466 = vmatpush3.bf16.msra.mxu0 %v6904_v28  ;;  %v6911_v2 = vld [vmem:[%s9093_s4 + $0xa8] sm:$0xff]  }
 0x263   : > { %6276 = vmatpush3.bf16.msra.mxu1 %v6905_v54  ;;  %6467 = vmatprep.subr.bf16.mxu0 %v6906_v10  ;;  %v8808_v28 = vld [vmem:[#allocation2 + $0xa3] sm:$0xff] }
 0x264   : > { %6277 = vmatprep.subr.bf16.mxu1 %v6907_v59  ;;  %6279 = vmatprep.mubr.msk.bf16.mxu1 %vm2102_vm0, %v2624_v37  ;;  %v4337_v54 = vpack.c.bf16 %v8808_v28, %v8555_v20  ;;  %v2985_v20 = vld [vmem:[#allocation2 + $0x32] sm:$0xff] }
 0x265   : > { %6460 = vmatmul.mubr.msk.bf16.gmra.mrb[4].mxu0 %vm2102_vm0, %v3971_v58  ;;  %v8830_v37 = vld [vmem:[#allocation2 + $0x52] sm:$0xff]  ;;  %v6934_v58 = vld [vmem:[%s9093_s4 + $0x280] sm:$0xff]  }
 0x266   : > { %6468 = vmatpush3.bf16.msra.mxu0 %v6906_v10  ;;  %6471 = vmatprep.mubr.msk.bf16.mxu0 %vm2102_vm0, %v8352_v39  ;;  %v8823_v10 = vld [vmem:[#allocation2 + $0x42] sm:$0xff]  ;;  %v2993_v60 = vpack.c.bf16 %v8440_v47, %v8830_v37  ;;  %v6938_v47 = vld [vmem:[%s9093_s4 + $0x290] sm:$0xff]  }
 0x267   : > { %6278 = vmatpush3.bf16.msra.mxu1 %v6907_v59  ;;  %6469 = vmatprep.subr.bf16.mxu0 %v6908_v19  ;;  %v2992_v59 = vpack.c.bf16 %v8823_v10, %v2985_v20  ;;  %v4819_v20 = vld [vmem:[#allocation2 + $0x82] sm:$0xff] }
 0x268   : > { %6287 = vmatprep.subr.bf16.mxu1 %v6909_v7 }
 0x26a   : > { %6280 = vmatmul.mubr.msk.bf16.vlgmr.msra.gmra.mrb[0].mxu1 %vm2102_vm0, %v8571_v46  ;;  %6470 = vmatpush3.bf16.msra.mxu0 %v6908_v19  ;;  %v6913_v46 = vld [vmem:[%s9093_s4 + $0xb0] sm:$0xff]   ;;  %v6935_v19 = vld [vmem:[%s9093_s4 + $0x108] sm:$0xff]  }
 0x26b   : > { %6283 = vmatprep.mubr.msk.bf16.mxu1 %vm2102_vm0, %v8587_v17  ;;  %6288 = vmatpush3.bf16.msra.mxu1 %v6909_v7  ;;  %v4093_v17 = vpack.c.bf16 %v8715_v41, %v8498_v43  ;;  %v6919_v43 = vld [vmem:[%s9093_s4 + $0xc8] sm:$0xff]   ;;  %v6937_v7 = vld [vmem:[%s9093_s4 + $0x110] sm:$0xff]  }
 0x26c   : > { %6479 = vmatprep.subr.bf16.mxu0 %v6910_v57  ;;  %6289 = vmatprep.subr.bf16.mxu1 %v6911_v2 }
 0x26d   : > { %6472 = vmatmul.mubr.msk.bf16.vlgmr.msra.gmra.mrb[0].mxu0 %vm2102_vm0, %v8693_v32 }
 0x26e   : > { %6480 = vmatpush3.bf16.msra.mxu0 %v6910_v57  ;;  %6475 = vmatprep.mubr.msk.bf16.mxu0 %vm2102_vm0, %v8700_v3  ;;  %v6939_v57 = vld [vmem:[%s9093_s4 + $0x118] sm:$0xff]  }
 0x26f   : > { %6290 = vmatpush3.bf16.msra.mxu1 %v6911_v2  ;;  %6481 = vmatprep.subr.bf16.mxu0 %v6912_v8  ;;  %v8858_v2 = vld [vmem:[#allocation2 + $0xa4] sm:$0xff] }
 0x270   : > { %6291 = vmatprep.subr.bf16.mxu1 %v6913_v46 }
 0x272   : > { %6284 = vmatmul.mubr.msk.bf16.gmra.mrb[4].mxu1 %vm2102_vm0, %v8594_v33  ;;  %6482 = vmatpush3.bf16.msra.mxu0 %v6912_v8  ;;  %v6923_v33 = vld [vmem:[%s9093_s4 + $0xd8] sm:$0xff]   ;;  %v4459_v8 = vpack.c.bf16 %v8858_v2, %v8610_v62  ;;  %v6942_v62 = vld [vmem:[%s9093_s4 + $0x2a0] sm:$0xff]  }
 0x273   : > { %6292 = vmatpush3.bf16.msra.mxu1 %v6913_v46  ;;  %6295 = vmatprep.mubr.msk.bf16.mxu1 %vm2102_vm0, %v2747_v61  ;;  %v6943_v46 = vld [vmem:[%s9093_s4 + $0x128] sm:$0xff]  }
 0x274   : > { %6483 = vmatprep.subr.bf16.mxu0 %v6914_v12  ;;  %6293 = vmatprep.subr.bf16.mxu1 %v6915_v30 }
 0x275   : > { %6476 = vmatmul.mubr.msk.bf16.gmra.mrb[4].mxu0 %vm2102_vm0, %v4093_v17  ;;  %v4693_v17 = vld [vmem:[#allocation2 + $0x41] sm:$0xff] }
 0x276   : > { %6484 = vmatpush3.bf16.msra.mxu0 %v6914_v12  ;;  %6487 = vmatprep.mubr.msk.bf16.mxu0 %vm2102_vm0, %v4212_v48  ;;  %v6922_v48 = vld [vmem:[%s9093_s4 + $0x250] sm:$0xff]  }
 0x277   : > { %6294 = vmatpush3.bf16.msra.mxu1 %v6915_v30  ;;  %6485 = vmatprep.subr.bf16.mxu0 %v6916_v38  ;;  %v4578_v12 = vld [vmem:[#allocation2 + $0xb0] sm:$0xff]  ;;  %v6947_v30 = vld [vmem:[%s9093_s4 + $0x138] sm:$0xff]  }
 0x278   : > { %6303 = vmatprep.subr.bf16.mxu1 %v6917_v50  ;;  %v4582_v61 = vpack.c.bf16 %v4578_v12, %v8664_v9  ;;  %v6949_v9 = vld [vmem:[%s9093_s4 + $0x140] sm:$0xff]  }
 0x27a   : > { %6296 = vmatmul.mubr.msk.bf16.vlgmr.msra.gmra.mrb[0].mxu1 %vm2102_vm0, %v8622_v0  ;;  %6486 = vmatpush3.bf16.msra.mxu0 %v6916_v38  ;;  %v4215_v0 = vpack.c.bf16 %v8763_v5, %v8463_v49  ;;  %v6926_v49 = vld [vmem:[%s9093_s4 + $0x260] sm:$0xff]   ;;  %v9249_v38 = vpack.c.bf16 %v8308_v51, %v8289_v35  ;;  %v3229_v35 = vld [vmem:[#allocation2 + $0x34] sm:$0xff] }
 0x27b   : > { %6299 = vmatprep.mubr.msk.bf16.mxu1 %vm2102_vm0, %v8642_v23  ;;  %6304 = vmatpush3.bf16.msra.mxu1 %v6917_v50  ;;  %v6931_v23 = vld [vmem:[%s9093_s4 + $0xf8] sm:$0xff]   ;;  %v4695_v51 = vld [vmem:[#allocation2 + $0x61] sm:$0xff] }
 0x27c   : > { %6495 = vmatprep.subr.bf16.mxu0 %v6918_v13  ;;  %6305 = vmatprep.subr.bf16.mxu1 %v6919_v43  ;;  %v6948_v50 = vld [vmem:[%s9093_s4 + $0x2b8] sm:$0xff]  }
 0x27d   : > { %6488 = vmatmul.mubr.msk.bf16.vlgmr.msra.gmra.mrb[0].mxu0 %vm2102_vm0, %v4213_v40  ;;  %v2869_v40 = vpack.c.bf16 %v8291_v24, %v6978_v21  ;;  %v6925_v24 = vld [vmem:[%s9093_s4 + $0xe0] sm:$0xff]   ;;  %v3350_v21 = vld [vmem:[#allocation2 + $0x30] sm:$0xff] }
 0x27e   : > { %6496 = vmatpush3.bf16.msra.mxu0 %v6918_v13  ;;  %6491 = vmatprep.mubr.msk.bf16.mxu0 %vm2102_vm0, %v8475_v14 }
 0x27f   : > { %6306 = vmatpush3.bf16.msra.mxu1 %v6919_v43  ;;  %6497 = vmatprep.subr.bf16.mxu0 %v6920_v42  ;;  %v6950_v43 = vld [vmem:[%s9093_s4 + $0x2c0] sm:$0xff]  }
 0x280   : > { %6307 = vmatprep.subr.bf16.mxu1 %v6921_v44 }
 0x282   : > { %6300 = vmatmul.mubr.msk.bf16.gmra.mrb[4].mxu1 %vm2102_vm0, %v8649_v34  ;;  %6498 = vmatpush3.bf16.msra.mxu0 %v6920_v42  ;;  %v6951_v42 = vld [vmem:[%s9093_s4 + $0x148] sm:$0xff]  }
 0x283   : > { %6308 = vmatpush3.bf16.msra.mxu1 %v6921_v44  ;;  %6311 = vmatprep.mubr.msk.bf16.mxu1 %vm2102_vm0, %v2869_v40  ;;  %v4696_v44 = vld [vmem:[#allocation2 + $0x71] sm:$0xff] }
 0x284   : > { %6499 = vmatprep.subr.bf16.mxu0 %v6922_v48  ;;  %6309 = vmatprep.subr.bf16.mxu1 %v6923_v33  ;;  %v4700_v40 = vld [vmem:[#allocation2 + $0xb1] sm:$0xff] }
 0x285   : > { %6492 = vmatmul.mubr.msk.bf16.gmra.mrb[4].mxu0 %vm2102_vm0, %v4215_v0  ;;  %v6954_v0 = vld [vmem:[%s9093_s4 + $0x2d0] sm:$0xff]  }
 0x286   : > { %6500 = vmatpush3.bf16.msra.mxu0 %v6922_v48  ;;  %6503 = vmatprep.mubr.msk.bf16.mxu0 %vm2102_vm0, %v4334_v55  ;;  %v6929_v55 = vld [vmem:[%s9093_s4 + $0xf0] sm:$0xff]   ;;  %v8931_v48 = vpack.c.bf16 %v4696_v44, %v4695_v51  ;;  %v5063_v51 = vld [vmem:[#allocation2 + $0x84] sm:$0xff] }
 0x287   : > { %6310 = vmatpush3.bf16.msra.mxu1 %v6923_v33  ;;  %6501 = vmatprep.subr.bf16.mxu0 %v6924_v6  ;;  %v6953_v33 = vld [vmem:[%s9093_s4 + $0x150] sm:$0xff]  }
 0x288   : > { %6319 = vmatprep.subr.bf16.mxu1 %v6925_v24 }
 0x28a   : > { %6312 = vmatmul.mubr.msk.bf16.vlgmr.msra.gmra.mrb[0].mxu1 %vm2102_vm0, %v8352_v39  ;;  %6502 = vmatpush3.bf16.msra.mxu0 %v6924_v6  ;;  %v2984_v39 = vld [vmem:[#allocation2 + $0x22] sm:$0xff]  ;;  %v6955_v6 = vld [vmem:[%s9093_s4 + $0x158] sm:$0xff]  }
 0x28b   : > { %6315 = vmatprep.mubr.msk.bf16.mxu1 %vm2102_vm0, %v8693_v32  ;;  %6320 = vmatpush3.bf16.msra.mxu1 %v6925_v24  ;;  %v2991_v34 = vpack.c.bf16 %v2984_v39, %v8553_v31  ;;  %v6933_v31 = vld [vmem:[%s9093_s4 + $0x100] sm:$0xff]   ;;  %v9248_v32 = vpack.c.bf16 %v8301_v45, %v8287_v18  ;;  %v3107_v18 = vld [vmem:[#allocation2 + $0x33] sm:$0xff] }
 0x28c   : > { %6511 = vmatprep.subr.bf16.mxu0 %v6926_v49  ;;  %6321 = vmatprep.subr.bf16.mxu1 %v6927_v63  ;;  %v3114_v45 = vpack.c.bf16 %v8364_v4, %v3107_v18  ;;  %v6944_v4 = vld [vmem:[%s9093_s4 + $0x2a8] sm:$0xff]   ;;  %v3353_v39 = vld [vmem:[#allocation2 + $0x60] sm:$0xff]  ;;  %v4938_v18 = vld [vmem:[#allocation2 + $0x53] sm:$0xff] }
 0x28d   : > { %6504 = vmatmul.mubr.msk.bf16.vlgmr.msra.gmra.mrb[0].mxu0 %vm2102_vm0, %v8454_v52 }
 0x28e   : > { %6512 = vmatpush3.bf16.msra.mxu0 %v6926_v49  ;;  %6507 = vmatprep.mubr.msk.bf16.mxu0 %vm2102_vm0, %v8477_v29  ;;  %v4704_v49 = vpack.c.bf16 %v4700_v40, %v8715_v41  ;;  %v6957_v41 = vld [vmem:[%s9093_s4 + $0x160] sm:$0xff]  }
 0x28f   : > { %6322 = vmatpush3.bf16.msra.mxu1 %v6927_v63  ;;  %6513 = vmatprep.subr.bf16.mxu0 %v6928_v11  ;;  %v6956_v63 = vld [vmem:[%s9093_s4 + $0x2d8] sm:$0xff]   ;;  %v5224_v40 = vld [vmem:[%s9096_s7 + $0x20] sm:$0xff] }
 0x290   : > { %6323 = vmatprep.subr.bf16.mxu1 %v6929_v55 }
 0x292   : > { %6316 = vmatmul.mubr.msk.bf16.gmra.mrb[4].mxu1 %vm2102_vm0, %v8700_v3  ;;  %6514 = vmatpush3.bf16.msra.mxu0 %v6928_v11  ;;  %v6940_v3 = vld [vmem:[%s9093_s4 + $0x298] sm:$0xff]   ;;  %v4823_v11 = vpack.c.bf16 %v8830_v37, %v8823_v10 }
 0x293   : > { %6324 = vmatpush3.bf16.msra.mxu1 %v6929_v55  ;;  %6327 = vmatprep.mubr.msk.bf16.mxu1 %vm2102_vm0, %v2991_v34  ;;  %v3352_v55 = vld [vmem:[#allocation2 + $0x50] sm:$0xff] }
 0x294   : > { %6515 = vmatprep.subr.bf16.mxu0 %v6930_v26  ;;  %6325 = vmatprep.subr.bf16.mxu1 %v6931_v23 }
 0x295   : > { %6508 = vmatmul.mubr.msk.bf16.gmra.mrb[4].mxu0 %vm2102_vm0, %v4337_v54  ;;  %v6958_v54 = vld [vmem:[%s9093_s4 + $0x2e0] sm:$0xff]  }
 0x296   : > { %6516 = vmatpush3.bf16.msra.mxu0 %v6930_v26  ;;  %6519 = vmatprep.mubr.msk.bf16.mxu0 %vm2102_vm0, %v4456_v16  ;;  %v6936_v16 = vld [vmem:[%s9093_s4 + $0x288] sm:$0xff]   ;;  %v3354_v26 = vld [vmem:[#allocation2 + $0x70] sm:$0xff] }
 0x297   : > { %6326 = vmatpush3.bf16.msra.mxu1 %v6931_v23  ;;  %6517 = vmatprep.subr.bf16.mxu0 %v6932_v25  ;;  %v4817_v23 = vld [vmem:[#allocation2 + $0x62] sm:$0xff]  ;;  %v3359_v10 = vpack.c.bf16 %v3354_v26, %v3353_v39  ;;  %v5230_v26 = vld [vmem:[%s9096_s7 + $0x50] sm:$0xff] }
 0x298   : > { %6335 = vmatprep.subr.bf16.mxu1 %v6933_v31 }
 0x29a   : > { %6328 = vmatmul.mubr.msk.bf16.vlgmr.msra.gmra.mrb[0].mxu1 %vm2102_vm0, %v2992_v59  ;;  %6518 = vmatpush3.bf16.msra.mxu0 %v6932_v25  ;;  %v6959_v25 = vld [vmem:[%s9093_s4 + $0x168] sm:$0xff]   ;;  %v4820_v59 = vld [vmem:[#allocation2 + $0x92] sm:$0xff] }
 0x29b   : > { %6331 = vmatprep.mubr.msk.bf16.mxu1 %vm2102_vm0, %v2993_v60  ;;  %6336 = vmatpush3.bf16.msra.mxu1 %v6933_v31  ;;  %v4818_v31 = vld [vmem:[#allocation2 + $0x72] sm:$0xff] }
 0x29c   : > { %6527 = vmatprep.subr.bf16.mxu0 %v6934_v58  ;;  %6337 = vmatprep.subr.bf16.mxu1 %v6935_v19  ;;  %v4824_v37 = vpack.c.bf16 %v4818_v31, %v4817_v23  ;;  %v6961_v60 = vld [vmem:[%s9093_s4 + $0x170] sm:$0xff]   ;;  %v5231_v23 = vld [vmem:[%s9096_s7 + $0x58] sm:$0xff] }
 0x29d   : > { %6520 = vmatmul.mubr.msk.bf16.vlgmr.msra.gmra.mrb[0].mxu0 %vm2102_vm0, %v8459_v27 }
 0x29e   : > { %6528 = vmatpush3.bf16.msra.mxu0 %v6934_v58  ;;  %6523 = vmatprep.mubr.msk.bf16.mxu0 %vm2102_vm0, %v8491_v22  ;;  %v6960_v58 = vld [vmem:[%s9093_s4 + $0x2e8] sm:$0xff]  }
 0x29f   : > { %6338 = vmatpush3.bf16.msra.mxu1 %v6935_v19  ;;  %6529 = vmatprep.subr.bf16.mxu0 %v6936_v16  ;;  %v4825_v19 = vpack.c.bf16 %v4820_v59, %v4819_v20  ;;  %v5235_v20 = vld [vmem:[%s9096_s7 + $0x78] sm:$0xff] }
 0x2a0   : > { %6339 = vmatprep.subr.bf16.mxu1 %v6937_v7 }
 0x2a2   : > { %6332 = vmatmul.mubr.msk.bf16.gmra.mrb[4].mxu1 %vm2102_vm0, %v8475_v14  ;;  %6530 = vmatpush3.bf16.msra.mxu0 %v6936_v16  ;;  %v6941_v14 = vld [vmem:[%s9093_s4 + $0x120] sm:$0xff]  }
 0x2a3   : > { %6340 = vmatpush3.bf16.msra.mxu1 %v6937_v7  ;;  %6343 = vmatprep.mubr.msk.bf16.mxu1 %vm2102_vm0, %v9248_v32  ;;  %v3471_v16 = vld [vmem:[#allocation2 + $0x21] sm:$0xff]  ;;  %v3472_v7 = vld [vmem:[#allocation2 + $0x31] sm:$0xff] }
 0x2a4   : > { %6531 = vmatprep.subr.bf16.mxu0 %v6938_v47  ;;  %6341 = vmatprep.subr.bf16.mxu1 %v6939_v57  ;;  %v6963_v32 = vld [vmem:[%s9093_s4 + $0x178] sm:$0xff]  }
 0x2a5   : > { %6524 = vmatmul.mubr.msk.bf16.gmra.mrb[4].mxu0 %vm2102_vm0, %v4459_v8  ;;  %v3479_v8 = vpack.c.bf16 %v3472_v7, %v3471_v16 }
 0x2a6   : > { %6532 = vmatpush3.bf16.msra.mxu0 %v6938_v47  ;;  %6535 = vmatprep.mubr.msk.bf16.mxu0 %vm2102_vm0, %v8517_v1  ;;  %v6945_v1 = vld [vmem:[%s9093_s4 + $0x130] sm:$0xff]  }
 0x2a7   : > { %6342 = vmatpush3.bf16.msra.mxu1 %v6939_v57  ;;  %6533 = vmatprep.subr.bf16.mxu0 %v6940_v3  ;;  %v4822_v47 = vld [vmem:[#allocation2 + $0xb2] sm:$0xff] }
 0x2a8   : > { %6351 = vmatprep.subr.bf16.mxu1 %v6941_v14  ;;  %v6962_v57 = vld [vmem:[%s9093_s4 + $0x2f0] sm:$0xff]  }
 0x2aa   : > { %6344 = vmatmul.mubr.msk.bf16.vlgmr.msra.gmra.mrb[0].mxu1 %vm2102_vm0, %v3114_v45  ;;  %6534 = vmatpush3.bf16.msra.mxu0 %v6940_v3  ;;  %v4826_v3 = vpack.c.bf16 %v4822_v47, %v8763_v5  ;;  %v6964_v45 = vld [vmem:[%s9093_s4 + $0x2f8] sm:$0xff]   ;;  %v4939_v5 = vld [vmem:[#allocation2 + $0x63] sm:$0xff] }
 0x2ab   : > { %6347 = vmatprep.mubr.msk.bf16.mxu1 %vm2102_vm0, %v8454_v52  ;;  %6352 = vmatpush3.bf16.msra.mxu1 %v6941_v14  ;;  %v6946_v52 = vld [vmem:[%s9093_s4 + $0x2b0] sm:$0xff]   ;;  %v4937_v14 = vld [vmem:[#allocation2 + $0x43] sm:$0xff] }
 0x2ac   : > { %6543 = vmatprep.subr.bf16.mxu0 %v6942_v62  ;;  %6353 = vmatprep.subr.bf16.mxu1 %v6943_v46 }
 0x2ad   : > { %6536 = vmatmul.mubr.msk.bf16.vlgmr.msra.gmra.mrb[0].mxu0 %vm2102_vm0, %v8545_v53  ;;  %v4694_v53 = vld [vmem:[#allocation2 + $0x51] sm:$0xff] }
 0x2ae   : > { %6544 = vmatpush3.bf16.msra.mxu0 %v6942_v62  ;;  %6539 = vmatprep.mubr.msk.bf16.mxu0 %vm2102_vm0, %v8504_v36  ;;  %v8913_v13 = vpack.c.bf16 %v4694_v53, %v4693_v17  ;;  %v4945_v62 = vpack.c.bf16 %v4938_v18, %v4937_v14  ;;  %v6967_v17 = vld [vmem:[%s9093_s4 + $0x310] sm:$0xff]   ;;  %v5987_v18 = vld [vmem:[%s9095_s6] ss:$0 sm:$0xff] }
 0x2af   : > { %6354 = vmatpush3.bf16.msra.mxu1 %v6943_v46  ;;  %6545 = vmatprep.subr.bf16.mxu0 %v6944_v4  ;;  %v4940_v46 = vld [vmem:[#allocation2 + $0x73] sm:$0xff] }
 0x2b0   : > { %6355 = vmatprep.subr.bf16.mxu1 %v6945_v1  ;;  %v4946_v12 = vpack.c.bf16 %v4940_v46, %v4939_v5 }
 0x2b2   : > { %6348 = vmatmul.mubr.msk.bf16.gmra.mrb[4].mxu1 %vm2102_vm0, %v8477_v29  ;;  %6546 = vmatpush3.bf16.msra.mxu0 %v6944_v4  ;;  %v3236_v29 = vpack.c.bf16 %v8366_v15, %v3229_v35  ;;  %v6952_v15 = vld [vmem:[%s9093_s4 + $0x2c8] sm:$0xff]  }
 0x2b3   : > { %6356 = vmatpush3.bf16.msra.mxu1 %v6945_v1  ;;  %6359 = vmatprep.mubr.msk.bf16.mxu1 %vm2102_vm0, %v9249_v38  ;;  %v4941_v4 = vld [vmem:[#allocation2 + $0x83] sm:$0xff]  ;;  %v4942_v1 = vld [vmem:[#allocation2 + $0x93] sm:$0xff] }
 0x2b4   : > { %6547 = vmatprep.subr.bf16.mxu0 %v6946_v52  ;;  %6357 = vmatprep.subr.bf16.mxu1 %v6947_v30  ;;  %v5059_v38 = vld [vmem:[#allocation2 + $0x44] sm:$0xff] }
 0x2b5   : > { %6540 = vmatmul.mubr.msk.bf16.gmra.mrb[4].mxu0 %vm2102_vm0, %v4582_v61  ;;  %v4944_v61 = vld [vmem:[#allocation2 + $0xb3] sm:$0xff]  ;;  %v5061_v35 = vld [vmem:[#allocation2 + $0x64] sm:$0xff] }
 0x2b6   : > { %6548 = vmatpush3.bf16.msra.mxu0 %v6946_v52  ;;  %6551 = vmatprep.mubr.msk.bf16.mxu0 %vm2102_vm0, %v8913_v13  ;;  %v6966_v52 = vld [vmem:[%s9093_s4 + $0x308] sm:$0xff]   ;;  %v4948_v53 = vpack.c.bf16 %v4944_v61, %v8808_v28  ;;  %v5062_v28 = vld [vmem:[#allocation2 + $0x74] sm:$0xff] }
 0x2b7   : > { %6358 = vmatpush3.bf16.msra.mxu1 %v6947_v30  ;;  %6549 = vmatprep.subr.bf16.mxu0 %v6948_v50  ;;  %v4947_v30 = vpack.c.bf16 %v4942_v1, %v4941_v4 }
 0x2b8   : > { %6367 = vmatprep.subr.bf16.mxu1 %v6949_v9 }
 0x2ba   : > { %6360 = vmatmul.mubr.msk.bf16.vlgmr.msra.gmra.mrb[0].mxu1 %vm2102_vm0, %v3236_v29  ;;  %6550 = vmatpush3.bf16.msra.mxu0 %v6948_v50  ;;  %v5060_v50 = vld [vmem:[#allocation2 + $0x54] sm:$0xff] }
 0x2bb   : > { %6363 = vmatprep.mubr.msk.bf16.mxu1 %vm2102_vm0, %v8459_v27  ;;  %6368 = vmatpush3.bf16.msra.mxu1 %v6949_v9  ;;  %v3349_v27 = vld [vmem:[#allocation2 + $0x20] sm:$0xff]  ;;  %v5067_v9 = vpack.c.bf16 %v5060_v50, %v5059_v38  ;;  %v5064_v29 = vld [vmem:[#allocation2 + $0x94] sm:$0xff] }
 0x2bc   : > { %6559 = vmatprep.subr.bf16.mxu0 %v6950_v43  ;;  %6369 = vmatprep.subr.bf16.mxu1 %v6951_v42  ;;  %v3357_v24 = vpack.c.bf16 %v3350_v21, %v3349_v27  ;;  %v5222_v21 = vld [vmem:[%s9096_s7 + $0x10] sm:$0xff] }
 0x2bd   : > { %6552 = vmatmul.mubr.msk.bf16.vlgmr.msra.gmra.mrb[0].mxu0 %vm2102_vm0, %v8931_v48 }
 0x2be   : > { %6560 = vmatpush3.bf16.msra.mxu0 %v6950_v43  ;;  %6555 = vmatprep.mubr.msk.bf16.mxu0 %vm2102_vm0, %v8508_v56  ;;  %v5068_v43 = vpack.c.bf16 %v5062_v28, %v5061_v35 }
 0x2bf   : > { %6370 = vmatpush3.bf16.msra.mxu1 %v6951_v42  ;;  %6561 = vmatprep.subr.bf16.mxu0 %v6952_v15  ;;  %v5066_v42 = vld [vmem:[#allocation2 + $0xb4] sm:$0xff] }
 0x2c0   : > { %6371 = vmatprep.subr.bf16.mxu1 %v6953_v33  ;;  %v5070_v44 = vpack.c.bf16 %v5066_v42, %v8858_v2  ;;  %v5223_v2 = vld [vmem:[%s9096_s7 + $0x18] sm:$0xff] }
 0x2c2   : > { %6364 = vmatmul.mubr.msk.bf16.gmra.mrb[4].mxu1 %vm2102_vm0, %v8491_v22  ;;  %6562 = vmatpush3.bf16.msra.mxu0 %v6952_v15  ;;  %v3351_v22 = vld [vmem:[#allocation2 + $0x40] sm:$0xff]  ;;  %v5221_v15 = vld [vmem:[%s9096_s7 + $0x8] sm:$0xff] }
 0x2c3   : > { %6372 = vmatpush3.bf16.msra.mxu1 %v6953_v33  ;;  %6375 = vmatprep.mubr.msk.bf16.mxu1 %vm2102_vm0, %v3357_v24  ;;  %v3358_v34 = vpack.c.bf16 %v3352_v55, %v3351_v22  ;;  %v6989_v33 = vmov 0.0|0.0   ;;  %v5229_v22 = vld [vmem:[%s9096_s7 + $0x48] sm:$0xff]  ;;  %v9250_v55 = vmov 0.0  }
 0x2c4   : > { %6563 = vmatprep.subr.bf16.mxu0 %v6954_v0  ;;  %6373 = vmatprep.subr.bf16.mxu1 %v6955_v6 }
 0x2c5   : > { %6556 = vmatmul.mubr.msk.bf16.gmra.mrb[4].mxu0 %vm2102_vm0, %v4704_v49  ;;  %v5226_v49 = vld [vmem:[%s9096_s7 + $0x30] sm:$0xff] }
 0x2c6   : > { %6564 = vmatpush3.bf16.msra.mxu0 %v6954_v0  ;;  %6567 = vmatprep.mubr.msk.bf16.mxu0 %vm2102_vm0, %v4823_v11  ;;  %v6646_v0 = vpack.c.bf16 %v5223_v2, %v5222_v21  ;;  %v5307_v2 = vlaneseq }
 0x2c7   : > { %6374 = vmatpush3.bf16.msra.mxu1 %v6955_v6  ;;  %6565 = vmatprep.subr.bf16.mxu0 %v6956_v63  ;;  %v5225_v6 = vld [vmem:[%s9096_s7 + $0x28] sm:$0xff] }
 0x2c8   : > { %6383 = vmatprep.subr.bf16.mxu1 %v6957_v41  ;;  %v6649_v24 = vpack.c.bf16 %v5225_v6, %v5224_v40  ;;  %v5308_v40 = vand.u32 127, %v5307_v2 }
 0x2ca   : > { %6376 = vmatmul.mubr.msk.bf16.vlgmr.msra.gmra.mrb[0].mxu1 %vm2102_vm0, %v3358_v34  ;;  %6566 = vmatpush3.bf16.msra.mxu0 %v6956_v63  ;;  %v5227_v63 = vld [vmem:[%s9096_s7 + $0x38] sm:$0xff]  ;;  %v6658_v34 = vpack.c.bf16 %v5231_v23, %v5230_v26  ;;  %vm5310_vm3 = vcmp.lt.s32.totalorder %v5308_v40, 3  ;;  %vm5328_vm5 = vcmp.ge.s32.totalorder %v5308_v40, 3  ;;  %vm5329_vm6 = vcmp.lt.s32.totalorder %v5308_v40, 8 }
 0x2cb   : > { %6379 = vmatprep.mubr.msk.bf16.mxu1 %vm2102_vm0, %v3359_v10  ;;  %6384 = vmatpush3.bf16.msra.mxu1 %v6957_v41  ;;  %v6652_v11 = vpack.c.bf16 %v5227_v63, %v5226_v49  ;;  %v5228_v41 = vld [vmem:[%s9096_s7 + $0x40] sm:$0xff]  ;;  %v5234_v10 = vld [vmem:[%s9096_s7 + $0x70] sm:$0xff]  ;;  %vm5330_vm7 = vmand %vm5328_vm5, %vm5329_vm6 }
 0x2cc   : > { %6575 = vmatprep.subr.bf16.mxu0 %v6958_v54  ;;  %6385 = vmatprep.subr.bf16.mxu1 %v6959_v25  ;;  %v6655_v39 = vpack.c.bf16 %v5229_v22, %v5228_v41  ;;  %v6664_v59 = vpack.c.bf16 %v5235_v20, %v5234_v10 }
 0x2cd   : > { %6568 = vmatmul.mubr.msk.bf16.vlgmr.msra.gmra.mrb[0].mxu0 %vm2102_vm0, %v4824_v37 }
 0x2ce   : > { %6576 = vmatpush3.bf16.msra.mxu0 %v6958_v54  ;;  %6571 = vmatprep.mubr.msk.bf16.mxu0 %vm2102_vm0, %v4825_v19  ;;  %v5232_v54 = vld [vmem:[%s9096_s7 + $0x60] sm:$0xff] }
 0x2cf   : > { %6386 = vmatpush3.bf16.msra.mxu1 %v6959_v25  ;;  %6577 = vmatprep.subr.bf16.mxu0 %v6960_v58  ;;  %v5233_v25 = vld [vmem:[%s9096_s7 + $0x68] sm:$0xff] }
 0x2d0   : > { %6387 = vmatprep.subr.bf16.mxu1 %v6961_v60  ;;  %v6661_v31 = vpack.c.bf16 %v5233_v25, %v5232_v54 }
 0x2d2   : > { %6380 = vmatmul.mubr.msk.bf16.gmra.mrb[4].mxu1 %vm2102_vm0, %v8504_v36  ;;  %6578 = vmatpush3.bf16.msra.mxu0 %v6960_v58  ;;  %v6965_v36 = vld [vmem:[%s9093_s4 + $0x300] sm:$0xff]  }
 0x2d3   : > { %6388 = vmatpush3.bf16.msra.mxu1 %v6961_v60  ;;  %6391 = vmatprep.mubr.msk.bf16.mxu1 %vm2102_vm0, %v3479_v8  ;;  %v5986_v8 = vld [vmem:[%s9094_s5] ss:$0 sm:$0xff] }
 0x2d4   : > { %6579 = vmatprep.subr.bf16.mxu0 %v6962_v57  ;;  %6389 = vmatprep.subr.bf16.mxu1 %v6963_v32 }
 0x2d5   : > { %6572 = vmatmul.mubr.msk.bf16.gmra.mrb[4].mxu0 %vm2102_vm0, %v4826_v3 }
 0x2d6   : > { %6580 = vmatpush3.bf16.msra.mxu0 %v6962_v57  ;;  %6583 = vmatprep.mubr.msk.bf16.mxu0 %vm2102_vm0, %v4945_v62 }
 0x2d7   : > { %6390 = vmatpush3.bf16.msra.mxu1 %v6963_v32  ;;  %6581 = vmatprep.subr.bf16.mxu0 %v6964_v45 }
 0x2d8   : > { %6642 = vmatprep.subr.bf16.mxu1 %v6989_v33 }
 0x2da   : > { %6392 = vmatmul.mubr.msk.bf16.vlgmr.msra.gmra.mrb[0].mxu1 %vm2102_vm0, %v8913_v13  ;;  %6582 = vmatpush3.bf16.msra.mxu0 %v6964_v45  ;;  %v6968_v13 = vld [vmem:[%s9093_s4 + $0x318] sm:$0xff]  }
 0x2db   : > { %6395 = vmatprep.mubr.msk.bf16.mxu1 %vm2102_vm0, %v8931_v48  ;;  %6591 = vmatprep.subr.bf16.mxu0 %v6965_v36  ;;  %v5220_v48 = vld [vmem:[%s9096_s7] sm:$0xff] }
 0x2dc   : > { %v6643_v27 = vpack.c.bf16 %v5221_v15, %v5220_v48 }
 0x2dd   : > { %6584 = vmatmul.mubr.msk.bf16.vlgmr.msra.gmra.mrb[0].mxu0 %vm2102_vm0, %v4946_v12 }
 0x2de   : > { %6592 = vmatpush3.bf16.msra.mxu0 %v6965_v36  ;;  %6587 = vmatprep.mubr.msk.bf16.mxu0 %vm2102_vm0, %v4947_v30 }
 0x2df   : > { %6593 = vmatprep.subr.bf16.mxu0 %v6966_v52  ;;  %6644 = vmatpush3.bf16.msra.mxu1 %v6643_v27 }
 0x2e0   : > { %6645 = vmatprep.subr.bf16.mxu1 %v6989_v33 }
 0x2e2   : > { %6396 = vmatmul.mubr.msk.bf16.gmra.mrb[4].mxu1 %vm2102_vm0, %v8508_v56  ;;  %6594 = vmatpush3.bf16.msra.mxu0 %v6966_v52  ;;  %v5069_v56 = vpack.c.bf16 %v5064_v29, %v5063_v51 }
 0x2e3   : > { %6595 = vmatprep.subr.bf16.mxu0 %v6967_v17  ;;  %6647 = vmatpush3.bf16.msra.mxu1 %v6646_v0  ;;  %v5236_v0 = vld [vmem:[%s9097_s8] sm:$0x1] }
 0x2e4   : > { %6648 = vmatprep.subr.bf16.mxu1 %v6989_v33  ;;  %6639 = vmatprep.mubr.msk.f32.mxu1 %vm6990_vm2, %v9250_v55 }
 0x2e5   : > { %6588 = vmatmul.mubr.msk.bf16.gmra.mrb[4].mxu0 %vm2102_vm0, %v4948_v53 }
 0x2e6   : > { %6596 = vmatpush3.bf16.msra.mxu0 %v6967_v17  ;;  %6599 = vmatprep.mubr.msk.bf16.mxu0 %vm2102_vm0, %v5067_v9 }
 0x2e7   : > { %6597 = vmatprep.subr.bf16.mxu0 %v6968_v13  ;;  %6650 = vmatpush3.bf16.msra.mxu1 %v6649_v24 }
 0x2e8   : > { %6651 = vmatprep.subr.bf16.mxu1 %v6989_v33 }
 0x2ea   : > { %6598 = vmatpush3.bf16.msra.mxu0 %v6968_v13 }
 0x2eb   : > { %6653 = vmatpush3.bf16.msra.mxu1 %v6652_v11 }
 0x2ec   : > { %6654 = vmatprep.subr.bf16.mxu1 %v6989_v33 }
 0x2ed   : > { %6600 = vmatmul.mubr.msk.bf16.vlgmr.msra.gmra.mrb[0].mxu0 %vm2102_vm0, %v5068_v43 }
 0x2ee   : > { %6603 = vmatprep.mubr.msk.bf16.mxu0 %vm2102_vm0, %v5069_v56 }
 0x2ef   : > { %6656 = vmatpush3.bf16.msra.mxu1 %v6655_v39 }
 0x2f0   : > { %6657 = vmatprep.subr.bf16.mxu1 %v6989_v33 }
 0x2f3   : > { %6659 = vmatpush3.bf16.msra.mxu1 %v6658_v34 }
 0x2f4   : > { %6660 = vmatprep.subr.bf16.mxu1 %v6989_v33 }
 0x2f5   : > { %6604 = vmatmul.mubr.msk.bf16.gmra.mrb[4].mxu0 %vm2102_vm0, %v5070_v44 }
 0x2f7   : > { %6662 = vmatpush3.bf16.msra.mxu1 %v6661_v31 }
 0x2f8   : > { %6663 = vmatprep.subr.bf16.mxu1 %v6989_v33 }
 0x2fb   : > { %6665 = vmatpush3.bf16.msra.mxu1 %v6664_v59 }
 0x3ad   : > { %v6393_v37 = vpop.f32.mrb[0].mxu1 }
 0x3ae   : > { %v3562_v58 = vpop.f32.mrb[1].mxu1 }
 0x3af   : > { %v6394_v19 = vpop.f32.mrb[2].mxu1 }
 0x3b0   : > { %v3565_v60 = vpop.f32.mrb[3].mxu1 }
 0x3b5   : > { %v6397_v16 = vpop.f32.mrb[4].mxu1 }
 0x3b6   : > { %v3576_v7 = vpop.f32.mrb[5].mxu1 }
 0x3b7   : > { %v6398_v47 = vpop.f32.mrb[6].mxu1 }
 0x3b8   : > { %v3579_v57 = vpop.f32.mrb[7].mxu1 }
 0x3c0   : > { %v6601_v32 = vpop.f32.mrb[0].mxu0 }
 0x3c1   : > { %v6666_v3 = vadd.f32 %v6601_v32, %v6393_v37  ;;  %v5150_v14 = vpop.f32.mrb[1].mxu0 }
 0x3c2   : > { %v6667_v45 = vadd.f32 %v5150_v14, %v3562_v58  ;;  %v6602_v62 = vpop.f32.mrb[2].mxu0 }
 0x3c3   : > { %v5189_v36 = vmul.f32 %v6666_v3, %v5986_v8  ;;  %v5153_v5 = vpop.f32.mrb[3].mxu0 }
 0x3c4   : > { %v5188_v46 = vmul.f32 %v6667_v45, %v5986_v8 }
 0x3c5   : > { %v5200_v4 = vadd.f32 %v5987_v18, %v5189_v36 }
 0x3c6   : > { %v5199_v1 = vadd.f32 %v5987_v18, %v5188_v46 }
 0x3c7   : > { %v5204_v12 = vmax.f32 %v5200_v4, 0.0 }
 0x3c8   : > { %v5203_v52 = vmax.f32 %v5199_v1, 0.0  ;;  %v6605_v30 = vpop.f32.mrb[4].mxu0 }
 0x3c9   : > { %v6668_v61 = vadd.f32 %v6605_v30, %v6397_v16  ;;  %v5164_v17 = vpop.f32.mrb[5].mxu0 }
 0x3ca   : > { %v5207_v53 = vmax.f32 %v5203_v52, %v5204_v12  ;;  %v6669_v38 = vadd.f32 %v5164_v17, %v3576_v7  ;;  %v6606_v50 = vpop.f32.mrb[6].mxu0 }
 0x3cb   : > { %v5191_v13 = vmul.f32 %v6668_v61, %v5986_v8  ;;  %v5167_v9 = vpop.f32.mrb[7].mxu0 }
 0x3cc   : > { %v5190_v35 = vmul.f32 %v6669_v38, %v5986_v8 }
 0x3cd   : > { %v5202_v28 = vadd.f32 %v5987_v18, %v5191_v13 }
 0x3ce   : > { %v5201_v51 = vadd.f32 %v5987_v18, %v5190_v35 }
 0x3cf   : > { %v5206_v43 = vmax.f32 %v5202_v28, 0.0 }
 0x3d0   : > { %v5205_v29 = vmax.f32 %v5201_v51, 0.0 }
 0x3d2   : > { %v5208_v56 = vmax.f32 %v5207_v53, %v5205_v29 }
 0x3d4   : > { %v5209_v42 = vmax.f32 %v5208_v56, %v5206_v43 }
 0x3d6   : > { %v5211_v44 = vrot.slane %v5209_v42, 2  ;;  %v5214_v15 = vrot.slane %v5209_v42, 4  ;;  %v5217_v27 = vrot.slane %v5209_v42, 6 }
 0x3d8   : > { %v5213_v48 = vmax.f32 %v5209_v42, %v5211_v44 }
 0x3da   : > { %v5216_v33 = vmax.f32 %v5213_v48, %v5214_v15 }
 0x3dc   : > { %v5219_v21 = vmax.f32 %v5216_v33, %v5217_v27 }
 0x3de   : > { %6640 = vmatmul.mubr.f32.vlgmr.msra.gmra.mrb[8].mxu1 %v5219_v21 }
 0x4b1   : > { %v5303_v6 = vpop.f32.mrb[8].mxu1 }
 0x4b2   : > { %v5304_v24 = vadd.f32 %v5303_v6, %v5236_v0  ;;  %v6641_v49 = vpop.f32.mrb[9].mxu1 }
 0x4b4   : > { %v5312_v63 = vsel %vm5310_vm3, %v5304_v24, -inf  ;;  %v5331_v34 = vsub.f32 0.0, %v5304_v24 }
 0x4b5   : > { %v5314_v11 = vsel %vm5313_vm4, %v5312_v63, -inf }
 0x4b6   : > { %5315 = vmax.xlane.f32.xlu0 %v5314_v11  ;;  %v5332_v54 = vmul.f32 1.442695, %v5331_v34 }
 0x543   : > { %v5316_v41 = vpop.xlane.xlu0 %5315 }
 0x544   : > { %v5317_v22 = vsub.f32 %v5304_v24, %v5316_v41 }
 0x546   : > { %v5318_v55 = vsel %vm5310_vm3, %v5317_v22, -inf }
 0x547   : > { %v5319_v39 = vmul.f32 1.442695, %v5318_v55 }
 0x549   : > { %6969 = vpow2.f32 %v5319_v39 }
 0x54a   : > { %6971 = vpow2.f32 %v5332_v54 }
 0x553   : > { %v6970_v26 = vpop.eup %6969 }
 0x554   : > { %v5321_v23 = vsel %vm5313_vm4, %v6970_v26, 0.0  ;;  %v6972_v25 = vpop.eup %6971 }
 0x555   : > { %5322 = vadd.xlane.f32.xlu1 %v5321_v23  ;;  %v5334_v10 = vadd.f32 1.0, %v6972_v25 }
 0x5e2   : > { %v5323_v31 = vpop.xlane.xlu1 %5322 }
 0x5e3   : > { %6973 = vlog2.f32 %v5323_v31 }
 0x5e4   : > { %6975 = vrcp.f32 %v5334_v10 }
 0x5ed   : > { %v6974_v20 = vpop.eup %6973 }
 0x5ee   : > { %v5325_v59 = vmul.f32 0.6931472, %v6974_v20  ;;  %v6976_v58 = vpop.eup %6975 }
 0x5f0   : > { %v5326_v37 = vsub.f32 %v5317_v22, %v5325_v59 }
 0x5f2   : > { %v5327_v19 = vsel %vm5310_vm3, %v5326_v37, 0.0 }
 0x5f3   : > { %v5336_v60 = vsel %vm5330_vm7, %v6976_v58, %v5327_v19 }
 0x5f4   : > { %5337 = vst [vmem:[%s328_s26] sm:$0x1] %v5336_v60 }
 0x5f5 PF: > { %s19_s30 = sadd.s32 1, %s6985_s30  }
 0x5f6   : > { %p16_p4 = scmp.ge.s32.totalorder %s19_s30, 4  }
 0x5f8   :  { %18 = sbr.rel (!%p16_p4) target bundleno = 1 (0x1), region = 123 }

</bundles_post_ra>
